<compile_context>
chip_gen: v7x
topology: tpu7x:2x2x1
jax: 0.10.0
libtpu: 0.0.40
codegen_flags: <defaults>
</compile_context>

<pallas_src>
import math

import jax
import jax.numpy as jnp
from jax.experimental import pallas as pl
from jax.experimental.pallas import tpu as pltpu

# Layer sizes from the PyTorch module: l1..l7
L1, L2, L3, L4, L5, L6, L7 = 5, 64, 128, 94, 64, 32, 1
L4P = 128   # L4 padded to a lane-dense width; padded cols/rows are zero -> identical result
K = 4       # k of knn_graph


def _relu(v):
    return jnp.maximum(v, 0.0)


# ----------------------------------------------------------------------------
# Kernel A: per-node EdgeConv (shared MLP, max/mean/add aggregation) + nn1 + nn2
# ----------------------------------------------------------------------------
def _node_kernel(ef_ref, w1_ref, b1_ref, w2_ref, b2_ref,
                 wn1_ref, bn1_ref, wn2_ref, bn2_ref, out_ref):
    k, tn, f2 = ef_ref.shape

    # Fold the K neighbors into the matmul M dimension: one (K*tn, 10) @ (10, 64)
    # and one (K*tn, 64) @ (64, 128) instead of K skinny matmuls. tn is a multiple
    # of 8 so the leading-dim merge is layout-free.
    e = ef_ref[...].reshape(k * tn, f2)

    # nn_conv1 = Sequential(Linear(10,64), ReLU, Linear(64,128), ReLU)  (ReLU after BOTH linears)
    h = _relu(jnp.dot(e, w1_ref[...], preferred_element_type=jnp.float32) + b1_ref[...])
    h = _relu(jnp.dot(h.astype(jnp.bfloat16), w2_ref[...],
                      preferred_element_type=jnp.float32) + b2_ref[...])

    # EdgeConv aggregations over the K neighbors via tile-aligned static slices.
    h_max = h[0:tn, :]
    h_sum = h[0:tn, :]
    for kk in range(1, k):
        hk = h[kk * tn:(kk + 1) * tn, :]
        h_max = jnp.maximum(h_max, hk)
        h_sum = h_sum + hk
    h_mean = h_sum * (1.0 / k)

    # PyTorch: x = relu(cat([x_max, x_mean, x_add], dim=1)); x = nn1(x)
    # Single 384-deep contraction (lane concat of three 128-wide, lane-tile aligned blocks).
    z_in = jnp.concatenate(
        [_relu(h_max), _relu(h_mean), _relu(h_sum)], axis=-1).astype(jnp.bfloat16)
    z = _relu(jnp.dot(z_in, wn1_ref[...], preferred_element_type=jnp.float32) + bn1_ref[...])

    # nn2 (no ReLU after nn2, matching the PyTorch forward)
    out_ref[...] = (jnp.dot(z.astype(jnp.bfloat16), wn2_ref[...],
                            preferred_element_type=jnp.float32) + bn2_ref[...])


def dynedge_node_mlp(ef, node_params, tn=256):
    """ef: [K, N_pad, 2*L1] -> node features [N_pad, L5]."""
    w1, b1, w2, b2, wn1, bn1, wn2, bn2 = node_params
    k, n, f2 = ef.shape
    assert n % tn == 0
    return pl.pallas_call(
        _node_kernel,
        out_shape=jax.ShapeDtypeStruct((n, L5), jnp.float32),
        grid_spec=pltpu.PrefetchScalarGridSpec(
            num_scalar_prefetch=0,
            grid=(n // tn,),
            in_specs=[
                pl.BlockSpec((k, tn, f2), lambda i: (0, i, 0)),
                pl.BlockSpec((2 * L1, L2), lambda i: (0, 0)),
                pl.BlockSpec((1, L2), lambda i: (0, 0)),
                pl.BlockSpec((L2, L3), lambda i: (0, 0)),
                pl.BlockSpec((1, L3), lambda i: (0, 0)),
                pl.BlockSpec((3 * L3, L4P), lambda i: (0, 0)),
                pl.BlockSpec((1, L4P), lambda i: (0, 0)),
                pl.BlockSpec((L4P, L5), lambda i: (0, 0)),
                pl.BlockSpec((1, L5), lambda i: (0, 0)),
            ],
            out_specs=pl.BlockSpec((tn, L5), lambda i: (i, 0)),
        ),
        compiler_params=pltpu.CompilerParams(dimension_semantics=("parallel",)),
    )(ef, w1, b1, w2, b2, wn1, bn1, wn2, bn2)


# ----------------------------------------------------------------------------
# Kernel B: scatter_max/min/sum/mean over graphs + nn3 + nn4, tiled over node chunks
# ----------------------------------------------------------------------------
def _graph_kernel(h_ref, gidc_ref, gidr_ref, inv_cnt_ref,
                  w3a_ref, w3b_ref, w3c_ref, w3d_ref, b3_ref, w4_ref, b4_ref,
                  out_ref, max_acc, min_acc, sum_acc):
    step = pl.program_id(0)
    bpad = max_acc.shape[0]
    breal = out_ref.shape[0]
    NEG = jnp.float32(-jnp.inf)
    POS = jnp.float32(jnp.inf)

    @pl.when(step == 0)
    def _():
        max_acc[...] = jnp.full_like(max_acc, NEG)
        min_acc[...] = jnp.full_like(min_acc, POS)
        sum_acc[...] = jnp.zeros_like(sum_acc)

    h = h_ref[...]                      # (tgn, L5) f32 node features
    gidc = gidc_ref[...]                # (tgn, 1)  int32 graph id per node (node-major)
    gidr = gidr_ref[...]                # (1, tgn)  int32 graph id per node (lane-major)

    # scatter_sum on the MXU: build the (B_pad, tgn) one-hot membership in-kernel.
    row_ids = jax.lax.broadcasted_iota(jnp.int32, (bpad, gidr.shape[1]), 0)
    m_bn = (row_ids == gidr).astype(jnp.float32)                       # (B_pad, tgn)
    sum_acc[...] += jnp.dot(m_bn, h, preferred_element_type=jnp.float32)

    # scatter_max / scatter_min: per-graph masked reduce of this chunk, assembled into a
    # full (B_pad, L5) chunk-max/min, then ONE full-tile accumulator update (no per-row
    # masked stores).
    # TODO(synk): for large B, bound this loop to the graphs present in the chunk via
    #             scalar-prefetched per-chunk [g_start, g_end) (batch sorted by graph).
    row_iota = jax.lax.broadcasted_iota(jnp.int32, (bpad, h.shape[1]), 0)
    cmax = jnp.full((bpad, h.shape[1]), NEG, dtype=jnp.float32)
    cmin = jnp.full((bpad, h.shape[1]), POS, dtype=jnp.float32)
    for g in range(breal):
        mb = gidc == g                                                  # (tgn, 1) bool
        gmax = jnp.max(jnp.where(mb, h, NEG), axis=0, keepdims=True)    # (1, L5)
        gmin = jnp.min(jnp.where(mb, h, POS), axis=0, keepdims=True)    # (1, L5)
        sel = row_iota == g
        cmax = jnp.where(sel, gmax, cmax)
        cmin = jnp.where(sel, gmin, cmin)
    max_acc[...] = jnp.maximum(max_acc[...], cmax)
    min_acc[...] = jnp.minimum(min_acc[...], cmin)

    @pl.when(step == pl.num_programs(0) - 1)
    def _():
        s = sum_acc[...]
        me = s * inv_cnt_ref[...]                    # scatter_mean (inv_cnt guarded > 0 outside)
        a = max_acc[...]
        b = min_acc[...]
        # Guard empty / padded graphs (accumulators still at +/-inf) so no NaN escapes.
        a = jnp.where(jnp.isfinite(a), a, 0.0)
        b = jnp.where(jnp.isfinite(b), b, 0.0)
        # PyTorch: x = relu(cat([max, min, sum, mean], dim=1)); x = nn3(x)
        # Concat-free split-weight form; relu applied per pooled block (identical math).
        z = (jnp.dot(_relu(a), w3a_ref[...], preferred_element_type=jnp.float32)
             + jnp.dot(_relu(b), w3b_ref[...], preferred_element_type=jnp.float32)
             + jnp.dot(_relu(s), w3c_ref[...], preferred_element_type=jnp.float32)
             + jnp.dot(_relu(me), w3d_ref[...], preferred_element_type=jnp.float32)
             + b3_ref[...])
        z = _relu(z)
        y = jnp.dot(z, w4_ref[...], preferred_element_type=jnp.float32) + b4_ref[...]
        out_ref[...] = y[:breal, :]


def dynedge_graph_head(h, gid_col, gid_row, inv_cnt, head_params, num_graphs, bpad, tgn=512):
    """h: [N_pad, L5], gid_col: [N_pad,1], gid_row: [1,N_pad], inv_cnt: [B_pad,1] -> [B, L7]."""
    w3a, w3b, w3c, w3d, b3, w4, b4 = head_params
    n = h.shape[0]
    assert n % tgn == 0
    return pl.pallas_call(
        _graph_kernel,
        out_shape=jax.ShapeDtypeStruct((num_graphs, L7), jnp.float32),
        grid_spec=pltpu.PrefetchScalarGridSpec(
            num_scalar_prefetch=0,
            grid=(n // tgn,),
            in_specs=[
                pl.BlockSpec((tgn, L5), lambda i: (i, 0)),
                pl.BlockSpec((tgn, 1), lambda i: (i, 0)),
                pl.BlockSpec((1, tgn), lambda i: (0, i)),
                pl.BlockSpec((bpad, 1), lambda i: (0, 0)),
                pl.BlockSpec((L5, L6), lambda i: (0, 0)),
                pl.BlockSpec((L5, L6), lambda i: (0, 0)),
                pl.BlockSpec((L5, L6), lambda i: (0, 0)),
                pl.BlockSpec((L5, L6), lambda i: (0, 0)),
                pl.BlockSpec((1, L6), lambda i: (0, 0)),
                pl.BlockSpec((L6, L7), lambda i: (0, 0)),
                pl.BlockSpec((1, L7), lambda i: (0, 0)),
            ],
            out_specs=pl.BlockSpec((num_graphs, L7), lambda i: (0, 0)),
            scratch_shapes=[
                pltpu.VMEM((bpad, L5), jnp.float32),   # running max
                pltpu.VMEM((bpad, L5), jnp.float32),   # running min
                pltpu.VMEM((bpad, L5), jnp.float32),   # running sum
            ],
        ),
        compiler_params=pltpu.CompilerParams(dimension_semantics=("arbitrary",)),
    )(h, gid_col, gid_row, inv_cnt, w3a, w3b, w3c, w3d, b3, w4, b4)


# ----------------------------------------------------------------------------
# Plain-JAX glue: kNN graph (on pos = x[:, :3]) and edge-feature gather.
# TODO(synk): knn_graph (pairwise distances + top_k gather) stays in plain JAX;
#             there is no clean dense Pallas equivalent for the data-dependent gather.
# ----------------------------------------------------------------------------
def knn_neighbors(pos, batch, k):
    """k nearest same-graph neighbors per node (self excluded), like knn_graph(loop=False)."""
    n = pos.shape[0]
    d = jnp.sum((pos[:, None, :] - pos[None, :, :]) ** 2, axis=-1)   # (N, N)
    same_graph = batch[:, None] == batch[None, :]
    valid = same_graph & (~jnp.eye(n, dtype=bool))
    d = jnp.where(valid, d, jnp.inf)
    scores, idx = jax.lax.top_k(-d, k)                               # (N, k)
    # Guard: graphs with <= k nodes yield invalid candidates -> fall back to self
    # (edge feature becomes [x_i, 0]).
    # TODO(synk): torch knn_graph emits fewer edges in that case (smaller mean/add
    #             denominators); exact replication needs a ragged edge list.
    self_idx = jnp.broadcast_to(jnp.arange(n)[:, None], (n, k))
    idx = jnp.where(jnp.isfinite(scores), idx, self_idx)
    return idx


def build_edge_features(x, nbr):
    """ef[k, n, :] = concat([x_n, x_{nbr[n,k]} - x_n]); shape (K, N, 2F)."""
    kk = nbr.shape[1]
    n, f = x.shape
    x_i = jnp.broadcast_to(x[None, :, :], (kk, n, f))                # (K, N, F)
    x_j = jnp.transpose(x[nbr], (1, 0, 2))                           # (K, N, F)
    return jnp.concatenate([x_i, x_j - x_i], axis=-1)                # (K, N, 2F)


# ----------------------------------------------------------------------------
# Parameters (deterministic synthetic init; PyTorch Linear(in, out) stored as
# W with shape [in, out] so the kernels compute x @ W + b).
# ----------------------------------------------------------------------------
def init_params(key):
    def lin(k, fan_in, fan_out):
        kw, kb = jax.random.split(k)
        w = jax.random.normal(kw, (fan_in, fan_out), jnp.float32) / jnp.sqrt(fan_in)
        b = 0.05 * jax.random.normal(kb, (1, fan_out), jnp.float32)
        return w, b

    ks = jax.random.split(key, 6)
    w1, b1 = lin(ks[0], 2 * L1, L2)      # nn_conv1[0]: Linear(10, 64)
    w2, b2 = lin(ks[1], L2, L3)          # nn_conv1[2]: Linear(64, 128)
    wn1, bn1 = lin(ks[2], 3 * L3, L4)    # nn1: Linear(384, 94)
    wn2, bn2 = lin(ks[3], L4, L5)        # nn2: Linear(94, 64)
    w3, b3 = lin(ks[4], 4 * L5, L6)      # nn3: Linear(256, 32)
    w4, b4 = lin(ks[5], L6, L7)          # nn4: Linear(32, 1)
    return (w1, b1, w2, b2, wn1, bn1, wn2, bn2, w3, b3, w4, b4)


def prepare_kernel_params(params):
    """Pad L4 -> L4P, cast the big MXU-facing weights to bf16, split nn3 into slabs."""
    (w1, b1, w2, b2, wn1, bn1, wn2, bn2, w3, b3, w4, b4) = params
    pad4 = L4P - L4
    wn1p = jnp.pad(wn1, ((0, 0), (0, pad4)))      # (384, 128)
    bn1p = jnp.pad(bn1, ((0, 0), (0, pad4)))      # (1, 128)
    wn2p = jnp.pad(wn2, ((0, pad4), (0, 0)))      # (128, 64); zero rows kill padded cols
    node_p = (w1, b1,
              w2.astype(jnp.bfloat16), b2,
              wn1p.astype(jnp.bfloat16), bn1p,
              wn2p.astype(jnp.bfloat16), bn2)
    # nn3 rows: [0:64]=max, [64:128]=min, [128:192]=sum, [192:256]=mean (torch.cat order)
    w3a = w3[0 * L5:1 * L5, :]
    w3b = w3[1 * L5:2 * L5, :]
    w3c = w3[2 * L5:3 * L5, :]
    w3d = w3[3 * L5:4 * L5, :]
    head_p = (w3a, w3b, w3c, w3d, b3, w4, b4)
    return node_p, head_p


def net_forward(x, batch, num_graphs, params, tn=256, tgn=512):
    node_p, head_p = prepare_kernel_params(params)

    # KNNAmp(4, x, batch): graph built on pos = x[:, :3]
    nbr = knn_neighbors(x[:, :3], batch, K)
    ef = build_edge_features(x, nbr)                                   # (K, N, 2*L1)

    # Pad nodes to a multiple of both tile sizes; padded rows are masked out downstream.
    n = x.shape[0]
    tile = tn * tgn // math.gcd(tn, tgn)
    n_pad = int(pl.cdiv(n, tile)) * tile
    ef = jnp.pad(ef, ((0, 0), (0, n_pad - n), (0, 0)))

    # EdgeConv (max/mean/add) + nn1 + nn2 — Pallas kernel A
    h = dynedge_node_mlp(ef, node_p, tn=tn)                            # (n_pad, L5)

    # scatter_max/min/sum/mean + nn3 + nn4 — Pallas kernel B
    bpad = ((num_graphs + 7) // 8) * 8                                 # pad B to 8 sublanes
    batch_p = jnp.pad(batch.astype(jnp.int32), (0, n_pad - n), constant_values=-1)
    gid_col = batch_p[:, None]                                         # (n_pad, 1)
    gid_row = batch_p[None, :]                                         # (1, n_pad)
    gids = jnp.arange(num_graphs, dtype=jnp.int32)
    cnt = jnp.sum((batch[:, None] == gids[None, :]).astype(jnp.float32), axis=0)
    cnt = jnp.maximum(cnt, 1.0)                                        # empty-graph guard
    inv_cnt = jnp.pad(1.0 / cnt, (0, bpad - num_graphs), constant_values=1.0)[:, None]
    return dynedge_graph_head(h, gid_col, gid_row, inv_cnt, head_p,
                              num_graphs, bpad, tgn=tgn)


if __name__ == "__main__":
    key = jax.random.PRNGKey(0)
    kx, kp = jax.random.split(key)

    num_graphs = 2
    nodes_per_graph = 16
    n_nodes = num_graphs * nodes_per_graph          # 32 nodes total

    x = jax.random.normal(kx, (n_nodes, L1), jnp.float32)              # [32, 5]
    batch = jnp.repeat(jnp.arange(num_graphs, dtype=jnp.int32), nodes_per_graph)

    params = init_params(kp)

    out = net_forward(x, batch, num_graphs, params)
    out = jax.block_until_ready(out)
    assert out.shape == (num_graphs, L7)
    assert bool(jnp.all(jnp.isfinite(out)))
    print("KERNEL_OK")
</pallas_src>

<mosaic_0001>
module attributes {stable_mosaic.version = 11 : i64} {
  func.func @_node_kernel(%arg0: i32, %arg1: memref<4x256x10xf32, #tpu.memory_space<vmem>>, %arg2: memref<10x64xf32, #tpu.memory_space<vmem>>, %arg3: memref<1x64xf32, #tpu.memory_space<vmem>>, %arg4: memref<64x128xbf16, #tpu.memory_space<vmem>>, %arg5: memref<1x128xf32, #tpu.memory_space<vmem>>, %arg6: memref<384x128xbf16, #tpu.memory_space<vmem>>, %arg7: memref<1x128xf32, #tpu.memory_space<vmem>>, %arg8: memref<128x64xbf16, #tpu.memory_space<vmem>>, %arg9: memref<1x64xf32, #tpu.memory_space<vmem>>, %arg10: memref<256x64xf32, #tpu.memory_space<vmem>>) attributes {dimension_semantics = [#tpu.dimension_semantics<parallel>], iteration_bounds = array<i64: 2>, scalar_prefetch = 0 : i64, scratch_operands = 0 : i64, tpu.core_type = #tpu.core_type<tc>, window_params = [{transform_indices = @transform_0, window_bounds = array<i64: 4, 256, 10>}, {pipeline_mode = #tpu.pipeline_mode<synchronous>, transform_indices = @transform_1, window_bounds = array<i64: 10, 64>}, {pipeline_mode = #tpu.pipeline_mode<synchronous>, transform_indices = @transform_2, window_bounds = array<i64: 1, 64>}, {pipeline_mode = #tpu.pipeline_mode<synchronous>, transform_indices = @transform_3, window_bounds = array<i64: 64, 128>}, {pipeline_mode = #tpu.pipeline_mode<synchronous>, transform_indices = @transform_4, window_bounds = array<i64: 1, 128>}, {pipeline_mode = #tpu.pipeline_mode<synchronous>, transform_indices = @transform_5, window_bounds = array<i64: 384, 128>}, {pipeline_mode = #tpu.pipeline_mode<synchronous>, transform_indices = @transform_6, window_bounds = array<i64: 1, 128>}, {pipeline_mode = #tpu.pipeline_mode<synchronous>, transform_indices = @transform_7, window_bounds = array<i64: 128, 64>}, {pipeline_mode = #tpu.pipeline_mode<synchronous>, transform_indices = @transform_8, window_bounds = array<i64: 1, 64>}, {transform_indices = @transform_9, window_bounds = array<i64: 256, 64>}]} {
    %c0 = arith.constant 0 : index
    %c0_0 = arith.constant 0 : index
    %c0_1 = arith.constant 0 : index
    %0 = vector.load %arg1[%c0, %c0_0, %c0_1] : memref<4x256x10xf32, #tpu.memory_space<vmem>>, vector<4x256x10xf32>
    %1 = vector.shape_cast %0 : vector<4x256x10xf32> to vector<1024x10xf32>
    %c0_2 = arith.constant 0 : index
    %c0_3 = arith.constant 0 : index
    %2 = vector.load %arg2[%c0_2, %c0_3] : memref<10x64xf32, #tpu.memory_space<vmem>>, vector<10x64xf32>
    %cst = arith.constant dense<0.000000e+00> : vector<1024x64xf32>
    %3 = tpu.matmul %1, %2, %cst {dimension_numbers = #tpu.dot_dimension_numbers<[1], [0], [0], [1], [0, 0, 1, 1], [], []>} : vector<1024x10xf32>, vector<10x64xf32>, vector<1024x64xf32> -> vector<1024x64xf32>
    %c0_4 = arith.constant 0 : index
    %c0_5 = arith.constant 0 : index
    %4 = vector.load %arg3[%c0_4, %c0_5] : memref<1x64xf32, #tpu.memory_space<vmem>>, vector<1x64xf32>
    %5 = vector.broadcast %4 : vector<1x64xf32> to vector<1024x64xf32>
    %6 = arith.addf %3, %5 : vector<1024x64xf32>
    %cst_6 = arith.constant 0.000000e+00 : f32
    %7 = vector.broadcast %cst_6 : f32 to vector<1024x64xf32>
    %8 = arith.maximumf %6, %7 : vector<1024x64xf32>
    %9 = arith.truncf %8 : vector<1024x64xf32> to vector<1024x64xbf16>
    %c0_7 = arith.constant 0 : index
    %c0_8 = arith.constant 0 : index
    %10 = vector.load %arg4[%c0_7, %c0_8] : memref<64x128xbf16, #tpu.memory_space<vmem>>, vector<64x128xbf16>
    %cst_9 = arith.constant dense<0.000000e+00> : vector<1024x128xf32>
    %11 = tpu.matmul %9, %10, %cst_9 {dimension_numbers = #tpu.dot_dimension_numbers<[1], [0], [0], [1], [0, 0, 1, 1], [], []>} : vector<1024x64xbf16>, vector<64x128xbf16>, vector<1024x128xf32> -> vector<1024x128xf32>
    %c0_10 = arith.constant 0 : index
    %c0_11 = arith.constant 0 : index
    %12 = vector.load %arg5[%c0_10, %c0_11] : memref<1x128xf32, #tpu.memory_space<vmem>>, vector<1x128xf32>
    %13 = vector.broadcast %12 : vector<1x128xf32> to vector<1024x128xf32>
    %14 = arith.addf %11, %13 : vector<1024x128xf32>
    %cst_12 = arith.constant 0.000000e+00 : f32
    %15 = vector.broadcast %cst_12 : f32 to vector<1024x128xf32>
    %16 = arith.maximumf %14, %15 : vector<1024x128xf32>
    %17 = vector.extract_strided_slice %16 {offsets = [0, 0], sizes = [256, 128], strides = [1, 1]} : vector<1024x128xf32> to vector<256x128xf32>
    %18 = vector.extract_strided_slice %16 {offsets = [0, 0], sizes = [256, 128], strides = [1, 1]} : vector<1024x128xf32> to vector<256x128xf32>
    %19 = vector.extract_strided_slice %16 {offsets = [256, 0], sizes = [256, 128], strides = [1, 1]} : vector<1024x128xf32> to vector<256x128xf32>
    %20 = arith.maximumf %17, %19 : vector<256x128xf32>
    %21 = arith.addf %18, %19 : vector<256x128xf32>
    %22 = vector.extract_strided_slice %16 {offsets = [512, 0], sizes = [256, 128], strides = [1, 1]} : vector<1024x128xf32> to vector<256x128xf32>
    %23 = arith.maximumf %20, %22 : vector<256x128xf32>
    %24 = arith.addf %21, %22 : vector<256x128xf32>
    %25 = vector.extract_strided_slice %16 {offsets = [768, 0], sizes = [256, 128], strides = [1, 1]} : vector<1024x128xf32> to vector<256x128xf32>
    %26 = arith.maximumf %23, %25 : vector<256x128xf32>
    %27 = arith.addf %24, %25 : vector<256x128xf32>
    %cst_13 = arith.constant 2.500000e-01 : f32
    %28 = vector.broadcast %cst_13 : f32 to vector<256x128xf32>
    %29 = arith.mulf %27, %28 : vector<256x128xf32>
    %cst_14 = arith.constant 0.000000e+00 : f32
    %30 = vector.broadcast %cst_14 : f32 to vector<256x128xf32>
    %31 = arith.maximumf %26, %30 : vector<256x128xf32>
    %cst_15 = arith.constant 0.000000e+00 : f32
    %32 = vector.broadcast %cst_15 : f32 to vector<256x128xf32>
    %33 = arith.maximumf %29, %32 : vector<256x128xf32>
    %cst_16 = arith.constant 0.000000e+00 : f32
    %34 = vector.broadcast %cst_16 : f32 to vector<256x128xf32>
    %35 = arith.maximumf %27, %34 : vector<256x128xf32>
    %36 = tpu.concatenate %31, %33, %35 in 1 : vector<256x128xf32>, vector<256x128xf32>, vector<256x128xf32> -> vector<256x384xf32>
    %37 = arith.truncf %36 : vector<256x384xf32> to vector<256x384xbf16>
    %c0_17 = arith.constant 0 : index
    %c0_18 = arith.constant 0 : index
    %38 = vector.load %arg6[%c0_17, %c0_18] : memref<384x128xbf16, #tpu.memory_space<vmem>>, vector<384x128xbf16>
    %cst_19 = arith.constant dense<0.000000e+00> : vector<256x128xf32>
    %39 = tpu.matmul %37, %38, %cst_19 {dimension_numbers = #tpu.dot_dimension_numbers<[1], [0], [0], [1], [0, 0, 1, 1], [], []>} : vector<256x384xbf16>, vector<384x128xbf16>, vector<256x128xf32> -> vector<256x128xf32>
    %c0_20 = arith.constant 0 : index
    %c0_21 = arith.constant 0 : index
    %40 = vector.load %arg7[%c0_20, %c0_21] : memref<1x128xf32, #tpu.memory_space<vmem>>, vector<1x128xf32>
    %41 = vector.broadcast %40 : vector<1x128xf32> to vector<256x128xf32>
    %42 = arith.addf %39, %41 : vector<256x128xf32>
    %cst_22 = arith.constant 0.000000e+00 : f32
    %43 = vector.broadcast %cst_22 : f32 to vector<256x128xf32>
    %44 = arith.maximumf %42, %43 : vector<256x128xf32>
    %45 = arith.truncf %44 : vector<256x128xf32> to vector<256x128xbf16>
    %c0_23 = arith.constant 0 : index
    %c0_24 = arith.constant 0 : index
    %46 = vector.load %arg8[%c0_23, %c0_24] : memref<128x64xbf16, #tpu.memory_space<vmem>>, vector<128x64xbf16>
    %cst_25 = arith.constant dense<0.000000e+00> : vector<256x64xf32>
    %47 = tpu.matmul %45, %46, %cst_25 {dimension_numbers = #tpu.dot_dimension_numbers<[1], [0], [0], [1], [0, 0, 1, 1], [], []>} : vector<256x128xbf16>, vector<128x64xbf16>, vector<256x64xf32> -> vector<256x64xf32>
    %c0_26 = arith.constant 0 : index
    %c0_27 = arith.constant 0 : index
    %48 = vector.load %arg9[%c0_26, %c0_27] : memref<1x64xf32, #tpu.memory_space<vmem>>, vector<1x64xf32>
    %49 = vector.broadcast %48 : vector<1x64xf32> to vector<256x64xf32>
    %50 = arith.addf %47, %49 : vector<256x64xf32>
    %c0_28 = arith.constant 0 : index
    %c0_29 = arith.constant 0 : index
    %51 = vector.load %arg10[%c0_28, %c0_29] : memref<256x64xf32, #tpu.memory_space<vmem>>, vector<256x64xf32>
    tpu.vector_store %arg10[%c0_28, %c0_29], %50 {strides = array<i32>} : memref<256x64xf32, #tpu.memory_space<vmem>>, vector<256x64xf32>,
    return
  }
  func.func @transform_0(%arg0: i32) -> (i32, i32, i32) {
    %c0_i32 = arith.constant 0 : i32
    %c0_i32_0 = arith.constant 0 : i32
    %c0_i32_1 = arith.constant 0 : i32
    return %c0_i32, %arg0, %c0_i32_0 : i32, i32, i32
  }
  func.func @transform_1(%arg0: i32) -> (i32, i32) {
    %c0_i32 = arith.constant 0 : i32
    %c0_i32_0 = arith.constant 0 : i32
    %c0_i32_1 = arith.constant 0 : i32
    return %c0_i32, %c0_i32_0 : i32, i32
  }
  func.func @transform_2(%arg0: i32) -> (i32, i32) {
    %c0_i32 = arith.constant 0 : i32
    %c0_i32_0 = arith.constant 0 : i32
    %c0_i32_1 = arith.constant 0 : i32
    return %c0_i32, %c0_i32_0 : i32, i32
  }
  func.func @transform_3(%arg0: i32) -> (i32, i32) {
    %c0_i32 = arith.constant 0 : i32
    %c0_i32_0 = arith.constant 0 : i32
    %c0_i32_1 = arith.constant 0 : i32
    return %c0_i32, %c0_i32_0 : i32, i32
  }
  func.func @transform_4(%arg0: i32) -> (i32, i32) {
    %c0_i32 = arith.constant 0 : i32
    %c0_i32_0 = arith.constant 0 : i32
    %c0_i32_1 = arith.constant 0 : i32
    return %c0_i32, %c0_i32_0 : i32, i32
  }
  func.func @transform_5(%arg0: i32) -> (i32, i32) {
    %c0_i32 = arith.constant 0 : i32
    %c0_i32_0 = arith.constant 0 : i32
    %c0_i32_1 = arith.constant 0 : i32
    return %c0_i32, %c0_i32_0 : i32, i32
  }
  func.func @transform_6(%arg0: i32) -> (i32, i32) {
    %c0_i32 = arith.constant 0 : i32
    %c0_i32_0 = arith.constant 0 : i32
    %c0_i32_1 = arith.constant 0 : i32
    return %c0_i32, %c0_i32_0 : i32, i32
  }
  func.func @transform_7(%arg0: i32) -> (i32, i32) {
    %c0_i32 = arith.constant 0 : i32
    %c0_i32_0 = arith.constant 0 : i32
    %c0_i32_1 = arith.constant 0 : i32
    return %c0_i32, %c0_i32_0 : i32, i32
  }
  func.func @transform_8(%arg0: i32) -> (i32, i32) {
    %c0_i32 = arith.constant 0 : i32
    %c0_i32_0 = arith.constant 0 : i32
    %c0_i32_1 = arith.constant 0 : i32
    return %c0_i32, %c0_i32_0 : i32, i32
  }
  func.func @transform_9(%arg0: i32) -> (i32, i32) {
    %c0_i32 = arith.constant 0 : i32
    %c0_i32_0 = arith.constant 0 : i32
    return %arg0, %c0_i32 : i32, i32
  }
}

</mosaic_0001>

<bundles_post_ra>
// kernel: tpu_custom_call.1
= control target key start
LH: loop header
LB: loop body
LE: loop exit
PB: predicated region body
PF: predicated region fallthrough
CT: control target
= control target key end

     0   :  { %s5647_s30 = smov 0   ;;  %s5649_s10 = smov 0   ;;  %s7610_s0 = inlined_call_operand.vmem [shape: f32[4,512,10], index: 0, kind: input, shape index: {}]   ;;  %s7611_s1 = inlined_call_operand.vmem [shape: f32[10,64], index: 1, kind: input, shape index: {}]   ;;  %s7612_s2 = inlined_call_operand.vmem [shape: f32[1,64], index: 2, kind: input, shape index: {}]   ;;  %s7613_s3 = inlined_call_operand.vmem [shape: bf16[64,128], index: 3, kind: input, shape index: {}]   ;;  %s7614_s4 = inlined_call_operand.vmem [shape: f32[1,128], index: 4, kind: input, shape index: {}]   ;;  %s7615_s5 = inlined_call_operand.vmem [shape: bf16[384,128], index: 5, kind: input, shape index: {}]   ;;  %s7616_s6 = inlined_call_operand.vmem [shape: f32[1,128], index: 6, kind: input, shape index: {}]   ;;  %s7617_s7 = inlined_call_operand.vmem [shape: bf16[128,64], index: 7, kind: input, shape index: {}]   ;;  %s7618_s8 = inlined_call_operand.vmem [shape: f32[1,64], index: 8, kind: input, shape index: {}]   ;;  %s7619_s9 = inlined_call_operand.vmem [shape: f32[512,64], index: 9, kind: output, shape index: {}]  }
   0x1   :  { %s5651_s11 = smov 0  }
   0x2 LB: > { %s4470_s12 = sadd.s32 4294967295, %s5594_s11   ;;  %s5664_s13 = sadd.s32 1, %s5594_s11   ;;  %s5594_s11 = sphi %s5651_s11, %s7733_s11   ;;  %s5590_s10 = sphi %s5649_s10, %s7732_s10   ;;  %s5586_s30 = sphi %s5647_s30, %s7731_s30  }
   0x3   : > { %s23_s14 = ssub.s32 %s5594_s11, %s5664_s13  ;;  %s26_s15 = sadd.s32 1, %s5590_s10 }
   0x4   : > { %p24_p0 = scmp.eq.s32.totalorder %s23_s14, 0  ;;  %p33_p1 = scmp.ne.s32.totalorder %s5590_s10, %s5586_s30 }
   0x5   : > { %p34_p2 = scmp.eq.s32.totalorder %s5594_s11, 0  ;;  %p4473_p4 = scmp.ge.s32.totalorder %s5594_s11, 2 }
   0x6   : > { %s5673_s16 = scalar_select %p24_p0, %s5590_s10, %s26_s15  }
   0x7   : > { %p35_p3 = por %p34_p2, %p33_p1  ;;  %277 = sbr.rel (%p4473_p4) target bundleno = 82 (0x52), region = 48 }
   0xe   : > { %280 = sbr.rel (!%p35_p3) target bundleno = 82 (0x52), region = 52  ;;  %s282_s17 = sand.u32 (%p35_p3), 1, %s5590_s10  }
   0xf   : > { %s4716_s18 = sshll.u32 (%p35_p3), %s5594_s11, 8  ;;  %s4474_s19 = sshll.u32 (%p35_p3), %s282_s17, 10 }
  0x10   : > { %s5681_s22 = scalar_lea.vmem (%p35_p3), %s7610_s0, %s4716_s18  ;;  %s5686_s23 = scalar_lea.vmem (%p35_p3), [#allocation2], %s4474_s19 }
  0x11   : > { %v569_v0 = vld [vmem:[%s5681_s22] sm:$0xff] (%p35_p3)  ;;  %v571_v1 = vld [vmem:[%s5681_s22 + $0x8] sm:$0xff] (%p35_p3)  ;;  %v573_v2 = vld [vmem:[%s5681_s22 + $0x10] sm:$0xff] (%p35_p3) }
  0x12   : > { %570 = vst [vmem:[%s5686_s23] sm:$0xff] (%p35_p3), %v569_v0  ;;  %572 = vst [vmem:[%s5686_s23 + $0x8] sm:$0xff] (%p35_p3), %v571_v1  ;;  %v575_v3 = vld [vmem:[%s5681_s22 + $0x18] sm:$0xff] (%p35_p3)  ;;  %v577_v4 = vld [vmem:[%s5681_s22 + $0x20] sm:$0xff] (%p35_p3) }
  0x13   : > { %574 = vst [vmem:[%s5686_s23 + $0x10] sm:$0xff] (%p35_p3), %v573_v2  ;;  %v579_v5 = vld [vmem:[%s5681_s22 + $0x28] sm:$0xff] (%p35_p3)  ;;  %576 = vst [vmem:[%s5686_s23 + $0x18] sm:$0xff] (%p35_p3), %v575_v3  ;;  %v581_v6 = vld [vmem:[%s5681_s22 + $0x30] sm:$0xff] (%p35_p3) }
  0x14   : > { %578 = vst [vmem:[%s5686_s23 + $0x20] sm:$0xff] (%p35_p3), %v577_v4  ;;  %580 = vst [vmem:[%s5686_s23 + $0x28] sm:$0xff] (%p35_p3), %v579_v5  ;;  %v583_v7 = vld [vmem:[%s5681_s22 + $0x38] sm:$0xff] (%p35_p3)  ;;  %v585_v8 = vld [vmem:[%s5681_s22 + $0x40] sm:$0xff] (%p35_p3) }
  0x15   : > { %582 = vst [vmem:[%s5686_s23 + $0x30] sm:$0xff] %v581_v6  ;;  %584 = vst [vmem:[%s5686_s23 + $0x38] sm:$0xff] %v583_v7  ;;  %v587_v9 = vld [vmem:[%s5681_s22 + $0x48] sm:$0xff]  ;;  %v589_v10 = vld [vmem:[%s5681_s22 + $0x50] sm:$0xff] }
  0x16   : > { %586 = vst [vmem:[%s5686_s23 + $0x40] sm:$0xff] %v585_v8  ;;  %v591_v11 = vld [vmem:[%s5681_s22 + $0x58] sm:$0xff]  ;;  %588 = vst [vmem:[%s5686_s23 + $0x48] sm:$0xff] %v587_v9  ;;  %v593_v12 = vld [vmem:[%s5681_s22 + $0x60] sm:$0xff] }
  0x17   : > { %590 = vst [vmem:[%s5686_s23 + $0x50] sm:$0xff] %v589_v10  ;;  %592 = vst [vmem:[%s5686_s23 + $0x58] sm:$0xff] %v591_v11  ;;  %v595_v13 = vld [vmem:[%s5681_s22 + $0x68] sm:$0xff]  ;;  %v597_v14 = vld [vmem:[%s5681_s22 + $0x70] sm:$0xff] }
  0x18   : > { %594 = vst [vmem:[%s5686_s23 + $0x60] sm:$0xff] %v593_v12  ;;  %596 = vst [vmem:[%s5686_s23 + $0x68] sm:$0xff] %v595_v13  ;;  %v599_v15 = vld [vmem:[%s5681_s22 + $0x78] sm:$0xff]  ;;  %v601_v16 = vld [vmem:[%s5681_s22 + $0x80] sm:$0xff] }
  0x19   : > { %598 = vst [vmem:[%s5686_s23 + $0x70] sm:$0xff] %v597_v14  ;;  %v603_v17 = vld [vmem:[%s5681_s22 + $0x88] sm:$0xff]  ;;  %600 = vst [vmem:[%s5686_s23 + $0x78] sm:$0xff] %v599_v15  ;;  %v605_v18 = vld [vmem:[%s5681_s22 + $0x90] sm:$0xff] }
  0x1a   : > { %602 = vst [vmem:[%s5686_s23 + $0x80] sm:$0xff] %v601_v16  ;;  %604 = vst [vmem:[%s5686_s23 + $0x88] sm:$0xff] %v603_v17  ;;  %v607_v19 = vld [vmem:[%s5681_s22 + $0x98] sm:$0xff]  ;;  %v609_v20 = vld [vmem:[%s5681_s22 + $0xa0] sm:$0xff] }
  0x1b   : > { %606 = vst [vmem:[%s5686_s23 + $0x90] sm:$0xff] %v605_v18  ;;  %608 = vst [vmem:[%s5686_s23 + $0x98] sm:$0xff] %v607_v19  ;;  %v611_v21 = vld [vmem:[%s5681_s22 + $0xa8] sm:$0xff]  ;;  %v613_v22 = vld [vmem:[%s5681_s22 + $0xb0] sm:$0xff] }
  0x1c   : > { %610 = vst [vmem:[%s5686_s23 + $0xa0] sm:$0xff] %v609_v20  ;;  %v615_v23 = vld [vmem:[%s5681_s22 + $0xb8] sm:$0xff]  ;;  %612 = vst [vmem:[%s5686_s23 + $0xa8] sm:$0xff] %v611_v21  ;;  %v617_v24 = vld [vmem:[%s5681_s22 + $0xc0] sm:$0xff] }
  0x1d   : > { %614 = vst [vmem:[%s5686_s23 + $0xb0] sm:$0xff] %v613_v22  ;;  %616 = vst [vmem:[%s5686_s23 + $0xb8] sm:$0xff] %v615_v23  ;;  %v619_v25 = vld [vmem:[%s5681_s22 + $0xc8] sm:$0xff]  ;;  %v621_v26 = vld [vmem:[%s5681_s22 + $0xd0] sm:$0xff] }
  0x1e   : > { %618 = vst [vmem:[%s5686_s23 + $0xc0] sm:$0xff] %v617_v24  ;;  %620 = vst [vmem:[%s5686_s23 + $0xc8] sm:$0xff] %v619_v25  ;;  %v623_v27 = vld [vmem:[%s5681_s22 + $0xd8] sm:$0xff]  ;;  %v625_v28 = vld [vmem:[%s5681_s22 + $0xe0] sm:$0xff] }
  0x1f   : > { %622 = vst [vmem:[%s5686_s23 + $0xd0] sm:$0xff] %v621_v26  ;;  %v627_v29 = vld [vmem:[%s5681_s22 + $0xe8] sm:$0xff]  ;;  %624 = vst [vmem:[%s5686_s23 + $0xd8] sm:$0xff] %v623_v27  ;;  %v629_v30 = vld [vmem:[%s5681_s22 + $0xf0] sm:$0xff] }
  0x20   : > { %626 = vst [vmem:[%s5686_s23 + $0xe0] sm:$0xff] %v625_v28  ;;  %628 = vst [vmem:[%s5686_s23 + $0xe8] sm:$0xff] %v627_v29  ;;  %v631_v31 = vld [vmem:[%s5681_s22 + $0xf8] sm:$0xff]  ;;  %v633_v32 = vld [vmem:[%s5681_s22 + $0x200] sm:$0xff] }
  0x21   : > { %630 = vst [vmem:[%s5686_s23 + $0xf0] sm:$0xff] %v629_v30  ;;  %632 = vst [vmem:[%s5686_s23 + $0xf8] sm:$0xff] %v631_v31  ;;  %v635_v33 = vld [vmem:[%s5681_s22 + $0x208] sm:$0xff]  ;;  %v637_v34 = vld [vmem:[%s5681_s22 + $0x210] sm:$0xff] }
  0x22   : > { %634 = vst [vmem:[%s5686_s23 + $0x100] sm:$0xff] %v633_v32  ;;  %v639_v35 = vld [vmem:[%s5681_s22 + $0x218] sm:$0xff]  ;;  %636 = vst [vmem:[%s5686_s23 + $0x108] sm:$0xff] %v635_v33  ;;  %v641_v36 = vld [vmem:[%s5681_s22 + $0x220] sm:$0xff] }
  0x23   : > { %638 = vst [vmem:[%s5686_s23 + $0x110] sm:$0xff] %v637_v34  ;;  %640 = vst [vmem:[%s5686_s23 + $0x118] sm:$0xff] %v639_v35  ;;  %v643_v37 = vld [vmem:[%s5681_s22 + $0x228] sm:$0xff]  ;;  %v645_v38 = vld [vmem:[%s5681_s22 + $0x230] sm:$0xff] }
  0x24   : > { %642 = vst [vmem:[%s5686_s23 + $0x120] sm:$0xff] %v641_v36  ;;  %644 = vst [vmem:[%s5686_s23 + $0x128] sm:$0xff] %v643_v37  ;;  %v647_v39 = vld [vmem:[%s5681_s22 + $0x238] sm:$0xff]  ;;  %v649_v40 = vld [vmem:[%s5681_s22 + $0x240] sm:$0xff] }
  0x25   : > { %646 = vst [vmem:[%s5686_s23 + $0x130] sm:$0xff] %v645_v38  ;;  %v651_v41 = vld [vmem:[%s5681_s22 + $0x248] sm:$0xff]  ;;  %648 = vst [vmem:[%s5686_s23 + $0x138] sm:$0xff] %v647_v39  ;;  %v653_v42 = vld [vmem:[%s5681_s22 + $0x250] sm:$0xff] }
  0x26   : > { %650 = vst [vmem:[%s5686_s23 + $0x140] sm:$0xff] %v649_v40  ;;  %652 = vst [vmem:[%s5686_s23 + $0x148] sm:$0xff] %v651_v41  ;;  %v655_v43 = vld [vmem:[%s5681_s22 + $0x258] sm:$0xff]  ;;  %v657_v44 = vld [vmem:[%s5681_s22 + $0x260] sm:$0xff] }
  0x27   : > { %654 = vst [vmem:[%s5686_s23 + $0x150] sm:$0xff] %v653_v42  ;;  %656 = vst [vmem:[%s5686_s23 + $0x158] sm:$0xff] %v655_v43  ;;  %v659_v45 = vld [vmem:[%s5681_s22 + $0x268] sm:$0xff]  ;;  %v661_v46 = vld [vmem:[%s5681_s22 + $0x270] sm:$0xff] }
  0x28   : > { %658 = vst [vmem:[%s5686_s23 + $0x160] sm:$0xff] %v657_v44  ;;  %v663_v47 = vld [vmem:[%s5681_s22 + $0x278] sm:$0xff]  ;;  %660 = vst [vmem:[%s5686_s23 + $0x168] sm:$0xff] %v659_v45  ;;  %v665_v48 = vld [vmem:[%s5681_s22 + $0x280] sm:$0xff] }
  0x29   : > { %662 = vst [vmem:[%s5686_s23 + $0x170] sm:$0xff] %v661_v46  ;;  %664 = vst [vmem:[%s5686_s23 + $0x178] sm:$0xff] %v663_v47  ;;  %v667_v49 = vld [vmem:[%s5681_s22 + $0x288] sm:$0xff]  ;;  %v669_v50 = vld [vmem:[%s5681_s22 + $0x290] sm:$0xff] }
  0x2a   : > { %666 = vst [vmem:[%s5686_s23 + $0x180] sm:$0xff] %v665_v48  ;;  %668 = vst [vmem:[%s5686_s23 + $0x188] sm:$0xff] %v667_v49  ;;  %v671_v51 = vld [vmem:[%s5681_s22 + $0x298] sm:$0xff]  ;;  %v673_v52 = vld [vmem:[%s5681_s22 + $0x2a0] sm:$0xff] }
  0x2b   : > { %670 = vst [vmem:[%s5686_s23 + $0x190] sm:$0xff] %v669_v50  ;;  %v675_v53 = vld [vmem:[%s5681_s22 + $0x2a8] sm:$0xff]  ;;  %672 = vst [vmem:[%s5686_s23 + $0x198] sm:$0xff] %v671_v51  ;;  %v677_v54 = vld [vmem:[%s5681_s22 + $0x2b0] sm:$0xff] }
  0x2c   : > { %674 = vst [vmem:[%s5686_s23 + $0x1a0] sm:$0xff] %v673_v52  ;;  %676 = vst [vmem:[%s5686_s23 + $0x1a8] sm:$0xff] %v675_v53  ;;  %v679_v55 = vld [vmem:[%s5681_s22 + $0x2b8] sm:$0xff]  ;;  %v681_v56 = vld [vmem:[%s5681_s22 + $0x2c0] sm:$0xff] }
  0x2d   : > { %678 = vst [vmem:[%s5686_s23 + $0x1b0] sm:$0xff] %v677_v54  ;;  %680 = vst [vmem:[%s5686_s23 + $0x1b8] sm:$0xff] %v679_v55  ;;  %v683_v57 = vld [vmem:[%s5681_s22 + $0x2c8] sm:$0xff]  ;;  %v685_v58 = vld [vmem:[%s5681_s22 + $0x2d0] sm:$0xff] }
  0x2e   : > { %682 = vst [vmem:[%s5686_s23 + $0x1c0] sm:$0xff] %v681_v56  ;;  %v687_v59 = vld [vmem:[%s5681_s22 + $0x2d8] sm:$0xff]  ;;  %684 = vst [vmem:[%s5686_s23 + $0x1c8] sm:$0xff] %v683_v57  ;;  %v689_v60 = vld [vmem:[%s5681_s22 + $0x2e0] sm:$0xff] }
  0x2f   : > { %686 = vst [vmem:[%s5686_s23 + $0x1d0] sm:$0xff] %v685_v58  ;;  %688 = vst [vmem:[%s5686_s23 + $0x1d8] sm:$0xff] %v687_v59  ;;  %v691_v61 = vld [vmem:[%s5681_s22 + $0x2e8] sm:$0xff]  ;;  %v693_v62 = vld [vmem:[%s5681_s22 + $0x2f0] sm:$0xff] }
  0x30   : > { %690 = vst [vmem:[%s5686_s23 + $0x1e0] sm:$0xff] %v689_v60  ;;  %692 = vst [vmem:[%s5686_s23 + $0x1e8] sm:$0xff] %v691_v61  ;;  %v695_v63 = vld [vmem:[%s5681_s22 + $0x2f8] sm:$0xff]  ;;  %v697_v0 = vld [vmem:[%s5681_s22 + $0x400] sm:$0xff] }
  0x31   : > { %694 = vst [vmem:[%s5686_s23 + $0x1f0] sm:$0xff] %v693_v62  ;;  %v699_v1 = vld [vmem:[%s5681_s22 + $0x408] sm:$0xff]  ;;  %696 = vst [vmem:[%s5686_s23 + $0x1f8] sm:$0xff] %v695_v63  ;;  %v701_v2 = vld [vmem:[%s5681_s22 + $0x410] sm:$0xff] }
  0x32   : > { %698 = vst [vmem:[%s5686_s23 + $0x200] sm:$0xff] %v697_v0  ;;  %700 = vst [vmem:[%s5686_s23 + $0x208] sm:$0xff] %v699_v1  ;;  %v703_v3 = vld [vmem:[%s5681_s22 + $0x418] sm:$0xff]  ;;  %v705_v4 = vld [vmem:[%s5681_s22 + $0x420] sm:$0xff] }
  0x33   : > { %702 = vst [vmem:[%s5686_s23 + $0x210] sm:$0xff] %v701_v2  ;;  %704 = vst [vmem:[%s5686_s23 + $0x218] sm:$0xff] %v703_v3  ;;  %v707_v5 = vld [vmem:[%s5681_s22 + $0x428] sm:$0xff]  ;;  %v709_v6 = vld [vmem:[%s5681_s22 + $0x430] sm:$0xff] }
  0x34   : > { %706 = vst [vmem:[%s5686_s23 + $0x220] sm:$0xff] %v705_v4  ;;  %v711_v7 = vld [vmem:[%s5681_s22 + $0x438] sm:$0xff]  ;;  %708 = vst [vmem:[%s5686_s23 + $0x228] sm:$0xff] %v707_v5  ;;  %v713_v8 = vld [vmem:[%s5681_s22 + $0x440] sm:$0xff] }
  0x35   : > { %710 = vst [vmem:[%s5686_s23 + $0x230] sm:$0xff] %v709_v6  ;;  %712 = vst [vmem:[%s5686_s23 + $0x238] sm:$0xff] %v711_v7  ;;  %v715_v9 = vld [vmem:[%s5681_s22 + $0x448] sm:$0xff]  ;;  %v717_v10 = vld [vmem:[%s5681_s22 + $0x450] sm:$0xff] }
  0x36   : > { %714 = vst [vmem:[%s5686_s23 + $0x240] sm:$0xff] %v713_v8  ;;  %716 = vst [vmem:[%s5686_s23 + $0x248] sm:$0xff] %v715_v9  ;;  %v719_v11 = vld [vmem:[%s5681_s22 + $0x458] sm:$0xff]  ;;  %v721_v12 = vld [vmem:[%s5681_s22 + $0x460] sm:$0xff] }
  0x37   : > { %718 = vst [vmem:[%s5686_s23 + $0x250] sm:$0xff] %v717_v10  ;;  %v723_v13 = vld [vmem:[%s5681_s22 + $0x468] sm:$0xff]  ;;  %720 = vst [vmem:[%s5686_s23 + $0x258] sm:$0xff] %v719_v11  ;;  %v725_v14 = vld [vmem:[%s5681_s22 + $0x470] sm:$0xff] }
  0x38   : > { %722 = vst [vmem:[%s5686_s23 + $0x260] sm:$0xff] %v721_v12  ;;  %724 = vst [vmem:[%s5686_s23 + $0x268] sm:$0xff] %v723_v13  ;;  %v727_v15 = vld [vmem:[%s5681_s22 + $0x478] sm:$0xff]  ;;  %v729_v16 = vld [vmem:[%s5681_s22 + $0x480] sm:$0xff] }
  0x39   : > { %726 = vst [vmem:[%s5686_s23 + $0x270] sm:$0xff] %v725_v14  ;;  %728 = vst [vmem:[%s5686_s23 + $0x278] sm:$0xff] %v727_v15  ;;  %v731_v17 = vld [vmem:[%s5681_s22 + $0x488] sm:$0xff]  ;;  %v733_v18 = vld [vmem:[%s5681_s22 + $0x490] sm:$0xff] }
  0x3a   : > { %730 = vst [vmem:[%s5686_s23 + $0x280] sm:$0xff] %v729_v16  ;;  %v735_v19 = vld [vmem:[%s5681_s22 + $0x498] sm:$0xff]  ;;  %732 = vst [vmem:[%s5686_s23 + $0x288] sm:$0xff] %v731_v17  ;;  %v737_v20 = vld [vmem:[%s5681_s22 + $0x4a0] sm:$0xff] }
  0x3b   : > { %734 = vst [vmem:[%s5686_s23 + $0x290] sm:$0xff] %v733_v18  ;;  %736 = vst [vmem:[%s5686_s23 + $0x298] sm:$0xff] %v735_v19  ;;  %v739_v21 = vld [vmem:[%s5681_s22 + $0x4a8] sm:$0xff]  ;;  %v741_v22 = vld [vmem:[%s5681_s22 + $0x4b0] sm:$0xff] }
  0x3c   : > { %738 = vst [vmem:[%s5686_s23 + $0x2a0] sm:$0xff] %v737_v20  ;;  %740 = vst [vmem:[%s5686_s23 + $0x2a8] sm:$0xff] %v739_v21  ;;  %v743_v23 = vld [vmem:[%s5681_s22 + $0x4b8] sm:$0xff]  ;;  %v745_v24 = vld [vmem:[%s5681_s22 + $0x4c0] sm:$0xff] }
  0x3d   : > { %742 = vst [vmem:[%s5686_s23 + $0x2b0] sm:$0xff] %v741_v22  ;;  %v747_v25 = vld [vmem:[%s5681_s22 + $0x4c8] sm:$0xff]  ;;  %744 = vst [vmem:[%s5686_s23 + $0x2b8] sm:$0xff] %v743_v23  ;;  %v749_v26 = vld [vmem:[%s5681_s22 + $0x4d0] sm:$0xff] }
  0x3e   : > { %746 = vst [vmem:[%s5686_s23 + $0x2c0] sm:$0xff] %v745_v24  ;;  %748 = vst [vmem:[%s5686_s23 + $0x2c8] sm:$0xff] %v747_v25  ;;  %v751_v27 = vld [vmem:[%s5681_s22 + $0x4d8] sm:$0xff]  ;;  %v753_v28 = vld [vmem:[%s5681_s22 + $0x4e0] sm:$0xff] }
  0x3f   : > { %750 = vst [vmem:[%s5686_s23 + $0x2d0] sm:$0xff] %v749_v26  ;;  %752 = vst [vmem:[%s5686_s23 + $0x2d8] sm:$0xff] %v751_v27  ;;  %v755_v29 = vld [vmem:[%s5681_s22 + $0x4e8] sm:$0xff]  ;;  %v757_v30 = vld [vmem:[%s5681_s22 + $0x4f0] sm:$0xff] }
  0x40   : > { %754 = vst [vmem:[%s5686_s23 + $0x2e0] sm:$0xff] %v753_v28  ;;  %v759_v31 = vld [vmem:[%s5681_s22 + $0x4f8] sm:$0xff]  ;;  %756 = vst [vmem:[%s5686_s23 + $0x2e8] sm:$0xff] %v755_v29  ;;  %v761_v32 = vld [vmem:[%s5681_s22 + $0x600] sm:$0xff] }
  0x41   : > { %758 = vst [vmem:[%s5686_s23 + $0x2f0] sm:$0xff] %v757_v30  ;;  %760 = vst [vmem:[%s5686_s23 + $0x2f8] sm:$0xff] %v759_v31  ;;  %v763_v33 = vld [vmem:[%s5681_s22 + $0x608] sm:$0xff]  ;;  %v765_v34 = vld [vmem:[%s5681_s22 + $0x610] sm:$0xff] }
  0x42   : > { %762 = vst [vmem:[%s5686_s23 + $0x300] sm:$0xff] %v761_v32  ;;  %764 = vst [vmem:[%s5686_s23 + $0x308] sm:$0xff] %v763_v33  ;;  %v767_v35 = vld [vmem:[%s5681_s22 + $0x618] sm:$0xff]  ;;  %v769_v36 = vld [vmem:[%s5681_s22 + $0x620] sm:$0xff] }
  0x43   : > { %766 = vst [vmem:[%s5686_s23 + $0x310] sm:$0xff] %v765_v34  ;;  %v771_v37 = vld [vmem:[%s5681_s22 + $0x628] sm:$0xff]  ;;  %768 = vst [vmem:[%s5686_s23 + $0x318] sm:$0xff] %v767_v35  ;;  %v773_v38 = vld [vmem:[%s5681_s22 + $0x630] sm:$0xff] }
  0x44   : > { %770 = vst [vmem:[%s5686_s23 + $0x320] sm:$0xff] %v769_v36  ;;  %772 = vst [vmem:[%s5686_s23 + $0x328] sm:$0xff] %v771_v37  ;;  %v775_v39 = vld [vmem:[%s5681_s22 + $0x638] sm:$0xff]  ;;  %v777_v40 = vld [vmem:[%s5681_s22 + $0x640] sm:$0xff] }
  0x45   : > { %774 = vst [vmem:[%s5686_s23 + $0x330] sm:$0xff] %v773_v38  ;;  %776 = vst [vmem:[%s5686_s23 + $0x338] sm:$0xff] %v775_v39  ;;  %v779_v41 = vld [vmem:[%s5681_s22 + $0x648] sm:$0xff]  ;;  %v781_v42 = vld [vmem:[%s5681_s22 + $0x650] sm:$0xff] }
  0x46   : > { %778 = vst [vmem:[%s5686_s23 + $0x340] sm:$0xff] %v777_v40  ;;  %v783_v43 = vld [vmem:[%s5681_s22 + $0x658] sm:$0xff]  ;;  %780 = vst [vmem:[%s5686_s23 + $0x348] sm:$0xff] %v779_v41  ;;  %v785_v44 = vld [vmem:[%s5681_s22 + $0x660] sm:$0xff] }
  0x47   : > { %782 = vst [vmem:[%s5686_s23 + $0x350] sm:$0xff] %v781_v42  ;;  %784 = vst [vmem:[%s5686_s23 + $0x358] sm:$0xff] %v783_v43  ;;  %v787_v45 = vld [vmem:[%s5681_s22 + $0x668] sm:$0xff]  ;;  %v789_v46 = vld [vmem:[%s5681_s22 + $0x670] sm:$0xff] }
  0x48   : > { %786 = vst [vmem:[%s5686_s23 + $0x360] sm:$0xff] %v785_v44  ;;  %788 = vst [vmem:[%s5686_s23 + $0x368] sm:$0xff] %v787_v45  ;;  %v791_v47 = vld [vmem:[%s5681_s22 + $0x678] sm:$0xff]  ;;  %v793_v48 = vld [vmem:[%s5681_s22 + $0x680] sm:$0xff] }
  0x49   : > { %790 = vst [vmem:[%s5686_s23 + $0x370] sm:$0xff] %v789_v46  ;;  %v795_v49 = vld [vmem:[%s5681_s22 + $0x688] sm:$0xff]  ;;  %792 = vst [vmem:[%s5686_s23 + $0x378] sm:$0xff] %v791_v47  ;;  %v797_v50 = vld [vmem:[%s5681_s22 + $0x690] sm:$0xff] }
  0x4a   : > { %794 = vst [vmem:[%s5686_s23 + $0x380] sm:$0xff] %v793_v48  ;;  %796 = vst [vmem:[%s5686_s23 + $0x388] sm:$0xff] %v795_v49  ;;  %v799_v51 = vld [vmem:[%s5681_s22 + $0x698] sm:$0xff]  ;;  %v801_v52 = vld [vmem:[%s5681_s22 + $0x6a0] sm:$0xff] }
  0x4b   : > { %798 = vst [vmem:[%s5686_s23 + $0x390] sm:$0xff] %v797_v50  ;;  %800 = vst [vmem:[%s5686_s23 + $0x398] sm:$0xff] %v799_v51  ;;  %v803_v53 = vld [vmem:[%s5681_s22 + $0x6a8] sm:$0xff]  ;;  %v805_v54 = vld [vmem:[%s5681_s22 + $0x6b0] sm:$0xff] }
  0x4c   : > { %802 = vst [vmem:[%s5686_s23 + $0x3a0] sm:$0xff] %v801_v52  ;;  %v807_v55 = vld [vmem:[%s5681_s22 + $0x6b8] sm:$0xff]  ;;  %804 = vst [vmem:[%s5686_s23 + $0x3a8] sm:$0xff] %v803_v53  ;;  %v809_v56 = vld [vmem:[%s5681_s22 + $0x6c0] sm:$0xff] }
  0x4d   : > { %806 = vst [vmem:[%s5686_s23 + $0x3b0] sm:$0xff] %v805_v54  ;;  %808 = vst [vmem:[%s5686_s23 + $0x3b8] sm:$0xff] %v807_v55  ;;  %v811_v57 = vld [vmem:[%s5681_s22 + $0x6c8] sm:$0xff]  ;;  %v813_v58 = vld [vmem:[%s5681_s22 + $0x6d0] sm:$0xff] }
  0x4e   : > { %810 = vst [vmem:[%s5686_s23 + $0x3c0] sm:$0xff] %v809_v56  ;;  %812 = vst [vmem:[%s5686_s23 + $0x3c8] sm:$0xff] %v811_v57  ;;  %v815_v59 = vld [vmem:[%s5681_s22 + $0x6d8] sm:$0xff]  ;;  %v817_v60 = vld [vmem:[%s5681_s22 + $0x6e0] sm:$0xff] }
  0x4f   : > { %814 = vst [vmem:[%s5686_s23 + $0x3d0] sm:$0xff] %v813_v58  ;;  %v819_v61 = vld [vmem:[%s5681_s22 + $0x6e8] sm:$0xff]  ;;  %816 = vst [vmem:[%s5686_s23 + $0x3d8] sm:$0xff] %v815_v59  ;;  %v821_v62 = vld [vmem:[%s5681_s22 + $0x6f0] sm:$0xff] }
  0x50   : > { %818 = vst [vmem:[%s5686_s23 + $0x3e0] sm:$0xff] %v817_v60  ;;  %820 = vst [vmem:[%s5686_s23 + $0x3e8] sm:$0xff] %v819_v61  ;;  %v823_v63 = vld [vmem:[%s5681_s22 + $0x6f8] sm:$0xff] }
  0x51   : > { %822 = vst [vmem:[%s5686_s23 + $0x3f0] sm:$0xff] %v821_v62  ;;  %824 = vst [vmem:[%s5686_s23 + $0x3f8] sm:$0xff] %v823_v63 }
  0x52 PF: > { %p4477_p5 = scmp.ge.s32.totalorder %s5594_s11, 1  ;;  %p829_p6 = scmp.lt.s32.totalorder %s5594_s11, 3 }
  0x54   : > { %p830_p7 = pnand %p4477_p5, %p829_p6 }
  0x56   : > { %833 = sbr.rel (%p830_p7) target bundleno = 1315 (0x523), region = 90 }
  0x5d   : > { %v1007_v0 = vld [vmem:[%s7611_s1] sm:$0xff]  ;;  %v1008_v1 = vld [vmem:[%s7611_s1 + $0x8] sm:$0x3]  ;;  %vm1401_vm0 = vcmask 1041408   ;;  %s836_s28 = sand.u32 1, %s5586_s30   ;;  %vm5596_vm1 = vmmov 1  }
  0x5e   : > { %v5503_v2 = vpack.c.bf16 %v1008_v1, %v1007_v0  ;;  %vm5504_vm2 = vmpackc.low %vm1401_vm0, %vm5596_vm1  ;;  %s4478_s29 = sshll.u32 %s836_s28, 10  ;;  %vm1016_vm3 = vcmask 80896   ;;  %v5534_v45 = vld [vmem:[%s7613_s3] sm:$0xff]   ;;  %v5535_v48 = vld [vmem:[%s7613_s3 + $0x8] sm:$0xff]   ;;  %vm2341_vm4 = vcmask 523264   ;;  %s4479_s17 = sshll.u32 %s4470_s12, 5 }
  0x5f   : > { %s5950_s14 = scalar_lea.vmem [#allocation2], %s4478_s29  ;;  %5271 = vmatprep.subr.bf16.mxu1 %v5534_v45  ;;  %v5536_v51 = vld [vmem:[%s7613_s3 + $0x10] sm:$0xff]   ;;  %v5537_v54 = vld [vmem:[%s7613_s3 + $0x18] sm:$0xff]   ;;  %p873_p8 = scmp.lt.s32.totalorder %s4479_s17, 63 }
  0x60   : > { %5505 = vmatprep.subr.msk.bf16.mxu0 %vm5504_vm2, %v5503_v2  ;;  %v879_v3 = vld [vmem:[%s5950_s14] sm:$0xff]  ;;  %v880_v4 = vld [vmem:[%s5950_s14 + $0x8] sm:$0xff]  ;;  %v881_v5 = vld [vmem:[%s5950_s14 + $0x10] sm:$0xff]  ;;  %5272 = vmatpush3.bf16.msra.mxu1 %v5534_v45 }
  0x61   : > { %5508 = vmatpush3.bf16.msk.msra.mxu0 %vm5504_vm2, %v5503_v2  ;;  %5079 = vmatprep.mubr.msk.f32.mxu0 %vm1016_vm3, %v879_v3  ;;  %v882_v6 = vld [vmem:[%s5950_s14 + $0x18] sm:$0xff]  ;;  %v883_v7 = vld [vmem:[%s5950_s14 + $0x20] sm:$0xff]  ;;  %v884_v8 = vld [vmem:[%s5950_s14 + $0x28] sm:$0xff]  ;;  %s7735_s17 = smov (!%p873_p8, %s4479_s17), 63 }
  0x62   : > { %v885_v9 = vld [vmem:[%s5950_s14 + $0x30] sm:$0xff]  ;;  %v886_v10 = vld [vmem:[%s5950_s14 + $0x38] sm:$0xff]  ;;  %v887_v11 = vld [vmem:[%s5950_s14 + $0x40] sm:$0xff]  ;;  %5273 = vmatprep.subr.bf16.mxu1 %v5535_v48  ;;  %s4480_s18 = sshll.u32 %s7735_s17, 3 }
  0x63   : > { %v888_v12 = vld [vmem:[%s5950_s14 + $0x48] sm:$0xff]  ;;  %v889_v13 = vld [vmem:[%s5950_s14 + $0x50] sm:$0xff]  ;;  %v890_v14 = vld [vmem:[%s5950_s14 + $0x58] sm:$0xff]  ;;  %s7502_s23 = scalar_lea.vmem %s7619_s9, %s4480_s18 }
  0x64   : > { %5080 = vmatmul.mubr.msk.f32.vlgmr.msra.gmra.mrb[0].mxu0 %vm1016_vm3, %v880_v4  ;;  %v891_v15 = vld [vmem:[%s5950_s14 + $0x60] sm:$0xff]  ;;  %v892_v16 = vld [vmem:[%s5950_s14 + $0x68] sm:$0xff]  ;;  %v893_v17 = vld [vmem:[%s5950_s14 + $0x70] sm:$0xff]  ;;  %5274 = vmatpush3.bf16.msra.mxu1 %v5535_v48 }
  0x65   : > { %5082 = vmatprep.mubr.msk.f32.mxu0 %vm1016_vm3, %v881_v5  ;;  %v894_v18 = vld [vmem:[%s5950_s14 + $0x78] sm:$0xff]  ;;  %v895_v19 = vld [vmem:[%s5950_s14 + $0x80] sm:$0xff]  ;;  %v896_v20 = vld [vmem:[%s5950_s14 + $0x88] sm:$0xff]  ;;  %5275 = vmatprep.subr.bf16.mxu1 %v5536_v51 }
  0x66   : > { %v897_v21 = vld [vmem:[%s5950_s14 + $0x90] sm:$0xff]  ;;  %v898_v22 = vld [vmem:[%s5950_s14 + $0x98] sm:$0xff]  ;;  %v899_v23 = vld [vmem:[%s5950_s14 + $0xa0] sm:$0xff] }
  0x67   : > { %v900_v24 = vld [vmem:[%s5950_s14 + $0xa8] sm:$0xff]  ;;  %v901_v25 = vld [vmem:[%s5950_s14 + $0xb0] sm:$0xff]  ;;  %v902_v26 = vld [vmem:[%s5950_s14 + $0xb8] sm:$0xff] }
  0x68   : > { %5083 = vmatmul.mubr.msk.f32.gmra.mrb[2].mxu0 %vm1016_vm3, %v882_v6  ;;  %v903_v27 = vld [vmem:[%s5950_s14 + $0xc0] sm:$0xff]  ;;  %v904_v28 = vld [vmem:[%s5950_s14 + $0xc8] sm:$0xff]  ;;  %v905_v29 = vld [vmem:[%s5950_s14 + $0xd0] sm:$0xff]  ;;  %5276 = vmatpush3.bf16.msra.mxu1 %v5536_v51 }
  0x69   : > { %5085 = vmatprep.mubr.msk.f32.mxu0 %vm1016_vm3, %v883_v7  ;;  %v906_v30 = vld [vmem:[%s5950_s14 + $0xd8] sm:$0xff]  ;;  %v907_v31 = vld [vmem:[%s5950_s14 + $0xe0] sm:$0xff]  ;;  %v908_v32 = vld [vmem:[%s5950_s14 + $0xe8] sm:$0xff]  ;;  %5277 = vmatprep.subr.bf16.mxu1 %v5537_v54 }
  0x6a   : > { %v909_v33 = vld [vmem:[%s5950_s14 + $0xf0] sm:$0xff]  ;;  %v910_v34 = vld [vmem:[%s5950_s14 + $0xf8] sm:$0xff]  ;;  %v911_v35 = vld [vmem:[%s5950_s14 + $0x100] sm:$0xff] }
  0x6b   : > { %v912_v36 = vld [vmem:[%s5950_s14 + $0x108] sm:$0xff]  ;;  %v913_v37 = vld [vmem:[%s5950_s14 + $0x110] sm:$0xff]  ;;  %v914_v38 = vld [vmem:[%s5950_s14 + $0x118] sm:$0xff] }
  0x6c   : > { %5086 = vmatmul.mubr.msk.f32.gmra.mrb[4].mxu0 %vm1016_vm3, %v884_v8  ;;  %v915_v39 = vld [vmem:[%s5950_s14 + $0x120] sm:$0xff]  ;;  %v916_v40 = vld [vmem:[%s5950_s14 + $0x128] sm:$0xff]  ;;  %v917_v41 = vld [vmem:[%s5950_s14 + $0x130] sm:$0xff]  ;;  %5278 = vmatpush3.bf16.msra.mxu1 %v5537_v54 }
  0x6d   : > { %5088 = vmatprep.mubr.msk.f32.mxu0 %vm1016_vm3, %v885_v9  ;;  %v918_v42 = vld [vmem:[%s5950_s14 + $0x138] sm:$0xff]  ;;  %v919_v43 = vld [vmem:[%s5950_s14 + $0x140] sm:$0xff]  ;;  %v920_v44 = vld [vmem:[%s5950_s14 + $0x148] sm:$0xff] }
  0x6e   : > { %v921_v46 = vld [vmem:[%s5950_s14 + $0x150] sm:$0xff]  ;;  %v922_v47 = vld [vmem:[%s5950_s14 + $0x158] sm:$0xff]  ;;  %v923_v49 = vld [vmem:[%s5950_s14 + $0x160] sm:$0xff] }
  0x6f   : > { %v924_v50 = vld [vmem:[%s5950_s14 + $0x168] sm:$0xff]  ;;  %v925_v52 = vld [vmem:[%s5950_s14 + $0x170] sm:$0xff]  ;;  %v926_v53 = vld [vmem:[%s5950_s14 + $0x178] sm:$0xff] }
  0x70   : > { %5089 = vmatmul.mubr.msk.f32.gmra.mrb[6].mxu0 %vm1016_vm3, %v886_v10  ;;  %v927_v55 = vld [vmem:[%s5950_s14 + $0x180] sm:$0xff]  ;;  %v928_v56 = vld [vmem:[%s5950_s14 + $0x188] sm:$0xff]  ;;  %v929_v57 = vld [vmem:[%s5950_s14 + $0x190] sm:$0xff] }
  0x71   : > { %5091 = vmatprep.mubr.msk.f32.mxu0 %vm1016_vm3, %v887_v11  ;;  %v930_v58 = vld [vmem:[%s5950_s14 + $0x198] sm:$0xff]  ;;  %v931_v59 = vld [vmem:[%s5950_s14 + $0x1a0] sm:$0xff]  ;;  %v932_v60 = vld [vmem:[%s5950_s14 + $0x1a8] sm:$0xff] }
  0x72   : > { %v933_v61 = vld [vmem:[%s5950_s14 + $0x1b0] sm:$0xff]  ;;  %v934_v62 = vld [vmem:[%s5950_s14 + $0x1b8] sm:$0xff]  ;;  %v935_v63 = vld [vmem:[%s5950_s14 + $0x1c0] sm:$0xff] }
  0x73   : > { %v936_v0 = vld [vmem:[%s5950_s14 + $0x1c8] sm:$0xff]  ;;  %v937_v1 = vld [vmem:[%s5950_s14 + $0x1d0] sm:$0xff]  ;;  %v938_v2 = vld [vmem:[%s5950_s14 + $0x1d8] sm:$0xff] }
  0x74   : > { %5092 = vmatmul.mubr.msk.f32.gmra.mrb[8].mxu0 %vm1016_vm3, %v888_v12  ;;  %v939_v3 = vld [vmem:[%s5950_s14 + $0x1e0] sm:$0xff]  ;;  %v940_v4 = vld [vmem:[%s5950_s14 + $0x1e8] sm:$0xff]  ;;  %v941_v5 = vld [vmem:[%s5950_s14 + $0x1f0] sm:$0xff] }
  0x75   : > { %5094 = vmatprep.mubr.msk.f32.mxu0 %vm1016_vm3, %v889_v13  ;;  %v942_v6 = vld [vmem:[%s5950_s14 + $0x1f8] sm:$0xff]  ;;  %v943_v7 = vld [vmem:[%s5950_s14 + $0x200] sm:$0xff]  ;;  %v944_v8 = vld [vmem:[%s5950_s14 + $0x208] sm:$0xff] }
  0x76   : > { %v945_v9 = vld [vmem:[%s5950_s14 + $0x210] sm:$0xff]  ;;  %v946_v10 = vld [vmem:[%s5950_s14 + $0x218] sm:$0xff]  ;;  %v947_v11 = vld [vmem:[%s5950_s14 + $0x220] sm:$0xff] }
  0x77   : > { %v948_v12 = vld [vmem:[%s5950_s14 + $0x228] sm:$0xff]  ;;  %v949_v13 = vld [vmem:[%s5950_s14 + $0x230] sm:$0xff]  ;;  %v986_v51 = vld [vmem:[%s5950_s14 + $0x358] sm:$0xff] }
  0x78   : > { %5095 = vmatmul.mubr.msk.f32.gmra.mrb[10].mxu0 %vm1016_vm3, %v890_v14  ;;  %v950_v14 = vld [vmem:[%s5950_s14 + $0x238] sm:$0xff]  ;;  %v981_v45 = vld [vmem:[%s5950_s14 + $0x330] sm:$0xff]  ;;  %v984_v48 = vld [vmem:[%s5950_s14 + $0x348] sm:$0xff] }
  0x79   : > { %5097 = vmatprep.mubr.msk.f32.mxu0 %vm1016_vm3, %v891_v15  ;;  %v951_v15 = vld [vmem:[%s5950_s14 + $0x240] sm:$0xff] }
  0x7c   : > { %5098 = vmatmul.mubr.msk.f32.gmra.mrb[12].mxu0 %vm1016_vm3, %v892_v16  ;;  %v952_v16 = vld [vmem:[%s5950_s14 + $0x248] sm:$0xff] }
  0x7d   : > { %5100 = vmatprep.mubr.msk.f32.mxu0 %vm1016_vm3, %v893_v17  ;;  %v953_v17 = vld [vmem:[%s5950_s14 + $0x250] sm:$0xff] }
  0x80   : > { %5101 = vmatmul.mubr.msk.f32.gmra.mrb[14].mxu0 %vm1016_vm3, %v894_v18  ;;  %v954_v18 = vld [vmem:[%s5950_s14 + $0x258] sm:$0xff] }
  0x81   : > { %5103 = vmatprep.mubr.msk.f32.mxu0 %vm1016_vm3, %v895_v19  ;;  %v955_v19 = vld [vmem:[%s5950_s14 + $0x260] sm:$0xff] }
  0x84   : > { %5104 = vmatmul.mubr.msk.f32.gmra.mrb[16].mxu0 %vm1016_vm3, %v896_v20  ;;  %v956_v20 = vld [vmem:[%s5950_s14 + $0x268] sm:$0xff] }
  0x85   : > { %5106 = vmatprep.mubr.msk.f32.mxu0 %vm1016_vm3, %v897_v21  ;;  %v957_v21 = vld [vmem:[%s5950_s14 + $0x270] sm:$0xff] }
  0x88   : > { %5107 = vmatmul.mubr.msk.f32.gmra.mrb[18].mxu0 %vm1016_vm3, %v898_v22  ;;  %v958_v22 = vld [vmem:[%s5950_s14 + $0x278] sm:$0xff] }
  0x89   : > { %5109 = vmatprep.mubr.msk.f32.mxu0 %vm1016_vm3, %v899_v23  ;;  %v959_v23 = vld [vmem:[%s5950_s14 + $0x280] sm:$0xff] }
  0x8c   : > { %5110 = vmatmul.mubr.msk.f32.gmra.mrb[20].mxu0 %vm1016_vm3, %v900_v24  ;;  %v960_v24 = vld [vmem:[%s5950_s14 + $0x288] sm:$0xff] }
  0x8d   : > { %5112 = vmatprep.mubr.msk.f32.mxu0 %vm1016_vm3, %v901_v25  ;;  %v961_v25 = vld [vmem:[%s5950_s14 + $0x290] sm:$0xff] }
  0x90   : > { %5113 = vmatmul.mubr.msk.f32.gmra.mrb[22].mxu0 %vm1016_vm3, %v902_v26  ;;  %v962_v26 = vld [vmem:[%s5950_s14 + $0x298] sm:$0xff] }
  0x91   : > { %5115 = vmatprep.mubr.msk.f32.mxu0 %vm1016_vm3, %v903_v27  ;;  %v963_v27 = vld [vmem:[%s5950_s14 + $0x2a0] sm:$0xff] }
  0x94   : > { %5116 = vmatmul.mubr.msk.f32.gmra.mrb[24].mxu0 %vm1016_vm3, %v904_v28  ;;  %v964_v28 = vld [vmem:[%s5950_s14 + $0x2a8] sm:$0xff] }
  0x95   : > { %5118 = vmatprep.mubr.msk.f32.mxu0 %vm1016_vm3, %v905_v29  ;;  %v965_v29 = vld [vmem:[%s5950_s14 + $0x2b0] sm:$0xff] }
  0x98   : > { %5119 = vmatmul.mubr.msk.f32.gmra.mrb[26].mxu0 %vm1016_vm3, %v906_v30  ;;  %v966_v30 = vld [vmem:[%s5950_s14 + $0x2b8] sm:$0xff] }
  0x99   : > { %5121 = vmatprep.mubr.msk.f32.mxu0 %vm1016_vm3, %v907_v31  ;;  %v967_v31 = vld [vmem:[%s5950_s14 + $0x2c0] sm:$0xff] }
  0x9c   : > { %5122 = vmatmul.mubr.msk.f32.gmra.mrb[28].mxu0 %vm1016_vm3, %v908_v32  ;;  %v968_v32 = vld [vmem:[%s5950_s14 + $0x2c8] sm:$0xff] }
  0x9d   : > { %5124 = vmatprep.mubr.msk.f32.mxu0 %vm1016_vm3, %v909_v33  ;;  %v969_v33 = vld [vmem:[%s5950_s14 + $0x2d0] sm:$0xff] }
  0xa0   : > { %5125 = vmatmul.mubr.msk.f32.gmra.mrb[30].mxu0 %vm1016_vm3, %v910_v34  ;;  %v970_v34 = vld [vmem:[%s5950_s14 + $0x2d8] sm:$0xff] }
  0xa1   : > { %5127 = vmatprep.mubr.msk.f32.mxu0 %vm1016_vm3, %v911_v35  ;;  %v971_v35 = vld [vmem:[%s5950_s14 + $0x2e0] sm:$0xff] }
  0xa4   : > { %5128 = vmatmul.mubr.msk.f32.gmra.mrb[32].mxu0 %vm1016_vm3, %v912_v36  ;;  %v972_v36 = vld [vmem:[%s5950_s14 + $0x2e8] sm:$0xff] }
  0xa5   : > { %5130 = vmatprep.mubr.msk.f32.mxu0 %vm1016_vm3, %v913_v37  ;;  %v973_v37 = vld [vmem:[%s5950_s14 + $0x2f0] sm:$0xff] }
  0xa8   : > { %5131 = vmatmul.mubr.msk.f32.gmra.mrb[34].mxu0 %vm1016_vm3, %v914_v38  ;;  %v974_v38 = vld [vmem:[%s5950_s14 + $0x2f8] sm:$0xff] }
  0xa9   : > { %5133 = vmatprep.mubr.msk.f32.mxu0 %vm1016_vm3, %v915_v39  ;;  %v975_v39 = vld [vmem:[%s5950_s14 + $0x300] sm:$0xff] }
  0xac   : > { %5134 = vmatmul.mubr.msk.f32.gmra.mrb[36].mxu0 %vm1016_vm3, %v916_v40  ;;  %v976_v40 = vld [vmem:[%s5950_s14 + $0x308] sm:$0xff] }
  0xad   : > { %5136 = vmatprep.mubr.msk.f32.mxu0 %vm1016_vm3, %v917_v41  ;;  %v977_v41 = vld [vmem:[%s5950_s14 + $0x310] sm:$0xff] }
  0xb0   : > { %5137 = vmatmul.mubr.msk.f32.gmra.mrb[38].mxu0 %vm1016_vm3, %v918_v42  ;;  %v978_v42 = vld [vmem:[%s5950_s14 + $0x318] sm:$0xff] }
  0xb1   : > { %5139 = vmatprep.mubr.msk.f32.mxu0 %vm1016_vm3, %v919_v43  ;;  %v979_v43 = vld [vmem:[%s5950_s14 + $0x320] sm:$0xff] }
  0xb4   : > { %5140 = vmatmul.mubr.msk.f32.gmra.mrb[40].mxu0 %vm1016_vm3, %v920_v44  ;;  %v980_v44 = vld [vmem:[%s5950_s14 + $0x328] sm:$0xff] }
  0xb5   : > { %5142 = vmatprep.mubr.msk.f32.mxu0 %vm1016_vm3, %v921_v46  ;;  %v982_v46 = vld [vmem:[%s5950_s14 + $0x338] sm:$0xff] }
  0xb8   : > { %5143 = vmatmul.mubr.msk.f32.gmra.mrb[42].mxu0 %vm1016_vm3, %v922_v47  ;;  %v983_v47 = vld [vmem:[%s5950_s14 + $0x340] sm:$0xff] }
  0xb9   : > { %5145 = vmatprep.mubr.msk.f32.mxu0 %vm1016_vm3, %v923_v49  ;;  %v985_v49 = vld [vmem:[%s5950_s14 + $0x350] sm:$0xff] }
  0xbc   : > { %5146 = vmatmul.mubr.msk.f32.gmra.mrb[44].mxu0 %vm1016_vm3, %v924_v50  ;;  %v6180_v50 = vld [vmem:[%s7612_s2] ss:$0 sm:$0xff] }
  0xbd   : > { %5148 = vmatprep.mubr.msk.f32.mxu0 %vm1016_vm3, %v925_v52  ;;  %v987_v52 = vld [vmem:[%s5950_s14 + $0x360] sm:$0xff] }
  0xc0   : > { %5149 = vmatmul.mubr.msk.f32.gmra.mrb[46].mxu0 %vm1016_vm3, %v926_v53 }
  0xc1   : > { %5151 = vmatprep.mubr.msk.f32.mxu0 %vm1016_vm3, %v927_v55 }
  0xc4   : > { %5152 = vmatmul.mubr.msk.f32.gmra.mrb[48].mxu0 %vm1016_vm3, %v928_v56 }
  0xc5   : > { %5154 = vmatprep.mubr.msk.f32.mxu0 %vm1016_vm3, %v929_v57  ;;  %v988_v57 = vld [vmem:[%s5950_s14 + $0x368] sm:$0xff] }
  0xc8   : > { %5155 = vmatmul.mubr.msk.f32.gmra.mrb[50].mxu0 %vm1016_vm3, %v930_v58 }
  0xc9   : > { %5157 = vmatprep.mubr.msk.f32.mxu0 %vm1016_vm3, %v931_v59  ;;  %v989_v59 = vld [vmem:[%s5950_s14 + $0x370] sm:$0xff] }
  0xcc   : > { %5158 = vmatmul.mubr.msk.f32.gmra.mrb[52].mxu0 %vm1016_vm3, %v932_v60 }
  0xcd   : > { %5160 = vmatprep.mubr.msk.f32.mxu0 %vm1016_vm3, %v933_v61 }
  0xd0   : > { %5161 = vmatmul.mubr.msk.f32.gmra.mrb[54].mxu0 %vm1016_vm3, %v934_v62 }
  0xd1   : > { %5163 = vmatprep.mubr.msk.f32.mxu0 %vm1016_vm3, %v935_v63 }
  0xd4   : > { %5164 = vmatmul.mubr.msk.f32.gmra.mrb[56].mxu0 %vm1016_vm3, %v936_v0 }
  0xd5   : > { %5166 = vmatprep.mubr.msk.f32.mxu0 %vm1016_vm3, %v937_v1 }
  0xd8   : > { %5167 = vmatmul.mubr.msk.f32.gmra.mrb[58].mxu0 %vm1016_vm3, %v938_v2  ;;  %v990_v2 = vld [vmem:[%s5950_s14 + $0x378] sm:$0xff] }
  0xd9   : > { %5169 = vmatprep.mubr.msk.f32.mxu0 %vm1016_vm3, %v939_v3 }
  0xdc   : > { %5170 = vmatmul.mubr.msk.f32.gmra.mrb[60].mxu0 %vm1016_vm3, %v940_v4  ;;  %v991_v4 = vld [vmem:[%s5950_s14 + $0x380] sm:$0xff] }
  0xdd   : > { %5172 = vmatprep.mubr.msk.f32.mxu0 %vm1016_vm3, %v941_v5 }
  0xe0   : > { %5173 = vmatmul.mubr.msk.f32.gmra.mrb[62].mxu0 %vm1016_vm3, %v942_v6 }
  0xe1   : > { %5175 = vmatprep.mubr.msk.f32.mxu0 %vm1016_vm3, %v943_v7 }
  0xe4   : > { %5176 = vmatmul.mubr.msk.f32.gmra.mrb[64].mxu0 %vm1016_vm3, %v944_v8 }
  0xe5   : > { %5178 = vmatprep.mubr.msk.f32.mxu0 %vm1016_vm3, %v945_v9 }
  0xe8   : > { %5179 = vmatmul.mubr.msk.f32.gmra.mrb[66].mxu0 %vm1016_vm3, %v946_v10 }
  0xe9   : > { %5181 = vmatprep.mubr.msk.f32.mxu0 %vm1016_vm3, %v947_v11  ;;  %v992_v11 = vld [vmem:[%s5950_s14 + $0x388] sm:$0xff] }
  0xec   : > { %5182 = vmatmul.mubr.msk.f32.gmra.mrb[68].mxu0 %vm1016_vm3, %v948_v12 }
  0xed   : > { %5184 = vmatprep.mubr.msk.f32.mxu0 %vm1016_vm3, %v949_v13  ;;  %v993_v13 = vld [vmem:[%s5950_s14 + $0x390] sm:$0xff] }
  0xf0   : > { %5185 = vmatmul.mubr.msk.f32.gmra.mrb[70].mxu0 %vm1016_vm3, %v950_v14 }
  0xf1   : > { %5187 = vmatprep.mubr.msk.f32.mxu0 %vm1016_vm3, %v951_v15 }
  0xf4   : > { %5188 = vmatmul.mubr.msk.f32.gmra.mrb[72].mxu0 %vm1016_vm3, %v952_v16 }
  0xf5   : > { %5190 = vmatprep.mubr.msk.f32.mxu0 %vm1016_vm3, %v953_v17 }
  0xf8   : > { %5191 = vmatmul.mubr.msk.f32.gmra.mrb[74].mxu0 %vm1016_vm3, %v954_v18 }
  0xf9   : > { %5193 = vmatprep.mubr.msk.f32.mxu0 %vm1016_vm3, %v955_v19 }
  0xfc   : > { %5194 = vmatmul.mubr.msk.f32.gmra.mrb[76].mxu0 %vm1016_vm3, %v956_v20  ;;  %v994_v20 = vld [vmem:[%s5950_s14 + $0x398] sm:$0xff] }
  0xfd   : > { %5196 = vmatprep.mubr.msk.f32.mxu0 %vm1016_vm3, %v957_v21 }
 0x100   : > { %5197 = vmatmul.mubr.msk.f32.gmra.mrb[78].mxu0 %vm1016_vm3, %v958_v22  ;;  %v995_v22 = vld [vmem:[%s5950_s14 + $0x3a0] sm:$0xff] }
 0x101   : > { %5199 = vmatprep.mubr.msk.f32.mxu0 %vm1016_vm3, %v959_v23 }
 0x104   : > { %5200 = vmatmul.mubr.msk.f32.gmra.mrb[80].mxu0 %vm1016_vm3, %v960_v24 }
 0x105   : > { %5202 = vmatprep.mubr.msk.f32.mxu0 %vm1016_vm3, %v961_v25 }
 0x108   : > { %5203 = vmatmul.mubr.msk.f32.gmra.mrb[82].mxu0 %vm1016_vm3, %v962_v26 }
 0x109   : > { %5205 = vmatprep.mubr.msk.f32.mxu0 %vm1016_vm3, %v963_v27 }
 0x10c   : > { %5206 = vmatmul.mubr.msk.f32.gmra.mrb[84].mxu0 %vm1016_vm3, %v964_v28 }
 0x10d   : > { %5208 = vmatprep.mubr.msk.f32.mxu0 %vm1016_vm3, %v965_v29  ;;  %v996_v29 = vld [vmem:[%s5950_s14 + $0x3a8] sm:$0xff] }
 0x110   : > { %5209 = vmatmul.mubr.msk.f32.gmra.mrb[86].mxu0 %vm1016_vm3, %v966_v30 }
 0x111   : > { %5211 = vmatprep.mubr.msk.f32.mxu0 %vm1016_vm3, %v967_v31  ;;  %v997_v31 = vld [vmem:[%s5950_s14 + $0x3b0] sm:$0xff] }
 0x114   : > { %5212 = vmatmul.mubr.msk.f32.gmra.mrb[88].mxu0 %vm1016_vm3, %v968_v32 }
 0x115   : > { %5214 = vmatprep.mubr.msk.f32.mxu0 %vm1016_vm3, %v969_v33 }
 0x118   : > { %5215 = vmatmul.mubr.msk.f32.gmra.mrb[90].mxu0 %vm1016_vm3, %v970_v34 }
 0x119   : > { %5217 = vmatprep.mubr.msk.f32.mxu0 %vm1016_vm3, %v971_v35 }
 0x11c   : > { %5218 = vmatmul.mubr.msk.f32.gmra.mrb[92].mxu0 %vm1016_vm3, %v972_v36 }
 0x11d   : > { %5220 = vmatprep.mubr.msk.f32.mxu0 %vm1016_vm3, %v973_v37 }
 0x120   : > { %5221 = vmatmul.mubr.msk.f32.gmra.mrb[94].mxu0 %vm1016_vm3, %v974_v38  ;;  %v998_v38 = vld [vmem:[%s5950_s14 + $0x3b8] sm:$0xff] }
 0x121   : > { %5223 = vmatprep.mubr.msk.f32.mxu0 %vm1016_vm3, %v975_v39 }
 0x124   : > { %5224 = vmatmul.mubr.msk.f32.gmra.mrb[96].mxu0 %vm1016_vm3, %v976_v40  ;;  %v999_v40 = vld [vmem:[%s5950_s14 + $0x3c0] sm:$0xff] }
 0x125   : > { %5226 = vmatprep.mubr.msk.f32.mxu0 %vm1016_vm3, %v977_v41 }
 0x128   : > { %5227 = vmatmul.mubr.msk.f32.gmra.mrb[98].mxu0 %vm1016_vm3, %v978_v42 }
 0x129   : > { %5229 = vmatprep.mubr.msk.f32.mxu0 %vm1016_vm3, %v979_v43 }
 0x12c   : > { %5230 = vmatmul.mubr.msk.f32.gmra.mrb[100].mxu0 %vm1016_vm3, %v980_v44 }
 0x12d   : > { %5232 = vmatprep.mubr.msk.f32.mxu0 %vm1016_vm3, %v981_v45 }
 0x130   : > { %5233 = vmatmul.mubr.msk.f32.gmra.mrb[102].mxu0 %vm1016_vm3, %v982_v46 }
 0x131   : > { %5235 = vmatprep.mubr.msk.f32.mxu0 %vm1016_vm3, %v983_v47  ;;  %v1000_v47 = vld [vmem:[%s5950_s14 + $0x3c8] sm:$0xff] }
 0x134   : > { %5236 = vmatmul.mubr.msk.f32.gmra.mrb[104].mxu0 %vm1016_vm3, %v984_v48 }
 0x135   : > { %5238 = vmatprep.mubr.msk.f32.mxu0 %vm1016_vm3, %v985_v49  ;;  %v1001_v49 = vld [vmem:[%s5950_s14 + $0x3d0] sm:$0xff] }
 0x137   : > { %v5081_v53 = vpop.f32.mrb[0].mxu0 }
 0x138   : > { %v1477_v54 = vadd.f32 %v5081_v53, %v6180_v50  ;;  %v1471_v55 = vpop.f32.mrb[1].mxu0  ;;  %5239 = vmatmul.mubr.msk.f32.gmra.mrb[106].mxu0 %vm1016_vm3, %v986_v51 }
 0x139   : > { %v1472_v56 = vadd.f32 %v6180_v50, %v1471_v55  ;;  %5241 = vmatprep.mubr.msk.f32.mxu0 %vm1016_vm3, %v987_v52 }
 0x13a   : > { %v2111_v58 = vmax.f32 %v1477_v54, 0.0 }
 0x13b   : > { %v2110_v60 = vmax.f32 %v1472_v56, 0.0  ;;  %v5084_v61 = vpop.f32.mrb[2].mxu0 }
 0x13c   : > { %v1487_v62 = vadd.f32 %v5084_v61, %v6180_v50  ;;  %v1481_v63 = vpop.f32.mrb[3].mxu0  ;;  %5242 = vmatmul.mubr.msk.f32.gmra.mrb[108].mxu0 %vm1016_vm3, %v988_v57  ;;  %v1002_v57 = vld [vmem:[%s5950_s14 + $0x3d8] sm:$0xff] }
 0x13d   : > { %v1482_v0 = vadd.f32 %v6180_v50, %v1481_v63  ;;  %5244 = vmatprep.mubr.msk.f32.mxu0 %vm1016_vm3, %v989_v59  ;;  %v2238_v1 = vpack.c.bf16 %v2111_v58, %v2110_v60  ;;  %v1003_v59 = vld [vmem:[%s5950_s14 + $0x3e0] sm:$0xff] }
 0x13e   : > { %v2113_v3 = vmax.f32 %v1487_v62, 0.0 }
 0x13f   : > { %v2112_v5 = vmax.f32 %v1482_v0, 0.0  ;;  %v5087_v6 = vpop.f32.mrb[4].mxu0  ;;  %5279 = vmatprep.mubr.msk.bf16.mxu1 %vm2341_vm4, %v2238_v1 }
 0x140   : > { %v1497_v7 = vadd.f32 %v5087_v6, %v6180_v50  ;;  %v1491_v8 = vpop.f32.mrb[5].mxu0  ;;  %5245 = vmatmul.mubr.msk.f32.gmra.mrb[110].mxu0 %vm1016_vm3, %v990_v2  ;;  %v1004_v2 = vld [vmem:[%s5950_s14 + $0x3e8] sm:$0xff] }
 0x141   : > { %v2239_v9 = vpack.c.bf16 %v2113_v3, %v2112_v5  ;;  %v1492_v10 = vadd.f32 %v6180_v50, %v1491_v8  ;;  %5247 = vmatprep.mubr.msk.f32.mxu0 %vm1016_vm3, %v991_v4  ;;  %v1005_v4 = vld [vmem:[%s5950_s14 + $0x3f0] sm:$0xff] }
 0x142   : > { %v2115_v12 = vmax.f32 %v1497_v7, 0.0 }
 0x143   : > { %v2114_v14 = vmax.f32 %v1492_v10, 0.0  ;;  %v5090_v15 = vpop.f32.mrb[6].mxu0  ;;  %5280 = vmatmul.mubr.msk.bf16.vlgmr.msra.gmra.mrb[0].mxu1 %vm2341_vm4, %v2239_v9 }
 0x144   : > { %v1507_v16 = vadd.f32 %v5090_v15, %v6180_v50  ;;  %v1501_v17 = vpop.f32.mrb[7].mxu0  ;;  %5248 = vmatmul.mubr.msk.f32.gmra.mrb[112].mxu0 %vm1016_vm3, %v992_v11  ;;  %v1006_v11 = vld [vmem:[%s5950_s14 + $0x3f8] sm:$0xff] }
 0x145   : > { %v2240_v18 = vpack.c.bf16 %v2115_v12, %v2114_v14  ;;  %v1502_v19 = vadd.f32 %v6180_v50, %v1501_v17  ;;  %5250 = vmatprep.mubr.msk.f32.mxu0 %vm1016_vm3, %v993_v13 }
 0x146   : > { %v2117_v21 = vmax.f32 %v1507_v16, 0.0 }
 0x147   : > { %v2116_v23 = vmax.f32 %v1502_v19, 0.0  ;;  %v5093_v24 = vpop.f32.mrb[8].mxu0  ;;  %5283 = vmatprep.mubr.msk.bf16.mxu1 %vm2341_vm4, %v2240_v18 }
 0x148   : > { %v1517_v25 = vadd.f32 %v5093_v24, %v6180_v50  ;;  %v1511_v26 = vpop.f32.mrb[9].mxu0  ;;  %5251 = vmatmul.mubr.msk.f32.gmra.mrb[114].mxu0 %vm1016_vm3, %v994_v20 }
 0x149   : > { %v2241_v27 = vpack.c.bf16 %v2117_v21, %v2116_v23  ;;  %v1512_v28 = vadd.f32 %v6180_v50, %v1511_v26  ;;  %5253 = vmatprep.mubr.msk.f32.mxu0 %vm1016_vm3, %v995_v22 }
 0x14a   : > { %v2119_v30 = vmax.f32 %v1517_v25, 0.0 }
 0x14b   : > { %v2118_v32 = vmax.f32 %v1512_v28, 0.0  ;;  %v5096_v33 = vpop.f32.mrb[10].mxu0  ;;  %5284 = vmatmul.mubr.msk.bf16.gmra.mrb[4].mxu1 %vm2341_vm4, %v2241_v27 }
 0x14c   : > { %v1527_v34 = vadd.f32 %v5096_v33, %v6180_v50  ;;  %v1521_v35 = vpop.f32.mrb[11].mxu0  ;;  %5254 = vmatmul.mubr.msk.f32.gmra.mrb[116].mxu0 %vm1016_vm3, %v996_v29  ;;  %v5538_v33 = vld [vmem:[%s7615_s5 + $0x40] sm:$0xff]  }
 0x14d   : > { %v2242_v36 = vpack.c.bf16 %v2119_v30, %v2118_v32  ;;  %v1522_v37 = vadd.f32 %v6180_v50, %v1521_v35  ;;  %5256 = vmatprep.mubr.msk.f32.mxu0 %vm1016_vm3, %v997_v31  ;;  %v5539_v35 = vld [vmem:[%s7615_s5] sm:$0xff]   ;;  %4915 = vmatprep.subr.bf16.mxu0 %v5538_v33 }
 0x14e   : > { %v2121_v39 = vmax.f32 %v1527_v34, 0.0  ;;  %4916 = vmatpush3.bf16.msra.mxu0 %v5539_v35 }
 0x14f   : > { %v2120_v41 = vmax.f32 %v1522_v37, 0.0  ;;  %v5099_v42 = vpop.f32.mrb[12].mxu0  ;;  %5287 = vmatprep.mubr.msk.bf16.mxu1 %vm2341_vm4, %v2242_v36 }
 0x150   : > { %v1537_v43 = vadd.f32 %v5099_v42, %v6180_v50  ;;  %v1531_v44 = vpop.f32.mrb[13].mxu0  ;;  %5257 = vmatmul.mubr.msk.f32.gmra.mrb[118].mxu0 %vm1016_vm3, %v998_v38 }
 0x151   : > { %v2243_v45 = vpack.c.bf16 %v2121_v39, %v2120_v41  ;;  %v1532_v46 = vadd.f32 %v6180_v50, %v1531_v44  ;;  %5259 = vmatprep.mubr.msk.f32.mxu0 %vm1016_vm3, %v999_v40 }
 0x152   : > { %v2123_v48 = vmax.f32 %v1537_v43, 0.0 }
 0x153   : > { %v2122_v51 = vmax.f32 %v1532_v46, 0.0  ;;  %v5102_v52 = vpop.f32.mrb[14].mxu0  ;;  %5288 = vmatmul.mubr.msk.bf16.gmra.mrb[8].mxu1 %vm2341_vm4, %v2243_v45 }
 0x154   : > { %v1547_v53 = vadd.f32 %v5102_v52, %v6180_v50  ;;  %v1541_v54 = vpop.f32.mrb[15].mxu0  ;;  %5260 = vmatmul.mubr.msk.f32.gmra.mrb[120].mxu0 %vm1016_vm3, %v1000_v47 }
 0x155   : > { %v2244_v55 = vpack.c.bf16 %v2123_v48, %v2122_v51  ;;  %v1542_v56 = vadd.f32 %v6180_v50, %v1541_v54  ;;  %5262 = vmatprep.mubr.msk.f32.mxu0 %vm1016_vm3, %v1001_v49 }
 0x156   : > { %v2125_v58 = vmax.f32 %v1547_v53, 0.0 }
 0x157   : > { %v2124_v60 = vmax.f32 %v1542_v56, 0.0  ;;  %v5105_v61 = vpop.f32.mrb[16].mxu0  ;;  %5291 = vmatprep.mubr.msk.bf16.mxu1 %vm2341_vm4, %v2244_v55 }
 0x158   : > { %v1557_v62 = vadd.f32 %v5105_v61, %v6180_v50  ;;  %v1551_v63 = vpop.f32.mrb[17].mxu0  ;;  %5263 = vmatmul.mubr.msk.f32.gmra.mrb[122].mxu0 %vm1016_vm3, %v1002_v57 }
 0x159   : > { %v2245_v0 = vpack.c.bf16 %v2125_v58, %v2124_v60  ;;  %v1552_v1 = vadd.f32 %v6180_v50, %v1551_v63  ;;  %5265 = vmatprep.mubr.msk.f32.mxu0 %vm1016_vm3, %v1003_v59 }
 0x15a   : > { %v2127_v3 = vmax.f32 %v1557_v62, 0.0 }
 0x15b   : > { %v2126_v5 = vmax.f32 %v1552_v1, 0.0  ;;  %v5108_v6 = vpop.f32.mrb[18].mxu0  ;;  %5292 = vmatmul.mubr.msk.bf16.gmra.mrb[12].mxu1 %vm2341_vm4, %v2245_v0 }
 0x15c   : > { %v1567_v7 = vadd.f32 %v5108_v6, %v6180_v50  ;;  %v1561_v8 = vpop.f32.mrb[19].mxu0  ;;  %5266 = vmatmul.mubr.msk.f32.gmra.mrb[124].mxu0 %vm1016_vm3, %v1004_v2 }
 0x15d   : > { %v2246_v9 = vpack.c.bf16 %v2127_v3, %v2126_v5  ;;  %v1562_v10 = vadd.f32 %v6180_v50, %v1561_v8  ;;  %5268 = vmatprep.mubr.msk.f32.mxu0 %vm1016_vm3, %v1005_v4 }
 0x15e   : > { %v2129_v12 = vmax.f32 %v1567_v7, 0.0 }
 0x15f   : > { %v2128_v13 = vmax.f32 %v1562_v10, 0.0  ;;  %v5111_v14 = vpop.f32.mrb[20].mxu0  ;;  %5295 = vmatprep.mubr.msk.bf16.mxu1 %vm2341_vm4, %v2246_v9 }
 0x160   : > { %v1577_v15 = vadd.f32 %v5111_v14, %v6180_v50  ;;  %v1571_v16 = vpop.f32.mrb[21].mxu0  ;;  %5269 = vmatmul.mubr.msk.f32.gmra.mrb[126].mxu0 %vm1016_vm3, %v1006_v11 }
 0x161   : > { %v2247_v17 = vpack.c.bf16 %v2129_v12, %v2128_v13  ;;  %v1572_v18 = vadd.f32 %v6180_v50, %v1571_v16 }
 0x162   : > { %v2131_v19 = vmax.f32 %v1577_v15, 0.0 }
 0x163   : > { %v2130_v20 = vmax.f32 %v1572_v18, 0.0  ;;  %v5114_v21 = vpop.f32.mrb[22].mxu0  ;;  %5296 = vmatmul.mubr.msk.bf16.gmra.mrb[16].mxu1 %vm2341_vm4, %v2247_v17 }
 0x164   : > { %v1587_v22 = vadd.f32 %v5114_v21, %v6180_v50  ;;  %v1581_v23 = vpop.f32.mrb[23].mxu0 }
 0x165   : > { %v2248_v24 = vpack.c.bf16 %v2131_v19, %v2130_v20  ;;  %v1582_v25 = vadd.f32 %v6180_v50, %v1581_v23 }
 0x166   : > { %v2133_v26 = vmax.f32 %v1587_v22, 0.0 }
 0x167   : > { %v2132_v27 = vmax.f32 %v1582_v25, 0.0  ;;  %v5117_v28 = vpop.f32.mrb[24].mxu0  ;;  %5299 = vmatprep.mubr.msk.bf16.mxu1 %vm2341_vm4, %v2248_v24 }
 0x168   : > { %v1597_v29 = vadd.f32 %v5117_v28, %v6180_v50  ;;  %v1591_v30 = vpop.f32.mrb[25].mxu0  ;;  %v5540_v28 = vld [vmem:[%s7615_s5 + $0x48] sm:$0xff]  }
 0x169   : > { %v2249_v31 = vpack.c.bf16 %v2133_v26, %v2132_v27  ;;  %v1592_v32 = vadd.f32 %v6180_v50, %v1591_v30  ;;  %4917 = vmatprep.subr.bf16.mxu0 %v5540_v28 }
 0x16a   : > { %v2135_v34 = vmax.f32 %v1597_v29, 0.0  ;;  %v5541_v29 = vld [vmem:[%s7615_s5 + $0x8] sm:$0xff]  }
 0x16b   : > { %v2134_v36 = vmax.f32 %v1592_v32, 0.0  ;;  %v5120_v37 = vpop.f32.mrb[26].mxu0  ;;  %5300 = vmatmul.mubr.msk.bf16.gmra.mrb[20].mxu1 %vm2341_vm4, %v2249_v31  ;;  %4918 = vmatpush3.bf16.msra.mxu0 %v5541_v29 }
 0x16c   : > { %v1607_v38 = vadd.f32 %v5120_v37, %v6180_v50  ;;  %v1601_v39 = vpop.f32.mrb[27].mxu0 }
 0x16d   : > { %v2250_v40 = vpack.c.bf16 %v2135_v34, %v2134_v36  ;;  %v1602_v41 = vadd.f32 %v6180_v50, %v1601_v39 }
 0x16e   : > { %v2137_v42 = vmax.f32 %v1607_v38, 0.0 }
 0x16f   : > { %v2136_v43 = vmax.f32 %v1602_v41, 0.0  ;;  %v5123_v44 = vpop.f32.mrb[28].mxu0  ;;  %5303 = vmatprep.mubr.msk.bf16.mxu1 %vm2341_vm4, %v2250_v40 }
 0x170   : > { %v1617_v45 = vadd.f32 %v5123_v44, %v6180_v50  ;;  %v1611_v46 = vpop.f32.mrb[29].mxu0 }
 0x171   : > { %v2251_v47 = vpack.c.bf16 %v2137_v42, %v2136_v43  ;;  %v1612_v48 = vadd.f32 %v6180_v50, %v1611_v46 }
 0x172   : > { %v2139_v49 = vmax.f32 %v1617_v45, 0.0 }
 0x173   : > { %v2138_v51 = vmax.f32 %v1612_v48, 0.0  ;;  %v5126_v52 = vpop.f32.mrb[30].mxu0  ;;  %5304 = vmatmul.mubr.msk.bf16.gmra.mrb[24].mxu1 %vm2341_vm4, %v2251_v47 }
 0x174   : > { %v1627_v53 = vadd.f32 %v5126_v52, %v6180_v50  ;;  %v1621_v54 = vpop.f32.mrb[31].mxu0 }
 0x175   : > { %v2252_v55 = vpack.c.bf16 %v2139_v49, %v2138_v51  ;;  %v1622_v56 = vadd.f32 %v6180_v50, %v1621_v54 }
 0x176   : > { %v2141_v57 = vmax.f32 %v1627_v53, 0.0 }
 0x177   : > { %v2140_v58 = vmax.f32 %v1622_v56, 0.0  ;;  %v5129_v59 = vpop.f32.mrb[32].mxu0  ;;  %5307 = vmatprep.mubr.msk.bf16.mxu1 %vm2341_vm4, %v2252_v55 }
 0x178   : > { %v1637_v60 = vadd.f32 %v5129_v59, %v6180_v50  ;;  %v1631_v61 = vpop.f32.mrb[33].mxu0 }
 0x179   : > { %v2253_v62 = vpack.c.bf16 %v2141_v57, %v2140_v58  ;;  %v1632_v63 = vadd.f32 %v6180_v50, %v1631_v61 }
 0x17a   : > { %v2143_v0 = vmax.f32 %v1637_v60, 0.0 }
 0x17b   : > { %v2142_v1 = vmax.f32 %v1632_v63, 0.0  ;;  %v5132_v2 = vpop.f32.mrb[34].mxu0  ;;  %5308 = vmatmul.mubr.msk.bf16.gmra.mrb[28].mxu1 %vm2341_vm4, %v2253_v62 }
 0x17c   : > { %v1647_v3 = vadd.f32 %v5132_v2, %v6180_v50  ;;  %v1641_v4 = vpop.f32.mrb[35].mxu0 }
 0x17d   : > { %v2254_v5 = vpack.c.bf16 %v2143_v0, %v2142_v1  ;;  %v1642_v6 = vadd.f32 %v6180_v50, %v1641_v4 }
 0x17e   : > { %v2145_v7 = vmax.f32 %v1647_v3, 0.0 }
 0x17f   : > { %v2144_v8 = vmax.f32 %v1642_v6, 0.0  ;;  %v5135_v9 = vpop.f32.mrb[36].mxu0  ;;  %5311 = vmatprep.mubr.msk.bf16.mxu1 %vm2341_vm4, %v2254_v5 }
 0x180   : > { %v1657_v10 = vadd.f32 %v5135_v9, %v6180_v50  ;;  %v1651_v11 = vpop.f32.mrb[37].mxu0 }
 0x181   : > { %v2255_v12 = vpack.c.bf16 %v2145_v7, %v2144_v8  ;;  %v1652_v13 = vadd.f32 %v6180_v50, %v1651_v11 }
 0x182   : > { %v2147_v14 = vmax.f32 %v1657_v10, 0.0 }
 0x183   : > { %v2146_v15 = vmax.f32 %v1652_v13, 0.0  ;;  %v5138_v16 = vpop.f32.mrb[38].mxu0  ;;  %5312 = vmatmul.mubr.msk.bf16.gmra.mrb[32].mxu1 %vm2341_vm4, %v2255_v12 }
 0x184   : > { %v1667_v17 = vadd.f32 %v5138_v16, %v6180_v50  ;;  %v1661_v18 = vpop.f32.mrb[39].mxu0 }
 0x185   : > { %v2256_v19 = vpack.c.bf16 %v2147_v14, %v2146_v15  ;;  %v1662_v20 = vadd.f32 %v6180_v50, %v1661_v18 }
 0x186   : > { %v2149_v21 = vmax.f32 %v1667_v17, 0.0 }
 0x187   : > { %v2148_v22 = vmax.f32 %v1662_v20, 0.0  ;;  %v5141_v23 = vpop.f32.mrb[40].mxu0  ;;  %5315 = vmatprep.mubr.msk.bf16.mxu1 %vm2341_vm4, %v2256_v19 }
 0x188   : > { %v1677_v24 = vadd.f32 %v5141_v23, %v6180_v50  ;;  %v1671_v25 = vpop.f32.mrb[41].mxu0  ;;  %v5542_v23 = vld [vmem:[%s7615_s5 + $0x50] sm:$0xff]  }
 0x189   : > { %v2257_v26 = vpack.c.bf16 %v2149_v21, %v2148_v22  ;;  %v1672_v27 = vadd.f32 %v6180_v50, %v1671_v25  ;;  %v5543_v25 = vld [vmem:[%s7615_s5 + $0x10] sm:$0xff]   ;;  %4919 = vmatprep.subr.bf16.mxu0 %v5542_v23 }
 0x18a   : > { %v2151_v30 = vmax.f32 %v1677_v24, 0.0  ;;  %4920 = vmatpush3.bf16.msra.mxu0 %v5543_v25 }
 0x18b   : > { %v2150_v31 = vmax.f32 %v1672_v27, 0.0  ;;  %v5144_v32 = vpop.f32.mrb[42].mxu0  ;;  %5316 = vmatmul.mubr.msk.bf16.gmra.mrb[36].mxu1 %vm2341_vm4, %v2257_v26 }
 0x18c   : > { %v1687_v33 = vadd.f32 %v5144_v32, %v6180_v50  ;;  %v1681_v34 = vpop.f32.mrb[43].mxu0 }
 0x18d   : > { %v2258_v35 = vpack.c.bf16 %v2151_v30, %v2150_v31  ;;  %v1682_v36 = vadd.f32 %v6180_v50, %v1681_v34  ;;  %v5544_v30 = vld [vmem:[%s7615_s5 + $0x80] sm:$0xff]  }
 0x18e   : > { %v2153_v37 = vmax.f32 %v1687_v33, 0.0  ;;  %5407 = vmatprep.subr.bf16.mxu1 %v5544_v30 }
 0x18f   : > { %v2152_v38 = vmax.f32 %v1682_v36, 0.0  ;;  %v5147_v39 = vpop.f32.mrb[44].mxu0  ;;  %5319 = vmatprep.mubr.msk.bf16.mxu1 %vm2341_vm4, %v2258_v35  ;;  %5408 = vmatpush3.bf16.msra.mxu1 %v5544_v30 }
 0x190   : > { %v1697_v40 = vadd.f32 %v5147_v39, %v6180_v50  ;;  %v1691_v41 = vpop.f32.mrb[45].mxu0 }
 0x191   : > { %v2259_v42 = vpack.c.bf16 %v2153_v37, %v2152_v38  ;;  %v1692_v43 = vadd.f32 %v6180_v50, %v1691_v41 }
 0x192   : > { %v2155_v44 = vmax.f32 %v1697_v40, 0.0 }
 0x193   : > { %v2154_v45 = vmax.f32 %v1692_v43, 0.0  ;;  %v5150_v46 = vpop.f32.mrb[46].mxu0  ;;  %5320 = vmatmul.mubr.msk.bf16.gmra.mrb[40].mxu1 %vm2341_vm4, %v2259_v42 }
 0x194   : > { %v1707_v47 = vadd.f32 %v5150_v46, %v6180_v50  ;;  %v1701_v48 = vpop.f32.mrb[47].mxu0 }
 0x195   : > { %v2260_v49 = vpack.c.bf16 %v2155_v44, %v2154_v45  ;;  %v1702_v51 = vadd.f32 %v6180_v50, %v1701_v48 }
 0x196   : > { %v2157_v52 = vmax.f32 %v1707_v47, 0.0 }
 0x197   : > { %v2156_v53 = vmax.f32 %v1702_v51, 0.0  ;;  %v5153_v54 = vpop.f32.mrb[48].mxu0  ;;  %5323 = vmatprep.mubr.msk.bf16.mxu1 %vm2341_vm4, %v2260_v49 }
 0x198   : > { %v1717_v55 = vadd.f32 %v5153_v54, %v6180_v50  ;;  %v1711_v56 = vpop.f32.mrb[49].mxu0 }
 0x199   : > { %v2261_v57 = vpack.c.bf16 %v2157_v52, %v2156_v53  ;;  %v1712_v58 = vadd.f32 %v6180_v50, %v1711_v56 }
 0x19a   : > { %v2159_v59 = vmax.f32 %v1717_v55, 0.0 }
 0x19b   : > { %v2158_v60 = vmax.f32 %v1712_v58, 0.0  ;;  %v5156_v61 = vpop.f32.mrb[50].mxu0  ;;  %5324 = vmatmul.mubr.msk.bf16.gmra.mrb[44].mxu1 %vm2341_vm4, %v2261_v57 }
 0x19c   : > { %v1727_v62 = vadd.f32 %v5156_v61, %v6180_v50  ;;  %v1721_v63 = vpop.f32.mrb[51].mxu0 }
 0x19d   : > { %v2262_v0 = vpack.c.bf16 %v2159_v59, %v2158_v60  ;;  %v1722_v1 = vadd.f32 %v6180_v50, %v1721_v63 }
 0x19e   : > { %v2161_v2 = vmax.f32 %v1727_v62, 0.0 }
 0x19f   : > { %v2160_v3 = vmax.f32 %v1722_v1, 0.0  ;;  %v5159_v4 = vpop.f32.mrb[52].mxu0  ;;  %5327 = vmatprep.mubr.msk.bf16.mxu1 %vm2341_vm4, %v2262_v0 }
 0x1a0   : > { %v1737_v5 = vadd.f32 %v5159_v4, %v6180_v50  ;;  %v1731_v6 = vpop.f32.mrb[53].mxu0 }
 0x1a1   : > { %v2263_v7 = vpack.c.bf16 %v2161_v2, %v2160_v3  ;;  %v1732_v8 = vadd.f32 %v6180_v50, %v1731_v6 }
 0x1a2   : > { %v2163_v9 = vmax.f32 %v1737_v5, 0.0 }
 0x1a3   : > { %v2162_v10 = vmax.f32 %v1732_v8, 0.0  ;;  %v5162_v11 = vpop.f32.mrb[54].mxu0  ;;  %5328 = vmatmul.mubr.msk.bf16.gmra.mrb[48].mxu1 %vm2341_vm4, %v2263_v7 }
 0x1a4   : > { %v1747_v12 = vadd.f32 %v5162_v11, %v6180_v50  ;;  %v1741_v13 = vpop.f32.mrb[55].mxu0 }
 0x1a5   : > { %v2264_v14 = vpack.c.bf16 %v2163_v9, %v2162_v10  ;;  %v1742_v15 = vadd.f32 %v6180_v50, %v1741_v13 }
 0x1a6   : > { %v2165_v16 = vmax.f32 %v1747_v12, 0.0 }
 0x1a7   : > { %v2164_v17 = vmax.f32 %v1742_v15, 0.0  ;;  %v5165_v18 = vpop.f32.mrb[56].mxu0  ;;  %5331 = vmatprep.mubr.msk.bf16.mxu1 %vm2341_vm4, %v2264_v14 }
 0x1a8   : > { %v1757_v19 = vadd.f32 %v5165_v18, %v6180_v50  ;;  %v1751_v20 = vpop.f32.mrb[57].mxu0 }
 0x1a9   : > { %v2265_v21 = vpack.c.bf16 %v2165_v16, %v2164_v17  ;;  %v1752_v22 = vadd.f32 %v6180_v50, %v1751_v20 }
 0x1aa   : > { %v2167_v24 = vmax.f32 %v1757_v19, 0.0  ;;  %v5545_v19 = vld [vmem:[%s7615_s5 + $0x58] sm:$0xff]  }
 0x1ab   : > { %v2166_v26 = vmax.f32 %v1752_v22, 0.0  ;;  %v5168_v27 = vpop.f32.mrb[58].mxu0  ;;  %5332 = vmatmul.mubr.msk.bf16.gmra.mrb[52].mxu1 %vm2341_vm4, %v2265_v21  ;;  %v5546_v21 = vld [vmem:[%s7615_s5 + $0x18] sm:$0xff]   ;;  %4921 = vmatprep.subr.bf16.mxu0 %v5545_v19 }
 0x1ac   : > { %v1767_v28 = vadd.f32 %v5168_v27, %v6180_v50  ;;  %v1761_v29 = vpop.f32.mrb[59].mxu0  ;;  %4922 = vmatpush3.bf16.msra.mxu0 %v5546_v21  ;;  %v5549_v21 = vld [vmem:[%s7615_s5 + $0x20] sm:$0xff]  }
 0x1ad   : > { %v2266_v31 = vpack.c.bf16 %v2167_v24, %v2166_v26  ;;  %v1762_v32 = vadd.f32 %v6180_v50, %v1761_v29  ;;  %v5547_v26 = vld [vmem:[%s7615_s5 + $0x88] sm:$0xff]  }
 0x1ae   : > { %v2169_v33 = vmax.f32 %v1767_v28, 0.0  ;;  %5409 = vmatprep.subr.bf16.mxu1 %v5547_v26 }
 0x1af   : > { %v2168_v34 = vmax.f32 %v1762_v32, 0.0  ;;  %v5171_v35 = vpop.f32.mrb[60].mxu0  ;;  %5335 = vmatprep.mubr.msk.bf16.mxu1 %vm2341_vm4, %v2266_v31  ;;  %5410 = vmatpush3.bf16.msra.mxu1 %v5547_v26 }
 0x1b0   : > { %v1777_v36 = vadd.f32 %v5171_v35, %v6180_v50  ;;  %v1771_v37 = vpop.f32.mrb[61].mxu0 }
 0x1b1   : > { %v2267_v38 = vpack.c.bf16 %v2169_v33, %v2168_v34  ;;  %v1772_v39 = vadd.f32 %v6180_v50, %v1771_v37 }
 0x1b2   : > { %v2171_v40 = vmax.f32 %v1777_v36, 0.0 }
 0x1b3   : > { %v2170_v41 = vmax.f32 %v1772_v39, 0.0  ;;  %v5174_v42 = vpop.f32.mrb[62].mxu0  ;;  %5336 = vmatmul.mubr.msk.bf16.gmra.mrb[56].mxu1 %vm2341_vm4, %v2267_v38 }
 0x1b4   : > { %v1787_v43 = vadd.f32 %v5174_v42, %v6180_v50  ;;  %v1781_v44 = vpop.f32.mrb[63].mxu0 }
 0x1b5   : > { %v2268_v45 = vpack.c.bf16 %v2171_v40, %v2170_v41  ;;  %v1782_v46 = vadd.f32 %v6180_v50, %v1781_v44 }
 0x1b6   : > { %v2173_v47 = vmax.f32 %v1787_v43, 0.0 }
 0x1b7   : > { %v2172_v48 = vmax.f32 %v1782_v46, 0.0  ;;  %v5177_v49 = vpop.f32.mrb[64].mxu0  ;;  %5339 = vmatprep.mubr.msk.bf16.mxu1 %vm2341_vm4, %v2268_v45 }
 0x1b8   : > { %v1797_v51 = vadd.f32 %v5177_v49, %v6180_v50  ;;  %v1791_v52 = vpop.f32.mrb[65].mxu0 }
 0x1b9   : > { %v2269_v53 = vpack.c.bf16 %v2173_v47, %v2172_v48  ;;  %v1792_v54 = vadd.f32 %v6180_v50, %v1791_v52 }
 0x1ba   : > { %v2175_v55 = vmax.f32 %v1797_v51, 0.0 }
 0x1bb   : > { %v2174_v56 = vmax.f32 %v1792_v54, 0.0  ;;  %v5180_v57 = vpop.f32.mrb[66].mxu0  ;;  %5340 = vmatmul.mubr.msk.bf16.gmra.mrb[60].mxu1 %vm2341_vm4, %v2269_v53 }
 0x1bc   : > { %v1807_v58 = vadd.f32 %v5180_v57, %v6180_v50  ;;  %v1801_v59 = vpop.f32.mrb[67].mxu0 }
 0x1bd   : > { %v2270_v60 = vpack.c.bf16 %v2175_v55, %v2174_v56  ;;  %v1802_v61 = vadd.f32 %v6180_v50, %v1801_v59 }
 0x1be   : > { %v2177_v62 = vmax.f32 %v1807_v58, 0.0 }
 0x1bf   : > { %v2176_v63 = vmax.f32 %v1802_v61, 0.0  ;;  %v5183_v0 = vpop.f32.mrb[68].mxu0  ;;  %5343 = vmatprep.mubr.msk.bf16.mxu1 %vm2341_vm4, %v2270_v60 }
 0x1c0   : > { %v1817_v1 = vadd.f32 %v5183_v0, %v6180_v50  ;;  %v1811_v2 = vpop.f32.mrb[69].mxu0 }
 0x1c1   : > { %v2271_v3 = vpack.c.bf16 %v2177_v62, %v2176_v63  ;;  %v1812_v4 = vadd.f32 %v6180_v50, %v1811_v2 }
 0x1c2   : > { %v2179_v5 = vmax.f32 %v1817_v1, 0.0 }
 0x1c3   : > { %v2178_v6 = vmax.f32 %v1812_v4, 0.0  ;;  %v5186_v7 = vpop.f32.mrb[70].mxu0  ;;  %5344 = vmatmul.mubr.msk.bf16.gmra.mrb[64].mxu1 %vm2341_vm4, %v2271_v3 }
 0x1c4   : > { %v1827_v8 = vadd.f32 %v5186_v7, %v6180_v50  ;;  %v1821_v9 = vpop.f32.mrb[71].mxu0 }
 0x1c5   : > { %v2272_v10 = vpack.c.bf16 %v2179_v5, %v2178_v6  ;;  %v1822_v11 = vadd.f32 %v6180_v50, %v1821_v9 }
 0x1c6   : > { %v2181_v12 = vmax.f32 %v1827_v8, 0.0 }
 0x1c7   : > { %v2180_v13 = vmax.f32 %v1822_v11, 0.0  ;;  %v5189_v14 = vpop.f32.mrb[72].mxu0  ;;  %5347 = vmatprep.mubr.msk.bf16.mxu1 %vm2341_vm4, %v2272_v10 }
 0x1c8   : > { %v1837_v15 = vadd.f32 %v5189_v14, %v6180_v50  ;;  %v1831_v16 = vpop.f32.mrb[73].mxu0 }
 0x1c9   : > { %v2273_v17 = vpack.c.bf16 %v2181_v12, %v2180_v13  ;;  %v1832_v18 = vadd.f32 %v6180_v50, %v1831_v16 }
 0x1ca   : > { %v2183_v20 = vmax.f32 %v1837_v15, 0.0 }
 0x1cb   : > { %v2182_v22 = vmax.f32 %v1832_v18, 0.0  ;;  %v5192_v23 = vpop.f32.mrb[74].mxu0  ;;  %5348 = vmatmul.mubr.msk.bf16.gmra.mrb[68].mxu1 %vm2341_vm4, %v2273_v17  ;;  %v5548_v18 = vld [vmem:[%s7615_s5 + $0x60] sm:$0xff]  }
 0x1cc   : > { %v1847_v24 = vadd.f32 %v5192_v23, %v6180_v50  ;;  %v1841_v25 = vpop.f32.mrb[75].mxu0  ;;  %4923 = vmatprep.subr.bf16.mxu0 %v5548_v18 }
 0x1cd   : > { %v2274_v27 = vpack.c.bf16 %v2183_v20, %v2182_v22  ;;  %v1842_v28 = vadd.f32 %v6180_v50, %v1841_v25  ;;  %4924 = vmatpush3.bf16.msra.mxu0 %v5549_v21  ;;  %v5550_v25 = vld [vmem:[%s7615_s5 + $0x90] sm:$0xff]   ;;  %v5553_v21 = vld [vmem:[%s7615_s5 + $0x98] sm:$0xff]  }
 0x1ce   : > { %v2185_v29 = vmax.f32 %v1847_v24, 0.0  ;;  %5411 = vmatprep.subr.bf16.mxu1 %v5550_v25 }
 0x1cf   : > { %v2184_v30 = vmax.f32 %v1842_v28, 0.0  ;;  %v5195_v31 = vpop.f32.mrb[76].mxu0  ;;  %5351 = vmatprep.mubr.msk.bf16.mxu1 %vm2341_vm4, %v2274_v27  ;;  %5412 = vmatpush3.bf16.msra.mxu1 %v5550_v25 }
 0x1d0   : > { %v1857_v32 = vadd.f32 %v5195_v31, %v6180_v50  ;;  %v1851_v33 = vpop.f32.mrb[77].mxu0  ;;  %5413 = vmatprep.subr.bf16.mxu1 %v5553_v21 }
 0x1d1   : > { %v2275_v34 = vpack.c.bf16 %v2185_v29, %v2184_v30  ;;  %v1852_v35 = vadd.f32 %v6180_v50, %v1851_v33 }
 0x1d2   : > { %v2187_v36 = vmax.f32 %v1857_v32, 0.0 }
 0x1d3   : > { %v2186_v37 = vmax.f32 %v1852_v35, 0.0  ;;  %v5198_v38 = vpop.f32.mrb[78].mxu0  ;;  %5352 = vmatmul.mubr.msk.bf16.gmra.mrb[72].mxu1 %vm2341_vm4, %v2275_v34 }
 0x1d4   : > { %v1867_v39 = vadd.f32 %v5198_v38, %v6180_v50  ;;  %v1861_v40 = vpop.f32.mrb[79].mxu0  ;;  %5414 = vmatpush3.bf16.msra.mxu1 %v5553_v21 }
 0x1d5   : > { %v2276_v41 = vpack.c.bf16 %v2187_v36, %v2186_v37  ;;  %v1862_v42 = vadd.f32 %v6180_v50, %v1861_v40 }
 0x1d6   : > { %v2189_v43 = vmax.f32 %v1867_v39, 0.0 }
 0x1d7   : > { %v2188_v44 = vmax.f32 %v1862_v42, 0.0  ;;  %v5201_v45 = vpop.f32.mrb[80].mxu0  ;;  %5355 = vmatprep.mubr.msk.bf16.mxu1 %vm2341_vm4, %v2276_v41 }
 0x1d8   : > { %v1877_v46 = vadd.f32 %v5201_v45, %v6180_v50  ;;  %v1871_v47 = vpop.f32.mrb[81].mxu0 }
 0x1d9   : > { %v2277_v48 = vpack.c.bf16 %v2189_v43, %v2188_v44  ;;  %v1872_v49 = vadd.f32 %v6180_v50, %v1871_v47 }
 0x1da   : > { %v2191_v51 = vmax.f32 %v1877_v46, 0.0 }
 0x1db   : > { %v2190_v52 = vmax.f32 %v1872_v49, 0.0  ;;  %v5204_v53 = vpop.f32.mrb[82].mxu0  ;;  %5356 = vmatmul.mubr.msk.bf16.gmra.mrb[76].mxu1 %vm2341_vm4, %v2277_v48 }
 0x1dc   : > { %v1887_v54 = vadd.f32 %v5204_v53, %v6180_v50  ;;  %v1881_v55 = vpop.f32.mrb[83].mxu0 }
 0x1dd   : > { %v2278_v56 = vpack.c.bf16 %v2191_v51, %v2190_v52  ;;  %v1882_v57 = vadd.f32 %v6180_v50, %v1881_v55 }
 0x1de   : > { %v2193_v58 = vmax.f32 %v1887_v54, 0.0 }
 0x1df   : > { %v2192_v59 = vmax.f32 %v1882_v57, 0.0  ;;  %v5207_v60 = vpop.f32.mrb[84].mxu0  ;;  %5359 = vmatprep.mubr.msk.bf16.mxu1 %vm2341_vm4, %v2278_v56 }
 0x1e0   : > { %v1897_v61 = vadd.f32 %v5207_v60, %v6180_v50  ;;  %v1891_v62 = vpop.f32.mrb[85].mxu0 }
 0x1e1   : > { %v2279_v63 = vpack.c.bf16 %v2193_v58, %v2192_v59  ;;  %v1892_v0 = vadd.f32 %v6180_v50, %v1891_v62 }
 0x1e2   : > { %v2195_v1 = vmax.f32 %v1897_v61, 0.0 }
 0x1e3   : > { %v2194_v2 = vmax.f32 %v1892_v0, 0.0  ;;  %v5210_v3 = vpop.f32.mrb[86].mxu0  ;;  %5360 = vmatmul.mubr.msk.bf16.gmra.mrb[80].mxu1 %vm2341_vm4, %v2279_v63 }
 0x1e4   : > { %v1907_v4 = vadd.f32 %v5210_v3, %v6180_v50  ;;  %v1901_v5 = vpop.f32.mrb[87].mxu0 }
 0x1e5   : > { %v2280_v6 = vpack.c.bf16 %v2195_v1, %v2194_v2  ;;  %v1902_v7 = vadd.f32 %v6180_v50, %v1901_v5 }
 0x1e6   : > { %v2197_v8 = vmax.f32 %v1907_v4, 0.0 }
 0x1e7   : > { %v2196_v9 = vmax.f32 %v1902_v7, 0.0  ;;  %v5213_v10 = vpop.f32.mrb[88].mxu0  ;;  %5363 = vmatprep.mubr.msk.bf16.mxu1 %vm2341_vm4, %v2280_v6 }
 0x1e8   : > { %v1917_v11 = vadd.f32 %v5213_v10, %v6180_v50  ;;  %v1911_v12 = vpop.f32.mrb[89].mxu0 }
 0x1e9   : > { %v2281_v13 = vpack.c.bf16 %v2197_v8, %v2196_v9  ;;  %v1912_v14 = vadd.f32 %v6180_v50, %v1911_v12 }
 0x1ea   : > { %v2199_v15 = vmax.f32 %v1917_v11, 0.0 }
 0x1eb   : > { %v2198_v16 = vmax.f32 %v1912_v14, 0.0  ;;  %v5216_v17 = vpop.f32.mrb[90].mxu0  ;;  %5364 = vmatmul.mubr.msk.bf16.gmra.mrb[84].mxu1 %vm2341_vm4, %v2281_v13  ;;  %v5551_v14 = vld [vmem:[%s7615_s5 + $0x68] sm:$0xff]  }
 0x1ec   : > { %v1927_v19 = vadd.f32 %v5216_v17, %v6180_v50  ;;  %v1921_v20 = vpop.f32.mrb[91].mxu0  ;;  %v5552_v17 = vld [vmem:[%s7615_s5 + $0x28] sm:$0xff]   ;;  %4925 = vmatprep.subr.bf16.mxu0 %v5551_v14 }
 0x1ed   : > { %v2282_v22 = vpack.c.bf16 %v2199_v15, %v2198_v16  ;;  %v1922_v23 = vadd.f32 %v6180_v50, %v1921_v20  ;;  %4926 = vmatpush3.bf16.msra.mxu0 %v5552_v17 }
 0x1ee   : > { %v2201_v24 = vmax.f32 %v1927_v19, 0.0 }
 0x1ef   : > { %v2200_v26 = vmax.f32 %v1922_v23, 0.0  ;;  %v5219_v27 = vpop.f32.mrb[92].mxu0  ;;  %5367 = vmatprep.mubr.msk.bf16.mxu1 %vm2341_vm4, %v2282_v22 }
 0x1f0   : > { %v1937_v28 = vadd.f32 %v5219_v27, %v6180_v50  ;;  %v1931_v29 = vpop.f32.mrb[93].mxu0  ;;  %v6438_v27 = vld [vmem:[%s7612_s2] ss:$0 sm:$0xff] }
 0x1f1   : > { %v2283_v30 = vpack.c.bf16 %v2201_v24, %v2200_v26  ;;  %v1932_v31 = vadd.f32 %v6180_v50, %v1931_v29 }
 0x1f2   : > { %v2203_v32 = vmax.f32 %v1937_v28, 0.0 }
 0x1f3   : > { %v2202_v33 = vmax.f32 %v1932_v31, 0.0  ;;  %v5222_v34 = vpop.f32.mrb[94].mxu0  ;;  %5368 = vmatmul.mubr.msk.bf16.gmra.mrb[88].mxu1 %vm2341_vm4, %v2283_v30 }
 0x1f4   : > { %v1947_v35 = vadd.f32 %v5222_v34, %v6180_v50  ;;  %v1941_v36 = vpop.f32.mrb[95].mxu0 }
 0x1f5   : > { %v2284_v37 = vpack.c.bf16 %v2203_v32, %v2202_v33  ;;  %v1942_v38 = vadd.f32 %v6180_v50, %v1941_v36 }
 0x1f6   : > { %v2205_v39 = vmax.f32 %v1947_v35, 0.0 }
 0x1f7   : > { %v2204_v40 = vmax.f32 %v1942_v38, 0.0  ;;  %v5225_v41 = vpop.f32.mrb[96].mxu0  ;;  %5371 = vmatprep.mubr.msk.bf16.mxu1 %vm2341_vm4, %v2284_v37 }
 0x1f8   : > { %v1957_v42 = vadd.f32 %v5225_v41, %v6180_v50  ;;  %v1951_v43 = vpop.f32.mrb[97].mxu0 }
 0x1f9   : > { %v2285_v44 = vpack.c.bf16 %v2205_v39, %v2204_v40  ;;  %v1952_v45 = vadd.f32 %v6180_v50, %v1951_v43 }
 0x1fa   : > { %v2207_v46 = vmax.f32 %v1957_v42, 0.0 }
 0x1fb   : > { %v2206_v47 = vmax.f32 %v1952_v45, 0.0  ;;  %v5228_v48 = vpop.f32.mrb[98].mxu0  ;;  %5372 = vmatmul.mubr.msk.bf16.gmra.mrb[92].mxu1 %vm2341_vm4, %v2285_v44 }
 0x1fc   : > { %v1967_v49 = vadd.f32 %v5228_v48, %v6180_v50  ;;  %v1961_v51 = vpop.f32.mrb[99].mxu0 }
 0x1fd   : > { %v2286_v52 = vpack.c.bf16 %v2207_v46, %v2206_v47  ;;  %v1962_v53 = vadd.f32 %v6180_v50, %v1961_v51 }
 0x1fe   : > { %v2209_v54 = vmax.f32 %v1967_v49, 0.0 }
 0x1ff   : > { %v2208_v55 = vmax.f32 %v1962_v53, 0.0  ;;  %5375 = vmatprep.mubr.msk.bf16.mxu1 %vm2341_vm4, %v2286_v52  ;;  %v5231_v56 = vpop.f32.mrb[100].mxu0 }
 0x200   : > { %v1977_v57 = vadd.f32 %v5231_v56, %v6180_v50  ;;  %v1971_v58 = vpop.f32.mrb[101].mxu0 }
 0x201   : > { %v2287_v59 = vpack.c.bf16 %v2209_v54, %v2208_v55  ;;  %v1972_v60 = vadd.f32 %v6180_v50, %v1971_v58 }
 0x202   : > { %v2211_v61 = vmax.f32 %v1977_v57, 0.0 }
 0x203   : > { %v2210_v62 = vmax.f32 %v1972_v60, 0.0  ;;  %v5234_v63 = vpop.f32.mrb[102].mxu0  ;;  %5376 = vmatmul.mubr.msk.bf16.gmra.mrb[96].mxu1 %vm2341_vm4, %v2287_v59 }
 0x204   : > { %v1987_v0 = vadd.f32 %v5234_v63, %v6180_v50  ;;  %v1981_v1 = vpop.f32.mrb[103].mxu0 }
 0x205   : > { %v2288_v2 = vpack.c.bf16 %v2211_v61, %v2210_v62  ;;  %v1982_v3 = vadd.f32 %v6180_v50, %v1981_v1 }
 0x206   : > { %v2213_v4 = vmax.f32 %v1987_v0, 0.0 }
 0x207   : > { %v2212_v5 = vmax.f32 %v1982_v3, 0.0  ;;  %v5237_v6 = vpop.f32.mrb[104].mxu0  ;;  %5379 = vmatprep.mubr.msk.bf16.mxu1 %vm2341_vm4, %v2288_v2 }
 0x208   : > { %v1997_v7 = vadd.f32 %v5237_v6, %v6180_v50  ;;  %v1991_v8 = vpop.f32.mrb[105].mxu0 }
 0x209   : > { %v2289_v9 = vpack.c.bf16 %v2213_v4, %v2212_v5  ;;  %v1992_v10 = vadd.f32 %v6180_v50, %v1991_v8 }
 0x20a   : > { %v2215_v11 = vmax.f32 %v1997_v7, 0.0 }
 0x20b   : > { %v2214_v12 = vmax.f32 %v1992_v10, 0.0  ;;  %v5240_v13 = vpop.f32.mrb[106].mxu0  ;;  %5380 = vmatmul.mubr.msk.bf16.gmra.mrb[100].mxu1 %vm2341_vm4, %v2289_v9 }
 0x20c   : > { %v2007_v15 = vadd.f32 %v5240_v13, %v6180_v50  ;;  %v2001_v16 = vpop.f32.mrb[107].mxu0 }
 0x20d   : > { %v2290_v18 = vpack.c.bf16 %v2215_v11, %v2214_v12  ;;  %v2002_v19 = vadd.f32 %v6180_v50, %v2001_v16 }
 0x20e   : > { %v2217_v20 = vmax.f32 %v2007_v15, 0.0 }
 0x20f   : > { %v2216_v22 = vmax.f32 %v2002_v19, 0.0  ;;  %v5243_v23 = vpop.f32.mrb[108].mxu0  ;;  %5383 = vmatprep.mubr.msk.bf16.mxu1 %vm2341_vm4, %v2290_v18 }
 0x210   : > { %v2017_v24 = vadd.f32 %v5243_v23, %v6180_v50  ;;  %v2011_v25 = vpop.f32.mrb[109].mxu0 }
 0x211   : > { %v2291_v26 = vpack.c.bf16 %v2217_v20, %v2216_v22  ;;  %v2012_v28 = vadd.f32 %v6438_v27, %v2011_v25  ;;  %v5554_v22 = vld [vmem:[%s7615_s5 + $0x70] sm:$0xff]  }
 0x212   : > { %v2219_v29 = vmax.f32 %v2017_v24, 0.0  ;;  %v5555_v25 = vld [vmem:[%s7615_s5 + $0x30] sm:$0xff]   ;;  %4927 = vmatprep.subr.bf16.mxu0 %v5554_v22 }
 0x213   : > { %v2218_v30 = vmax.f32 %v2012_v28, 0.0  ;;  %v5246_v31 = vpop.f32.mrb[110].mxu0  ;;  %5384 = vmatmul.mubr.msk.bf16.gmra.mrb[104].mxu1 %vm2341_vm4, %v2291_v26  ;;  %4928 = vmatpush3.bf16.msra.mxu0 %v5555_v25 }
 0x214   : > { %v2027_v32 = vadd.f32 %v6438_v27, %v5246_v31  ;;  %v2021_v33 = vpop.f32.mrb[111].mxu0  ;;  %v5556_v31 = vld [vmem:[%s7615_s5 + $0xa0] sm:$0xff]  }
 0x215   : > { %v2292_v50 = vpack.c.bf16 %v2219_v29, %v2218_v30  ;;  %v2022_v34 = vadd.f32 %v6438_v27, %v2021_v33  ;;  %5415 = vmatprep.subr.bf16.mxu1 %v5556_v31 }
 0x216   : > { %v2221_v35 = vmax.f32 %v2027_v32, 0.0  ;;  %v6444_v36 = vpop.f32.mrb[0].mxu1  ;;  %5416 = vmatpush3.bf16.msra.mxu1 %v5556_v31 }
 0x217   : > { %v2220_v37 = vmax.f32 %v2022_v34, 0.0  ;;  %v6446_v38 = vpop.f32.mrb[1].mxu1  ;;  %v5249_v39 = vpop.f32.mrb[112].mxu0  ;;  %5387 = vmatprep.mubr.msk.bf16.mxu1 %vm2341_vm4, %v2292_v50 }
 0x218   : > { %v6449_v40 = vpop.f32.mrb[2].mxu1  ;;  %v2037_v41 = vadd.f32 %v6438_v27, %v5249_v39  ;;  %v2031_v42 = vpop.f32.mrb[113].mxu0 }
 0x219   : > { %v2293_v43 = vpack.c.bf16 %v2221_v35, %v2220_v37  ;;  %v6452_v44 = vpop.f32.mrb[3].mxu1  ;;  %v2032_v45 = vadd.f32 %v6438_v27, %v2031_v42 }
 0x21a   : > { %v2223_v46 = vmax.f32 %v2037_v41, 0.0 }
 0x21b   : > { %v2222_v47 = vmax.f32 %v2032_v45, 0.0  ;;  %v5252_v48 = vpop.f32.mrb[114].mxu0  ;;  %5388 = vmatmul.mubr.msk.bf16.gmra.mrb[108].mxu1 %vm2341_vm4, %v2293_v43 }
 0x21c   : > { %v2047_v49 = vadd.f32 %v6438_v27, %v5252_v48  ;;  %v2041_v51 = vpop.f32.mrb[115].mxu0 }
 0x21d   : > { %v2294_v52 = vpack.c.bf16 %v2223_v46, %v2222_v47  ;;  %v2042_v53 = vadd.f32 %v6438_v27, %v2041_v51 }
 0x21e   : > { %v2225_v54 = vmax.f32 %v2047_v49, 0.0  ;;  %v6458_v55 = vpop.f32.mrb[4].mxu1 }
 0x21f   : > { %v2224_v56 = vmax.f32 %v2042_v53, 0.0  ;;  %v6460_v57 = vpop.f32.mrb[5].mxu1  ;;  %v5255_v58 = vpop.f32.mrb[116].mxu0  ;;  %5391 = vmatprep.mubr.msk.bf16.mxu1 %vm2341_vm4, %v2294_v52 }
 0x220   : > { %v6463_v59 = vpop.f32.mrb[6].mxu1  ;;  %v2057_v60 = vadd.f32 %v6438_v27, %v5255_v58  ;;  %v2051_v61 = vpop.f32.mrb[117].mxu0 }
 0x221   : > { %v2295_v62 = vpack.c.bf16 %v2225_v54, %v2224_v56  ;;  %v6466_v63 = vpop.f32.mrb[7].mxu1  ;;  %v2052_v0 = vadd.f32 %v6438_v27, %v2051_v61 }
 0x222   : > { %v2227_v1 = vmax.f32 %v2057_v60, 0.0 }
 0x223   : > { %v2226_v2 = vmax.f32 %v2052_v0, 0.0  ;;  %v5258_v3 = vpop.f32.mrb[118].mxu0  ;;  %5392 = vmatmul.mubr.msk.bf16.gmra.mrb[112].mxu1 %vm2341_vm4, %v2295_v62 }
 0x224   : > { %v2067_v4 = vadd.f32 %v6438_v27, %v5258_v3  ;;  %v2061_v5 = vpop.f32.mrb[119].mxu0 }
 0x225   : > { %v2296_v6 = vpack.c.bf16 %v2227_v1, %v2226_v2  ;;  %v2062_v7 = vadd.f32 %v6438_v27, %v2061_v5 }
 0x226   : > { %v2229_v8 = vmax.f32 %v2067_v4, 0.0  ;;  %v6472_v9 = vpop.f32.mrb[8].mxu1 }
 0x227   : > { %v2228_v10 = vmax.f32 %v2062_v7, 0.0  ;;  %v6474_v11 = vpop.f32.mrb[9].mxu1  ;;  %v5261_v12 = vpop.f32.mrb[120].mxu0  ;;  %5395 = vmatprep.mubr.msk.bf16.mxu1 %vm2341_vm4, %v2296_v6  ;;  %v5557_v6 = vld [vmem:[%s7615_s5 + $0x78] sm:$0xff]  }
 0x228   : > { %v6477_v13 = vpop.f32.mrb[10].mxu1  ;;  %v2077_v14 = vadd.f32 %v6438_v27, %v5261_v12  ;;  %v2071_v15 = vpop.f32.mrb[121].mxu0  ;;  %v5558_v7 = vld [vmem:[%s7615_s5 + $0x38] sm:$0xff]   ;;  %4929 = vmatprep.subr.bf16.mxu0 %v5557_v6 }
 0x229   : > { %v2297_v16 = vpack.c.bf16 %v2229_v8, %v2228_v10  ;;  %v6480_v17 = vpop.f32.mrb[11].mxu1  ;;  %v2072_v18 = vadd.f32 %v6438_v27, %v2071_v15  ;;  %4930 = vmatpush3.bf16.msra.mxu0 %v5558_v7  ;;  %v5559_v10 = vld [vmem:[%s7615_s5 + $0xa8] sm:$0xff]  }
 0x22a   : > { %v2231_v19 = vmax.f32 %v2077_v14, 0.0  ;;  %5417 = vmatprep.subr.bf16.mxu1 %v5559_v10 }
 0x22b   : > { %v2230_v20 = vmax.f32 %v2072_v18, 0.0  ;;  %v5264_v21 = vpop.f32.mrb[122].mxu0  ;;  %5396 = vmatmul.mubr.msk.bf16.gmra.mrb[116].mxu1 %vm2341_vm4, %v2297_v16  ;;  %v6555_v16 = vld [vmem:[%s7614_s4] ss:$0 sm:$0xff] }
 0x22c   : > { %v2087_v23 = vadd.f32 %v6438_v27, %v5264_v21  ;;  %v2081_v24 = vpop.f32.mrb[123].mxu0  ;;  %5418 = vmatpush3.bf16.msra.mxu1 %v5559_v10  ;;  %v2577_v18 = vadd.f32 %v6444_v36, %v6555_v16  ;;  %v2580_v21 = vadd.f32 %v6449_v40, %v6555_v16  ;;  %v2596_v6 = vadd.f32 %v6463_v59, %v6555_v16 }
 0x22d   : > { %v2298_v26 = vpack.c.bf16 %v2231_v19, %v2230_v20  ;;  %v2082_v28 = vadd.f32 %v6438_v27, %v2081_v24  ;;  %v2569_v19 = vadd.f32 %v6555_v16, %v6446_v38  ;;  %v2572_v24 = vadd.f32 %v6555_v16, %v6452_v44 }
 0x22e   : > { %v2233_v29 = vmax.f32 %v2087_v23, 0.0  ;;  %v6492_v30 = vpop.f32.mrb[12].mxu1 }
 0x22f   : > { %v2232_v32 = vmax.f32 %v2082_v28, 0.0  ;;  %v6497_v33 = vpop.f32.mrb[13].mxu1  ;;  %v5267_v50 = vpop.f32.mrb[124].mxu0  ;;  %5399 = vmatprep.mubr.msk.bf16.mxu1 %vm2341_vm4, %v2298_v26  ;;  %v3081_v28 = vmax.f32 %v2577_v18, 0.0 }
 0x230   : > { %v6500_v34 = vpop.f32.mrb[14].mxu1  ;;  %v2097_v35 = vadd.f32 %v6438_v27, %v5267_v50  ;;  %v2091_v37 = vpop.f32.mrb[125].mxu0 }
 0x231   : > { %v2299_v39 = vpack.c.bf16 %v2233_v29, %v2232_v32  ;;  %v6503_v41 = vpop.f32.mrb[15].mxu1  ;;  %v2092_v42 = vadd.f32 %v6438_v27, %v2091_v37  ;;  %v3079_v32 = vmax.f32 %v2569_v19, 0.0 }
 0x232   : > { %v2235_v43 = vmax.f32 %v2097_v35, 0.0  ;;  %v3082_v35 = vmax.f32 %v2580_v21, 0.0 }
 0x233   : > { %v2234_v45 = vmax.f32 %v2092_v42, 0.0  ;;  %v5270_v46 = vpop.f32.mrb[126].mxu0  ;;  %5400 = vmatmul.mubr.msk.bf16.gmra.mrb[120].mxu1 %vm2341_vm4, %v2299_v39  ;;  %v3080_v42 = vmax.f32 %v2572_v24, 0.0 }
 0x234   : > { %v2107_v47 = vadd.f32 %v6438_v27, %v5270_v46  ;;  %v2101_v48 = vpop.f32.mrb[127].mxu0  ;;  %v5560_v46 = vld [vmem:[%s7615_s5 + $0xb0] sm:$0xff]  }
 0x235   : > { %v2300_v49 = vpack.c.bf16 %v2235_v43, %v2234_v45  ;;  %v2102_v51 = vadd.f32 %v6438_v27, %v2101_v48  ;;  %5419 = vmatprep.subr.bf16.mxu1 %v5560_v46 }
 0x236   : > { %v2237_v52 = vmax.f32 %v2107_v47, 0.0  ;;  %v6509_v53 = vpop.f32.mrb[16].mxu1  ;;  %v2593_v47 = vadd.f32 %v6458_v55, %v6555_v16  ;;  %5420 = vmatpush3.bf16.msra.mxu1 %v5560_v46  ;;  %v2588_v55 = vadd.f32 %v6555_v16, %v6466_v63 }
 0x237   : > { %v2236_v54 = vmax.f32 %v2102_v51, 0.0  ;;  %v6511_v56 = vpop.f32.mrb[17].mxu1  ;;  %5403 = vmatprep.mubr.msk.bf16.mxu1 %vm2341_vm4, %v2300_v49  ;;  %v2585_v51 = vadd.f32 %v6555_v16, %v6460_v57 }
 0x238   : > { %v6514_v58 = vpop.f32.mrb[18].mxu1  ;;  %v3085_v57 = vmax.f32 %v2593_v47, 0.0 }
 0x239   : > { %v2301_v60 = vpack.c.bf16 %v2237_v52, %v2236_v54  ;;  %v6516_v61 = vpop.f32.mrb[19].mxu1  ;;  %v3083_v59 = vmax.f32 %v2585_v51, 0.0  ;;  %v2612_v51 = vadd.f32 %v6477_v13, %v6555_v16 }
 0x23b   : > { %5404 = vmatmul.mubr.msk.bf16.gmra.mrb[124].mxu1 %vm2341_vm4, %v2301_v60 }
 0x23e   : > { %v6519_v62 = vpop.f32.mrb[20].mxu1 }
 0x23f   : > { %v6521_v0 = vpop.f32.mrb[21].mxu1 }
 0x240   : > { %v6523_v27 = vpop.f32.mrb[22].mxu1 }
 0x241   : > { %v6525_v1 = vpop.f32.mrb[23].mxu1 }
 0x246   : > { %v6527_v2 = vpop.f32.mrb[24].mxu1 }
 0x247   : > { %v6529_v3 = vpop.f32.mrb[25].mxu1 }
 0x248   : > { %v6531_v4 = vpop.f32.mrb[26].mxu1 }
 0x249   : > { %v6533_v5 = vpop.f32.mrb[27].mxu1 }
 0x24e   : > { %v6541_v8 = vpop.f32.mrb[28].mxu1 }
 0x24f   : > { %v6546_v12 = vpop.f32.mrb[29].mxu1 }
 0x250   : > { %v6548_v14 = vpop.f32.mrb[30].mxu1 }
 0x251   : > { %v6550_v15 = vpop.f32.mrb[31].mxu1 }
 0x256   : > { %v5313_v20 = vpop.f32.mrb[32].mxu1 }
 0x257   : > { %v2705_v22 = vadd.f32 %v5313_v20, %v6555_v16  ;;  %v2696_v23 = vpop.f32.mrb[33].mxu1 }
 0x258   : > { %v2697_v25 = vadd.f32 %v6555_v16, %v2696_v23  ;;  %v5314_v26 = vpop.f32.mrb[34].mxu1  ;;  %v5561_v23 = vld [vmem:[%s7615_s5 + $0xb8] sm:$0xff]  }
 0x259   : > { %v3113_v29 = vmax.f32 %v2705_v22, 0.0  ;;  %v2708_v36 = vadd.f32 %v5314_v26, %v6555_v16  ;;  %v2699_v31 = vpop.f32.mrb[35].mxu1  ;;  %v3086_v26 = vmax.f32 %v2596_v6, 0.0  ;;  %5421 = vmatprep.subr.bf16.mxu1 %v5561_v23 }
 0x25a   : > { %v3111_v38 = vmax.f32 %v2697_v25, 0.0  ;;  %v2700_v50 = vadd.f32 %v6555_v16, %v2699_v31  ;;  %5422 = vmatpush3.bf16.msra.mxu1 %v5561_v23 }
 0x25b   : > { %v6569_v40 = vmax.f32 %v3081_v28, %v3113_v29  ;;  %v6571_v37 = vadd.f32 %v3113_v29, %v3081_v28  ;;  %v3114_v39 = vmax.f32 %v2708_v36, 0.0  ;;  %v3084_v36 = vmax.f32 %v2588_v55, 0.0 }
 0x25c   : > { %v6573_v44 = vmax.f32 %v3079_v32, %v3111_v38  ;;  %v6575_v43 = vadd.f32 %v3111_v38, %v3079_v32  ;;  %v3112_v45 = vmax.f32 %v2700_v50, 0.0  ;;  %v2609_v50 = vadd.f32 %v6472_v9, %v6555_v16 }
 0x25d   : > { %v6582_v48 = vmax.f32 %v3082_v35, %v3114_v39  ;;  %v6584_v49 = vadd.f32 %v3114_v39, %v3082_v35  ;;  %v2604_v9 = vadd.f32 %v6555_v16, %v6480_v17 }
 0x25e   : > { %v6588_v52 = vmax.f32 %v3080_v42, %v3112_v45  ;;  %v6590_v54 = vadd.f32 %v3112_v45, %v3080_v42  ;;  %v5317_v60 = vpop.f32.mrb[36].mxu1  ;;  %v2601_v42 = vadd.f32 %v6555_v16, %v6474_v11  ;;  %v3089_v55 = vmax.f32 %v2609_v50, 0.0 }
 0x25f   : > { %v2721_v7 = vadd.f32 %v5317_v60, %v6555_v16  ;;  %v2712_v10 = vpop.f32.mrb[37].mxu1  ;;  %v2617_v50 = vadd.f32 %v6555_v16, %v6497_v33 }
 0x260   : > { %v2713_v18 = vadd.f32 %v6555_v16, %v2712_v10  ;;  %v5318_v19 = vpop.f32.mrb[38].mxu1 }
 0x261   : > { %v3117_v20 = vmax.f32 %v2721_v7, 0.0  ;;  %v2724_v21 = vadd.f32 %v5318_v19, %v6555_v16  ;;  %v2715_v22 = vpop.f32.mrb[39].mxu1 }
 0x262   : > { %v3115_v24 = vmax.f32 %v2713_v18, 0.0  ;;  %v2716_v25 = vadd.f32 %v6555_v16, %v2715_v22  ;;  %v3090_v22 = vmax.f32 %v2612_v51, 0.0 }
 0x263   : > { %v6603_v28 = vmax.f32 %v3085_v57, %v3117_v20  ;;  %v6605_v63 = vadd.f32 %v3117_v20, %v3085_v57  ;;  %v3118_v29 = vmax.f32 %v2724_v21, 0.0  ;;  %v3087_v57 = vmax.f32 %v2601_v42, 0.0 }
 0x264   : > { %v6607_v31 = vmax.f32 %v3083_v59, %v3115_v24  ;;  %v6609_v32 = vadd.f32 %v3115_v24, %v3083_v59  ;;  %v3116_v38 = vmax.f32 %v2716_v25, 0.0  ;;  %v3088_v24 = vmax.f32 %v2604_v9, 0.0 }
 0x265   : > { %v6613_v35 = vmax.f32 %v3086_v26, %v3118_v29  ;;  %v6615_v39 = vadd.f32 %v3118_v29, %v3086_v26  ;;  %v2625_v29 = vadd.f32 %v6492_v30, %v6555_v16  ;;  %v2620_v30 = vadd.f32 %v6555_v16, %v6503_v41 }
 0x266   : > { %v6619_v45 = vmax.f32 %v3084_v36, %v3116_v38  ;;  %v6621_v46 = vadd.f32 %v3116_v38, %v3084_v36  ;;  %v5321_v47 = vpop.f32.mrb[40].mxu1 }
 0x267   : > { %v2737_v60 = vadd.f32 %v5321_v47, %v6555_v16  ;;  %v2728_v6 = vpop.f32.mrb[41].mxu1 }
 0x268   : > { %v2729_v7 = vadd.f32 %v6555_v16, %v2728_v6  ;;  %v5322_v10 = vpop.f32.mrb[42].mxu1 }
 0x269   : > { %v3121_v18 = vmax.f32 %v2737_v60, 0.0  ;;  %v2740_v11 = vadd.f32 %v5322_v10, %v6555_v16  ;;  %v2731_v19 = vpop.f32.mrb[43].mxu1  ;;  %v2628_v60 = vadd.f32 %v6500_v34, %v6555_v16 }
 0x26a   : > { %v3119_v20 = vmax.f32 %v2729_v7, 0.0  ;;  %v2732_v21 = vadd.f32 %v6555_v16, %v2731_v19  ;;  %v3091_v19 = vmax.f32 %v2617_v50, 0.0 }
 0x26b   : > { %v6631_v13 = vmax.f32 %v3089_v55, %v3121_v18  ;;  %v6633_v23 = vadd.f32 %v3121_v18, %v3089_v55  ;;  %v3122_v59 = vmax.f32 %v2740_v11, 0.0  ;;  %v3093_v55 = vmax.f32 %v2625_v29, 0.0 }
 0x26c   : > { %v6635_v17 = vmax.f32 %v3087_v57, %v3119_v20  ;;  %v6637_v25 = vadd.f32 %v3119_v20, %v3087_v57  ;;  %v3120_v26 = vmax.f32 %v2732_v21, 0.0  ;;  %v3094_v21 = vmax.f32 %v2628_v60, 0.0 }
 0x26d   : > { %v6641_v36 = vmax.f32 %v3090_v22, %v3122_v59  ;;  %v6643_v38 = vadd.f32 %v3122_v59, %v3090_v22  ;;  %v2633_v60 = vadd.f32 %v6555_v16, %v6511_v56 }
 0x26e   : > { %v6647_v42 = vmax.f32 %v3088_v24, %v3120_v26  ;;  %v6649_v47 = vadd.f32 %v3120_v26, %v3088_v24  ;;  %v5325_v51 = vpop.f32.mrb[44].mxu1  ;;  %v3092_v24 = vmax.f32 %v2620_v30, 0.0 }
 0x26f   : > { %v2753_v6 = vadd.f32 %v5325_v51, %v6555_v16  ;;  %v2744_v9 = vpop.f32.mrb[45].mxu1  ;;  %v2641_v51 = vadd.f32 %v6509_v53, %v6555_v16  ;;  %v2636_v53 = vadd.f32 %v6555_v16, %v6516_v61 }
 0x270   : > { %v2745_v7 = vadd.f32 %v6555_v16, %v2744_v9  ;;  %v5326_v10 = vpop.f32.mrb[46].mxu1 }
 0x271   : > { %v3125_v18 = vmax.f32 %v2753_v6, 0.0  ;;  %v2756_v33 = vadd.f32 %v5326_v10, %v6555_v16  ;;  %v2747_v11 = vpop.f32.mrb[47].mxu1  ;;  %v2644_v10 = vadd.f32 %v6514_v58, %v6555_v16 }
 0x272   : > { %v3123_v57 = vmax.f32 %v2745_v7, 0.0  ;;  %v2748_v20 = vadd.f32 %v6555_v16, %v2747_v11 }
 0x273   : > { %v6659_v34 = vmax.f32 %v3093_v55, %v3125_v18  ;;  %v6661_v22 = vadd.f32 %v3125_v18, %v3093_v55  ;;  %v3126_v59 = vmax.f32 %v2756_v33, 0.0 }
 0x274   : > { %v6663_v41 = vmax.f32 %v3091_v19, %v3123_v57  ;;  %v6665_v26 = vadd.f32 %v3123_v57, %v3091_v19  ;;  %v3124_v29 = vmax.f32 %v2748_v20, 0.0  ;;  %v3097_v19 = vmax.f32 %v2641_v51, 0.0 }
 0x275   : > { %v6669_v6 = vmax.f32 %v3094_v21, %v3126_v59  ;;  %v6671_v50 = vadd.f32 %v3126_v59, %v3094_v21  ;;  %v3095_v21 = vmax.f32 %v2633_v60, 0.0 }
 0x276   : > { %v6675_v9 = vmax.f32 %v3092_v24, %v3124_v29  ;;  %v6677_v7 = vadd.f32 %v3124_v29, %v3092_v24  ;;  %v5329_v30 = vpop.f32.mrb[48].mxu1  ;;  %v3098_v29 = vmax.f32 %v2644_v10, 0.0  ;;  %v2649_v10 = vadd.f32 %v6555_v16, %v6521_v0 }
 0x277   : > { %v2769_v55 = vadd.f32 %v5329_v30, %v6555_v16  ;;  %v2760_v18 = vpop.f32.mrb[49].mxu1 }
 0x278   : > { %7620 = vst [vmem:[#allocation3_spill] sm:$0xff] %v6675_v9  ;;  %7621 = vst [vmem:[#allocation4_spill] sm:$0xff] %v6677_v7  ;;  %v2761_v33 = vadd.f32 %v6555_v16, %v2760_v18  ;;  %v5330_v11 = vpop.f32.mrb[50].mxu1  ;;  %v3096_v9 = vmax.f32 %v2636_v53, 0.0 }
 0x279   : > { %v3129_v57 = vmax.f32 %v2769_v55, 0.0  ;;  %v2772_v56 = vadd.f32 %v5330_v11, %v6555_v16  ;;  %v2763_v20 = vpop.f32.mrb[51].mxu1  ;;  %v2657_v55 = vadd.f32 %v6519_v62, %v6555_v16  ;;  %v2652_v62 = vadd.f32 %v6555_v16, %v6525_v1 }
 0x27a   : > { %v3127_v59 = vmax.f32 %v2761_v33, 0.0  ;;  %v2764_v24 = vadd.f32 %v6555_v16, %v2763_v20 }
 0x27b   : > { %v6687_v58 = vmax.f32 %v3097_v19, %v3129_v57  ;;  %v6689_v30 = vadd.f32 %v3129_v57, %v3097_v19  ;;  %v3130_v7 = vmax.f32 %v2772_v56, 0.0  ;;  %v2660_v57 = vadd.f32 %v6523_v27, %v6555_v16 }
 0x27c   : > { %v6691_v61 = vmax.f32 %v3095_v21, %v3127_v59  ;;  %v6693_v18 = vadd.f32 %v3127_v59, %v3095_v21  ;;  %v3128_v51 = vmax.f32 %v2764_v24, 0.0  ;;  %v3101_v59 = vmax.f32 %v2657_v55, 0.0 }
 0x27d   : > { %v6697_v11 = vmax.f32 %v3098_v29, %v3130_v7  ;;  %v6699_v60 = vadd.f32 %v3130_v7, %v3098_v29 }
 0x27e   : > { %v6703_v33 = vmax.f32 %v3096_v9, %v3128_v51  ;;  %v6705_v19 = vadd.f32 %v3128_v51, %v3096_v9  ;;  %v5333_v53 = vpop.f32.mrb[52].mxu1  ;;  %v3099_v9 = vmax.f32 %v2649_v10, 0.0 }
 0x27f   : > { %7622 = vst [vmem:[#allocation5_spill] sm:$0xff] %v6697_v11  ;;  %7623 = vst [vmem:[#allocation6_spill] sm:$0xff] %v6699_v60  ;;  %v2785_v56 = vadd.f32 %v5333_v53, %v6555_v16  ;;  %v2776_v20 = vpop.f32.mrb[53].mxu1  ;;  %v3100_v11 = vmax.f32 %v2652_v62, 0.0 }
 0x280   : > { %7624 = vst [vmem:[#allocation7_spill] sm:$0xff] %v6703_v33  ;;  %7625 = vst [vmem:[#allocation8_spill] sm:$0xff] %v6705_v19  ;;  %v2777_v7 = vadd.f32 %v6555_v16, %v2776_v20  ;;  %v5334_v21 = vpop.f32.mrb[54].mxu1  ;;  %v3102_v33 = vmax.f32 %v2660_v57, 0.0  ;;  %v2665_v57 = vadd.f32 %v6555_v16, %v6529_v3 }
 0x281   : > { %v3133_v24 = vmax.f32 %v2785_v56, 0.0  ;;  %v2788_v0 = vadd.f32 %v5334_v21, %v6555_v16  ;;  %v2779_v29 = vpop.f32.mrb[55].mxu1  ;;  %v2673_v56 = vadd.f32 %v6527_v2, %v6555_v16  ;;  %v2668_v2 = vadd.f32 %v6555_v16, %v6533_v5 }
 0x282   : > { %v3131_v51 = vmax.f32 %v2777_v7, 0.0  ;;  %v2780_v19 = vadd.f32 %v6555_v16, %v2779_v29 }
 0x283   : > { %v6715_v27 = vmax.f32 %v3101_v59, %v3133_v24  ;;  %v6717_v53 = vadd.f32 %v3133_v24, %v3101_v59  ;;  %v3134_v60 = vmax.f32 %v2788_v0, 0.0  ;;  %v2676_v24 = vadd.f32 %v6531_v4, %v6555_v16 }
 0x284   : > { %v6719_v1 = vmax.f32 %v3099_v9, %v3131_v51  ;;  %v6721_v20 = vadd.f32 %v3131_v51, %v3099_v9  ;;  %v3132_v55 = vmax.f32 %v2780_v19, 0.0  ;;  %v3105_v29 = vmax.f32 %v2673_v56, 0.0 }
 0x285   : > { %v6725_v21 = vmax.f32 %v3102_v33, %v3134_v60  ;;  %v6727_v10 = vadd.f32 %v3134_v60, %v3102_v33 }
 0x286   : > { %v6731_v7 = vmax.f32 %v3100_v11, %v3132_v55  ;;  %v6733_v59 = vadd.f32 %v3132_v55, %v3100_v11  ;;  %v5337_v62 = vpop.f32.mrb[56].mxu1  ;;  %v3103_v11 = vmax.f32 %v2665_v57, 0.0 }
 0x287   : > { %7626 = vst [vmem:[#allocation9_spill] sm:$0xff] %v6725_v21  ;;  %7627 = vst [vmem:[#allocation10_spill] sm:$0xff] %v6727_v10  ;;  %v2801_v19 = vadd.f32 %v5337_v62, %v6555_v16  ;;  %v2792_v0 = vpop.f32.mrb[57].mxu1  ;;  %v3104_v21 = vmax.f32 %v2668_v2, 0.0 }
 0x288   : > { %7628 = vst [vmem:[#allocation11_spill] sm:$0xff] %v6731_v7  ;;  %7629 = vst [vmem:[#allocation12_spill] sm:$0xff] %v6733_v59  ;;  %v2793_v60 = vadd.f32 %v6555_v16, %v2792_v0  ;;  %v5338_v33 = vpop.f32.mrb[58].mxu1  ;;  %v3106_v7 = vmax.f32 %v2676_v24, 0.0  ;;  %v2681_v24 = vadd.f32 %v6555_v16, %v6546_v12 }
 0x289   : > { %v3137_v9 = vmax.f32 %v2801_v19, 0.0  ;;  %v2804_v3 = vadd.f32 %v5338_v33, %v6555_v16  ;;  %v2795_v51 = vpop.f32.mrb[59].mxu1  ;;  %v2689_v19 = vadd.f32 %v6541_v8, %v6555_v16  ;;  %v2684_v8 = vadd.f32 %v6555_v16, %v6550_v15 }
 0x28a   : > { %v3135_v55 = vmax.f32 %v2793_v60, 0.0  ;;  %v2796_v59 = vadd.f32 %v6555_v16, %v2795_v51 }
 0x28b   : > { %v6743_v4 = vmax.f32 %v3105_v29, %v3137_v9  ;;  %v6745_v62 = vadd.f32 %v3137_v9, %v3105_v29  ;;  %v3138_v10 = vmax.f32 %v2804_v3, 0.0  ;;  %v2692_v9 = vadd.f32 %v6548_v14, %v6555_v16 }
 0x28c   : > { %v6747_v5 = vmax.f32 %v3103_v11, %v3135_v55  ;;  %v6749_v0 = vadd.f32 %v3135_v55, %v3103_v11  ;;  %v3136_v56 = vmax.f32 %v2796_v59, 0.0  ;;  %v3109_v51 = vmax.f32 %v2689_v19, 0.0 }
 0x28d   : > { %v6753_v33 = vmax.f32 %v3106_v7, %v3138_v10  ;;  %v6755_v57 = vadd.f32 %v3138_v10, %v3106_v7 }
 0x28e   : > { %v6759_v60 = vmax.f32 %v3104_v21, %v3136_v56  ;;  %v6761_v29 = vadd.f32 %v3136_v56, %v3104_v21  ;;  %v5341_v2 = vpop.f32.mrb[60].mxu1  ;;  %v3107_v21 = vmax.f32 %v2681_v24, 0.0 }
 0x28f   : > { %7630 = vst [vmem:[#allocation13_spill] sm:$0xff] %v6753_v33  ;;  %7631 = vst [vmem:[#allocation14_spill] sm:$0xff] %v6755_v57  ;;  %v2817_v59 = vadd.f32 %v5341_v2, %v6555_v16  ;;  %v2808_v3 = vpop.f32.mrb[61].mxu1  ;;  %v3108_v33 = vmax.f32 %v2684_v8, 0.0 }
 0x290   : > { %7632 = vst [vmem:[#allocation15_spill] sm:$0xff] %v6759_v60  ;;  %7633 = vst [vmem:[#allocation16_spill] sm:$0xff] %v6761_v29  ;;  %v2809_v10 = vadd.f32 %v6555_v16, %v2808_v3  ;;  %v5342_v7 = vpop.f32.mrb[62].mxu1  ;;  %v3110_v60 = vmax.f32 %v2692_v9, 0.0 }
 0x291   : > { %v3141_v11 = vmax.f32 %v2817_v59, 0.0  ;;  %v2820_v12 = vadd.f32 %v5342_v7, %v6555_v16  ;;  %v2811_v55 = vpop.f32.mrb[63].mxu1 }
 0x292   : > { %v3139_v56 = vmax.f32 %v2809_v10, 0.0  ;;  %v2812_v29 = vadd.f32 %v6555_v16, %v2811_v55 }
 0x293   : > { %v6771_v14 = vmax.f32 %v3109_v51, %v3141_v11  ;;  %v6773_v2 = vadd.f32 %v3141_v11, %v3109_v51  ;;  %v3142_v57 = vmax.f32 %v2820_v12, 0.0 }
 0x294   : > { %v6775_v15 = vmax.f32 %v3107_v21, %v3139_v56  ;;  %v6777_v3 = vadd.f32 %v3139_v56, %v3107_v21  ;;  %v3140_v19 = vmax.f32 %v2812_v29, 0.0 }
 0x295   : > { %v6779_v59 = vmax.f32 %v3110_v60, %v3142_v57  ;;  %v6781_v7 = vadd.f32 %v3142_v57, %v3110_v60 }
 0x296   : > { %v6783_v24 = vmax.f32 %v3108_v33, %v3140_v19  ;;  %v6785_v10 = vadd.f32 %v3140_v19, %v3108_v33  ;;  %v5345_v9 = vpop.f32.mrb[64].mxu1 }
 0x297   : > { %7634 = vst [vmem:[#allocation17_spill] sm:$0xff] %v6779_v59  ;;  %v2833_v55 = vadd.f32 %v5345_v9, %v6555_v16  ;;  %v2824_v51 = vpop.f32.mrb[65].mxu1 }
 0x298   : > { %v2825_v11 = vadd.f32 %v6555_v16, %v2824_v51  ;;  %v5346_v8 = vpop.f32.mrb[66].mxu1 }
 0x299   : > { %v3145_v12 = vmax.f32 %v2833_v55, 0.0  ;;  %v2836_v21 = vadd.f32 %v5346_v8, %v6555_v16  ;;  %v2827_v56 = vpop.f32.mrb[67].mxu1 }
 0x29a   : > { %v3143_v29 = vmax.f32 %v2825_v11, 0.0  ;;  %v2828_v59 = vadd.f32 %v6555_v16, %v2827_v56 }
 0x29b   : > { %v6792_v57 = vmax.f32 %v6569_v40, %v3145_v12  ;;  %v6795_v33 = vadd.f32 %v6571_v37, %v3145_v12  ;;  %v3146_v60 = vmax.f32 %v2836_v21, 0.0 }
 0x29c   : > { %v6798_v19 = vmax.f32 %v6573_v44, %v3143_v29  ;;  %v6801_v9 = vadd.f32 %v6575_v43, %v3143_v29  ;;  %v3144_v55 = vmax.f32 %v2828_v59, 0.0 }
 0x29d   : > { %v6804_v51 = vmax.f32 %v6582_v48, %v3146_v60  ;;  %v6807_v11 = vadd.f32 %v6584_v49, %v3146_v60 }
 0x29e   : > { %v6810_v40 = vmax.f32 %v6588_v52, %v3144_v55  ;;  %v6813_v37 = vadd.f32 %v6590_v54, %v3144_v55  ;;  %v5349_v8 = vpop.f32.mrb[68].mxu1 }
 0x29f   : > { %v2849_v44 = vadd.f32 %v5349_v8, %v6555_v16  ;;  %v2840_v12 = vpop.f32.mrb[69].mxu1 }
 0x2a0   : > { %v2841_v43 = vadd.f32 %v6555_v16, %v2840_v12  ;;  %v5350_v21 = vpop.f32.mrb[70].mxu1 }
 0x2a1   : > { %v3149_v59 = vmax.f32 %v2849_v44, 0.0  ;;  %v2852_v48 = vadd.f32 %v5350_v21, %v6555_v16  ;;  %v2843_v56 = vpop.f32.mrb[71].mxu1 }
 0x2a2   : > { %v3147_v29 = vmax.f32 %v2841_v43, 0.0  ;;  %v2844_v49 = vadd.f32 %v6555_v16, %v2843_v56 }
 0x2a3   : > { %v6820_v52 = vmax.f32 %v6603_v28, %v3149_v59  ;;  %v6823_v54 = vadd.f32 %v6605_v63, %v3149_v59  ;;  %v3150_v60 = vmax.f32 %v2852_v48, 0.0 }
 0x2a4   : > { %v6826_v55 = vmax.f32 %v6607_v31, %v3147_v29  ;;  %v6829_v8 = vadd.f32 %v6609_v32, %v3147_v29  ;;  %v3148_v44 = vmax.f32 %v2844_v49, 0.0 }
 0x2a5   : > { %v6832_v12 = vmax.f32 %v6613_v35, %v3150_v60  ;;  %v6835_v43 = vadd.f32 %v6615_v39, %v3150_v60 }
 0x2a6   : > { %v6838_v28 = vmax.f32 %v6619_v45, %v3148_v44  ;;  %v6841_v63 = vadd.f32 %v6621_v46, %v3148_v44  ;;  %v5353_v21 = vpop.f32.mrb[72].mxu1 }
 0x2a7   : > { %v2865_v31 = vadd.f32 %v5353_v21, %v6555_v16  ;;  %v2856_v59 = vpop.f32.mrb[73].mxu1 }
 0x2a8   : > { %v2857_v32 = vadd.f32 %v6555_v16, %v2856_v59  ;;  %v5354_v48 = vpop.f32.mrb[74].mxu1 }
 0x2a9   : > { %v3153_v56 = vmax.f32 %v2865_v31, 0.0  ;;  %v2868_v35 = vadd.f32 %v5354_v48, %v6555_v16  ;;  %v2859_v29 = vpop.f32.mrb[75].mxu1 }
 0x2aa   : > { %v3151_v49 = vmax.f32 %v2857_v32, 0.0  ;;  %v2860_v39 = vadd.f32 %v6555_v16, %v2859_v29 }
 0x2ab   : > { %v6848_v45 = vmax.f32 %v6631_v13, %v3153_v56  ;;  %v6851_v46 = vadd.f32 %v6633_v23, %v3153_v56  ;;  %v3154_v60 = vmax.f32 %v2868_v35, 0.0 }
 0x2ac   : > { %v6854_v44 = vmax.f32 %v6635_v17, %v3151_v49  ;;  %v6857_v21 = vadd.f32 %v6637_v25, %v3151_v49  ;;  %v3152_v31 = vmax.f32 %v2860_v39, 0.0 }
 0x2ad   : > { %v6860_v59 = vmax.f32 %v6641_v36, %v3154_v60  ;;  %v6863_v32 = vadd.f32 %v6643_v38, %v3154_v60 }
 0x2ae   : > { %v6866_v13 = vmax.f32 %v6647_v42, %v3152_v31  ;;  %v6869_v23 = vadd.f32 %v6649_v47, %v3152_v31  ;;  %v5357_v48 = vpop.f32.mrb[76].mxu1 }
 0x2af   : > { %v2881_v17 = vadd.f32 %v5357_v48, %v6555_v16  ;;  %v2872_v56 = vpop.f32.mrb[77].mxu1 }
 0x2b0   : > { %v2873_v25 = vadd.f32 %v6555_v16, %v2872_v56  ;;  %v5358_v35 = vpop.f32.mrb[78].mxu1 }
 0x2b1   : > { %v3157_v29 = vmax.f32 %v2881_v17, 0.0  ;;  %v2884_v36 = vadd.f32 %v5358_v35, %v6555_v16  ;;  %v2875_v49 = vpop.f32.mrb[79].mxu1  ;;  %v7637_v35 = vld [vmem:[#allocation3_spill] sm:$0xff] }
 0x2b2   : > { %v3155_v39 = vmax.f32 %v2873_v25, 0.0  ;;  %v2876_v38 = vadd.f32 %v6555_v16, %v2875_v49  ;;  %v7638_v49 = vld [vmem:[#allocation4_spill] sm:$0xff] }
 0x2b3   : > { %v6876_v42 = vmax.f32 %v6659_v34, %v3157_v29  ;;  %v6879_v47 = vadd.f32 %v6661_v22, %v3157_v29  ;;  %v3158_v60 = vmax.f32 %v2884_v36, 0.0 }
 0x2b4   : > { %v6882_v31 = vmax.f32 %v6663_v41, %v3155_v39  ;;  %v6885_v48 = vadd.f32 %v6665_v26, %v3155_v39  ;;  %v3156_v17 = vmax.f32 %v2876_v38, 0.0 }
 0x2b5   : > { %v6888_v56 = vmax.f32 %v6669_v6, %v3158_v60  ;;  %v6891_v25 = vadd.f32 %v6671_v50, %v3158_v60 }
 0x2b6   : > { %7635 = vst [vmem:[#allocation18_spill] sm:$0xff] %v6885_v48  ;;  %v6894_v34 = vmax.f32 %v7637_v35, %v3156_v17  ;;  %v6897_v22 = vadd.f32 %v7638_v49, %v3156_v17  ;;  %v5361_v29 = vpop.f32.mrb[80].mxu1 }
 0x2b7   : > { %7636 = vst [vmem:[#allocation19_spill] sm:$0xff] %v6888_v56  ;;  %v2897_v41 = vadd.f32 %v5361_v29, %v6555_v16  ;;  %v2888_v36 = vpop.f32.mrb[81].mxu1 }
 0x2b8   : > { %7639 = vst [vmem:[#allocation3_spill] sm:$0xff] %v6897_v22  ;;  %v2889_v26 = vadd.f32 %v6555_v16, %v2888_v36  ;;  %v5362_v39 = vpop.f32.mrb[82].mxu1  ;;  %v7642_v36 = vld [vmem:[#allocation5_spill] sm:$0xff] }
 0x2b9   : > { %v3161_v38 = vmax.f32 %v2897_v41, 0.0  ;;  %v2900_v6 = vadd.f32 %v5362_v39, %v6555_v16  ;;  %v2891_v56 = vpop.f32.mrb[83].mxu1 }
 0x2ba   : > { %v3159_v48 = vmax.f32 %v2889_v26, 0.0  ;;  %v2892_v50 = vadd.f32 %v6555_v16, %v2891_v56  ;;  %v7644_v26 = vld [vmem:[#allocation6_spill] sm:$0xff]  ;;  %v7645_v56 = vld [vmem:[#allocation7_spill] sm:$0xff] }
 0x2bb   : > { %v6904_v60 = vmax.f32 %v6687_v58, %v3161_v38  ;;  %v6907_v17 = vadd.f32 %v6689_v30, %v3161_v38  ;;  %v3162_v35 = vmax.f32 %v2900_v6, 0.0 }
 0x2bc   : > { %v6910_v49 = vmax.f32 %v6691_v61, %v3159_v48  ;;  %v6913_v29 = vadd.f32 %v6693_v18, %v3159_v48  ;;  %v3160_v41 = vmax.f32 %v2892_v50, 0.0 }
 0x2bd   : > { %7640 = vst [vmem:[#allocation4_spill] sm:$0xff] %v6904_v60  ;;  %v6916_v39 = vmax.f32 %v7642_v36, %v3162_v35  ;;  %v6919_v22 = vadd.f32 %v7644_v26, %v3162_v35  ;;  %v7646_v60 = vld [vmem:[#allocation8_spill] sm:$0xff] }
 0x2be   : > { %7641 = vst [vmem:[#allocation20_spill] sm:$0xff] %v6913_v29  ;;  %v6922_v58 = vmax.f32 %v7645_v56, %v3160_v41  ;;  %v6925_v30 = vadd.f32 %v7646_v60, %v3160_v41  ;;  %v5365_v38 = vpop.f32.mrb[84].mxu1 }
 0x2bf   : > { %7643 = vst [vmem:[#allocation5_spill] sm:$0xff] %v6916_v39  ;;  %v2913_v61 = vadd.f32 %v5365_v38, %v6555_v16  ;;  %v2904_v6 = vpop.f32.mrb[85].mxu1 }
 0x2c0   : > { %7647 = vst [vmem:[#allocation6_spill] sm:$0xff] %v6925_v30  ;;  %v2905_v18 = vadd.f32 %v6555_v16, %v2904_v6  ;;  %v5366_v48 = vpop.f32.mrb[86].mxu1  ;;  %v7650_v6 = vld [vmem:[#allocation9_spill] sm:$0xff] }
 0x2c1   : > { %v3165_v50 = vmax.f32 %v2913_v61, 0.0  ;;  %v2916_v36 = vadd.f32 %v5366_v48, %v6555_v16  ;;  %v2907_v39 = vpop.f32.mrb[87].mxu1 }
 0x2c2   : > { %v3163_v29 = vmax.f32 %v2905_v18, 0.0  ;;  %v2908_v35 = vadd.f32 %v6555_v16, %v2907_v39  ;;  %v7652_v18 = vld [vmem:[#allocation10_spill] sm:$0xff]  ;;  %v7653_v39 = vld [vmem:[#allocation11_spill] sm:$0xff] }
 0x2c3   : > { %v6932_v26 = vmax.f32 %v6715_v27, %v3165_v50  ;;  %v6935_v60 = vadd.f32 %v6717_v53, %v3165_v50  ;;  %v3166_v41 = vmax.f32 %v2916_v36, 0.0 }
 0x2c4   : > { %v6938_v56 = vmax.f32 %v6719_v1, %v3163_v29  ;;  %v6941_v38 = vadd.f32 %v6721_v20, %v3163_v29  ;;  %v3164_v61 = vmax.f32 %v2908_v35, 0.0 }
 0x2c5   : > { %7648 = vst [vmem:[#allocation7_spill] sm:$0xff] %v6932_v26  ;;  %v6944_v48 = vmax.f32 %v7650_v6, %v3166_v41  ;;  %v6947_v30 = vadd.f32 %v7652_v18, %v3166_v41  ;;  %v7654_v26 = vld [vmem:[#allocation12_spill] sm:$0xff] }
 0x2c6   : > { %7649 = vst [vmem:[#allocation8_spill] sm:$0xff] %v6941_v38  ;;  %v6950_v27 = vmax.f32 %v7653_v39, %v3164_v61  ;;  %v6953_v53 = vadd.f32 %v7654_v26, %v3164_v61  ;;  %v5369_v50 = vpop.f32.mrb[88].mxu1 }
 0x2c7   : > { %7651 = vst [vmem:[#allocation9_spill] sm:$0xff] %v6944_v48  ;;  %v2929_v1 = vadd.f32 %v5369_v50, %v6555_v16  ;;  %v2920_v36 = vpop.f32.mrb[89].mxu1 }
 0x2c8   : > { %7655 = vst [vmem:[#allocation10_spill] sm:$0xff] %v6953_v53  ;;  %v2921_v20 = vadd.f32 %v6555_v16, %v2920_v36  ;;  %v5370_v29 = vpop.f32.mrb[90].mxu1  ;;  %v7658_v36 = vld [vmem:[#allocation13_spill] sm:$0xff] }
 0x2c9   : > { %v3169_v35 = vmax.f32 %v2929_v1, 0.0  ;;  %v2932_v6 = vadd.f32 %v5370_v29, %v6555_v16  ;;  %v2923_v48 = vpop.f32.mrb[91].mxu1 }
 0x2ca   : > { %v3167_v38 = vmax.f32 %v2921_v20, 0.0  ;;  %v2924_v41 = vadd.f32 %v6555_v16, %v2923_v48  ;;  %v7660_v20 = vld [vmem:[#allocation14_spill] sm:$0xff]  ;;  %v7661_v48 = vld [vmem:[#allocation15_spill] sm:$0xff] }
 0x2cb   : > { %v6960_v18 = vmax.f32 %v6743_v4, %v3169_v35  ;;  %v6963_v26 = vadd.f32 %v6745_v62, %v3169_v35  ;;  %v3170_v61 = vmax.f32 %v2932_v6, 0.0 }
 0x2cc   : > { %v6966_v39 = vmax.f32 %v6747_v5, %v3167_v38  ;;  %v6969_v50 = vadd.f32 %v6749_v0, %v3167_v38  ;;  %v3168_v1 = vmax.f32 %v2924_v41, 0.0 }
 0x2cd   : > { %7656 = vst [vmem:[#allocation11_spill] sm:$0xff] %v6960_v18  ;;  %v6972_v29 = vmax.f32 %v7658_v36, %v3170_v61  ;;  %v6975_v53 = vadd.f32 %v7660_v20, %v3170_v61  ;;  %v7662_v18 = vld [vmem:[#allocation16_spill] sm:$0xff] }
 0x2ce   : > { %7657 = vst [vmem:[#allocation12_spill] sm:$0xff] %v6969_v50  ;;  %v6978_v4 = vmax.f32 %v7661_v48, %v3168_v1  ;;  %v6981_v62 = vadd.f32 %v7662_v18, %v3168_v1  ;;  %v5373_v35 = vpop.f32.mrb[92].mxu1 }
 0x2cf   : > { %7659 = vst [vmem:[#allocation13_spill] sm:$0xff] %v6972_v29  ;;  %v2945_v5 = vadd.f32 %v5373_v35, %v6555_v16  ;;  %v2936_v6 = vpop.f32.mrb[93].mxu1 }
 0x2d0   : > { %v2937_v0 = vadd.f32 %v6555_v16, %v2936_v6  ;;  %v5374_v38 = vpop.f32.mrb[94].mxu1  ;;  %v7667_v6 = vld [vmem:[#allocation17_spill] sm:$0xff] }
 0x2d1   : > { %v3173_v41 = vmax.f32 %v2945_v5, 0.0  ;;  %v2948_v36 = vadd.f32 %v5374_v38, %v6555_v16  ;;  %v2939_v29 = vpop.f32.mrb[95].mxu1 }
 0x2d2   : > { %v3171_v50 = vmax.f32 %v2937_v0, 0.0  ;;  %v2940_v61 = vadd.f32 %v6555_v16, %v2939_v29 }
 0x2d3   : > { %v6988_v20 = vmax.f32 %v6771_v14, %v3173_v41  ;;  %v6991_v18 = vadd.f32 %v6773_v2, %v3173_v41  ;;  %v3174_v1 = vmax.f32 %v2948_v36, 0.0 }
 0x2d4   : > { %v6994_v48 = vmax.f32 %v6775_v15, %v3171_v50  ;;  %v6997_v35 = vadd.f32 %v6777_v3, %v3171_v50  ;;  %v3172_v5 = vmax.f32 %v2940_v61, 0.0 }
 0x2d5   : > { %7663 = vst [vmem:[#allocation14_spill] sm:$0xff] %v6988_v20  ;;  %7664 = vst [vmem:[#allocation15_spill] sm:$0xff] %v6991_v18  ;;  %v7000_v38 = vmax.f32 %v7667_v6, %v3174_v1  ;;  %v7003_v0 = vadd.f32 %v6781_v7, %v3174_v1 }
 0x2d6   : > { %7665 = vst [vmem:[#allocation16_spill] sm:$0xff] %v6994_v48  ;;  %7666 = vst [vmem:[#allocation21_spill] sm:$0xff] %v6997_v35  ;;  %v7006_v14 = vmax.f32 %v6783_v24, %v3172_v5  ;;  %v7009_v2 = vadd.f32 %v6785_v10, %v3172_v5  ;;  %v5377_v29 = vpop.f32.mrb[96].mxu1 }
 0x2d7   : > { %7668 = vst [vmem:[#allocation17_spill] sm:$0xff] %v7000_v38  ;;  %7669 = vst [vmem:[#allocation22_spill] sm:$0xff] %v7003_v0  ;;  %v2961_v15 = vadd.f32 %v5377_v29, %v6555_v16  ;;  %v2952_v41 = vpop.f32.mrb[97].mxu1 }
 0x2d8   : > { %7670 = vst [vmem:[#allocation23_spill] sm:$0xff] %v7006_v14  ;;  %7671 = vst [vmem:[#allocation24_spill] sm:$0xff] %v7009_v2  ;;  %v2953_v3 = vadd.f32 %v6555_v16, %v2952_v41  ;;  %v5378_v50 = vpop.f32.mrb[98].mxu1 }
 0x2d9   : > { %v3177_v36 = vmax.f32 %v2961_v15, 0.0  ;;  %v2964_v61 = vadd.f32 %v5378_v50, %v6555_v16  ;;  %v2955_v6 = vpop.f32.mrb[99].mxu1 }
 0x2da   : > { %v3175_v38 = vmax.f32 %v2953_v3, 0.0  ;;  %v2956_v7 = vadd.f32 %v6555_v16, %v2955_v6 }
 0x2db   : > { %v7016_v24 = vmax.f32 %v6792_v57, %v3177_v36  ;;  %v3369_v10 = vadd.f32 %v6795_v33, %v3177_v36  ;;  %v3178_v1 = vmax.f32 %v2964_v61, 0.0 }
 0x2dc   : > { %v3335_v5 = vmax.f32 %v6798_v19, %v3175_v38  ;;  %v3367_v29 = vadd.f32 %v6801_v9, %v3175_v38  ;;  %v3176_v2 = vmax.f32 %v2956_v7, 0.0 }
 0x2dd   : > { %v7021_v41 = vmul.f32 0.25, %v3369_v10  ;;  %v3497_v50 = vmax.f32 %v3369_v10, 0.0  ;;  %v7025_v3 = vmax.f32 %v6804_v51, %v3178_v1  ;;  %v3370_v0 = vadd.f32 %v6807_v11, %v3178_v1 }
 0x2de   : > { %v3399_v6 = vmul.f32 0.25, %v3367_v29  ;;  %v3431_v14 = vmax.f32 %v3335_v5, 0.0  ;;  %v3495_v57 = vmax.f32 %v3367_v29, 0.0  ;;  %v5381_v33 = vpop.f32.mrb[100].mxu1  ;;  %v3336_v9 = vmax.f32 %v6810_v40, %v3176_v2 }
 0x2df   : > { %v3368_v38 = vadd.f32 %v6813_v37, %v3176_v2  ;;  %v2968_v61 = vpop.f32.mrb[101].mxu1  ;;  %v3402_v10 = vmul.f32 0.25, %v3370_v0  ;;  %v3498_v15 = vmax.f32 %v3370_v0, 0.0  ;;  %v2977_v51 = vadd.f32 %v5381_v33, %v6555_v16 }
 0x2e0   : > { %v3463_v7 = vmax.f32 %v3399_v6, 0.0  ;;  %v5382_v35 = vpop.f32.mrb[102].mxu1  ;;  %v3432_v29 = vmax.f32 %v3336_v9, 0.0  ;;  %v2969_v11 = vadd.f32 %v6555_v16, %v2968_v61 }
 0x2e1   : > { %v3400_v5 = vmul.f32 0.25, %v3368_v38  ;;  %v3496_v48 = vmax.f32 %v3368_v38, 0.0  ;;  %v2971_v1 = vpop.f32.mrb[103].mxu1  ;;  %v3466_v36 = vmax.f32 %v3402_v10, 0.0  ;;  %v3532_v18 = vpack.c.bf16 %v3498_v15, %v3497_v50 }
 0x2e2   : > { %v3181_v19 = vmax.f32 %v2977_v51, 0.0  ;;  %v2980_v40 = vadd.f32 %v5382_v35, %v6555_v16  ;;  %v3527_v37 = vpack.c.bf16 %v3432_v29, %v3431_v14  ;;  %v3179_v2 = vmax.f32 %v2969_v11, 0.0 }
 0x2e3   : > { %v3464_v20 = vmax.f32 %v3400_v5, 0.0  ;;  %v2972_v6 = vadd.f32 %v6555_v16, %v2971_v1  ;;  %v3529_v38 = vpack.c.bf16 %v3496_v48, %v3495_v57 }
 0x2e4   : > { %v7037_v0 = vmax.f32 %v6820_v52, %v3181_v19  ;;  %v3373_v33 = vadd.f32 %v6823_v54, %v3181_v19  ;;  %v3182_v9 = vmax.f32 %v2980_v40, 0.0  ;;  %v7041_v61 = vmax.f32 %v6826_v55, %v3179_v2 }
 0x2e5   : > { %v3371_v15 = vadd.f32 %v6829_v8, %v3179_v2  ;;  %v3180_v50 = vmax.f32 %v2972_v6, 0.0  ;;  %v3528_v10 = vpack.c.bf16 %v3464_v20, %v3463_v7  ;;  %5423 = vmatprep.mubr.bf16.mxu1 %v3529_v38 }
 0x2e6   : > { %v7044_v35 = vmul.f32 0.25, %v3373_v33  ;;  %v3501_v51 = vmax.f32 %v3373_v33, 0.0  ;;  %v7048_v5 = vmax.f32 %v6832_v12, %v3182_v9  ;;  %v5385_v52 = vpop.f32.mrb[104].mxu1  ;;  %v3435_v48 = vmax.f32 %v7041_v61, 0.0  ;;  %5424 = vmatmul.mubr.bf16.vlgmr.msra.gmra.mrb[128].mxu1 %v3532_v18 }
 0x2e7   : > { %v7050_v54 = vmul.f32 0.25, %v3371_v15  ;;  %v3499_v55 = vmax.f32 %v3371_v15, 0.0  ;;  %v3374_v57 = vadd.f32 %v6835_v43, %v3182_v9  ;;  %3806 = vmatprep.mubr.bf16.mxu0 %v3528_v10  ;;  %v2984_v8 = vpop.f32.mrb[105].mxu1  ;;  %v7057_v7 = vmax.f32 %v6838_v28, %v3180_v50  ;;  %v5562_v28 = vld [vmem:[%s7617_s7] sm:$0xff]  }
 0x2e8   : > { %v3372_v12 = vadd.f32 %v6841_v63, %v3180_v50  ;;  %3807 = vmatmul.mubr.bf16.vlgmr.msra.gmra.mrb[128].mxu0 %v3527_v37  ;;  %v5386_v29 = vpop.f32.mrb[106].mxu1  ;;  %v2993_v43 = vadd.f32 %v5385_v52, %v6555_v16  ;;  %v2985_v9 = vadd.f32 %v6555_v16, %v2984_v8  ;;  %v5563_v63 = vld [vmem:[%s7617_s7 + $0x8] sm:$0xff]   ;;  %v7672_v50 = vmax.f32 %v7021_v41, 0.0  ;;  %5455 = vmatprep.subr.bf16.mxu1 %v5562_v28 }
 0x2e9   : > { %v3467_v11 = vmax.f32 %v7050_v54, 0.0  ;;  %v7061_v1 = vmul.f32 0.25, %v3374_v57  ;;  %v3502_v40 = vmax.f32 %v3374_v57, 0.0  ;;  %v2987_v18 = vpop.f32.mrb[107].mxu1  ;;  %v3436_v6 = vmax.f32 %v7057_v7, 0.0  ;;  %5456 = vmatpush3.bf16.msra.mxu1 %v5562_v28  ;;  %v7675_v54 = vld [vmem:[#allocation18_spill] sm:$0xff] }
 0x2ea   : > { %v3404_v2 = vmul.f32 0.25, %v3372_v12  ;;  %v3500_v33 = vmax.f32 %v3372_v12, 0.0  ;;  %v3185_v38 = vmax.f32 %v2993_v43, 0.0  ;;  %v2996_v15 = vadd.f32 %v5386_v29, %v6555_v16  ;;  %5457 = vmatprep.subr.bf16.mxu1 %v5563_v63 }
 0x2eb   : > { %v3531_v10 = vpack.c.bf16 %v3466_v36, %v7672_v50  ;;  %v3183_v57 = vmax.f32 %v2985_v9, 0.0  ;;  %v2988_v8 = vadd.f32 %v6555_v16, %v2987_v18  ;;  %v3538_v37 = vpack.c.bf16 %v3502_v40, %v3501_v51 }
 0x2ec   : > { %v3468_v52 = vmax.f32 %v3404_v2, 0.0  ;;  %v3535_v12 = vpack.c.bf16 %v3500_v33, %v3499_v55  ;;  %v7078_v19 = vmax.f32 %v6848_v45, %v3185_v38  ;;  %v3377_v14 = vadd.f32 %v6851_v46, %v3185_v38 }
 0x2ed   : > { %v3186_v20 = vmax.f32 %v2996_v15, 0.0  ;;  %3814 = vmatprep.mubr.bf16.mxu0 %v3531_v10  ;;  %v7082_v29 = vmax.f32 %v6854_v44, %v3183_v57  ;;  %v3375_v41 = vadd.f32 %v6857_v21, %v3183_v57  ;;  %v3184_v36 = vmax.f32 %v2988_v8, 0.0  ;;  %5458 = vmatpush3.bf16.msra.mxu1 %v5563_v63 }
 0x2ee   : > { %5427 = vmatprep.mubr.bf16.mxu1 %v3535_v12  ;;  %v5389_v43 = vpop.f32.mrb[108].mxu1  ;;  %v7673_v16 = vmax.f32 %v7016_v24, 0.0  ;;  %v7674_v55 = vmax.f32 %v7025_v3, 0.0  ;;  %v7089_v18 = vmul.f32 0.25, %v3377_v14  ;;  %v3505_v51 = vmax.f32 %v3377_v14, 0.0 }
 0x2ef   : > { %v7093_v40 = vmax.f32 %v6860_v59, %v3186_v20  ;;  %5428 = vmatmul.mubr.bf16.gmra.mrb[132].mxu1 %v3538_v37  ;;  %v3000_v44 = vpop.f32.mrb[109].mxu1  ;;  %v7095_v21 = vmul.f32 0.25, %v3375_v41  ;;  %v3439_v2 = vmax.f32 %v7082_v29, 0.0  ;;  %v3503_v33 = vmax.f32 %v3375_v41, 0.0 }
 0x2f0   : > { %v3530_v45 = vpack.c.bf16 %v7674_v55, %v7673_v16  ;;  %v3378_v24 = vadd.f32 %v6863_v32, %v3186_v20  ;;  %v5390_v3 = vpop.f32.mrb[110].mxu1  ;;  %v3473_v9 = vmax.f32 %v7089_v18, 0.0  ;;  %v7102_v14 = vmax.f32 %v6866_v13, %v3184_v36  ;;  %v7111_v32 = vld [vmem:[%s7614_s4] ss:$0 sm:$0xff]  ;;  %v7692_v18 = vld [vmem:[#allocation12_spill] sm:$0xff] }
 0x2f1   : > { %v3376_v59 = vadd.f32 %v6869_v23, %v3184_v36  ;;  %v3003_v37 = vpop.f32.mrb[111].mxu1  ;;  %v3471_v38 = vmax.f32 %v7095_v21, 0.0  ;;  %v3009_v20 = vadd.f32 %v7111_v32, %v5389_v43  ;;  %v3001_v23 = vadd.f32 %v7111_v32, %v3000_v44 }
 0x2f2   : > { %3815 = vmatmul.mubr.bf16.gmra.mrb[132].mxu0 %v3530_v45  ;;  %v7106_v15 = vmul.f32 0.25, %v3378_v24  ;;  %v3506_v50 = vmax.f32 %v3378_v24, 0.0  ;;  %v3440_v13 = vmax.f32 %v7102_v14, 0.0  ;;  %v3012_v12 = vadd.f32 %v7111_v32, %v5390_v3 }
 0x2f3   : > { %v7114_v10 = vmul.f32 0.25, %v3376_v59  ;;  %v3504_v57 = vmax.f32 %v3376_v59, 0.0  ;;  %v3189_v8 = vmax.f32 %v3009_v20, 0.0  ;;  %v3534_v41 = vpack.c.bf16 %v3468_v52, %v3467_v11 }
 0x2f4   : > { %v3187_v16 = vmax.f32 %v3001_v23, 0.0  ;;  %v3004_v43 = vadd.f32 %v7111_v32, %v3003_v37  ;;  %v3190_v44 = vmax.f32 %v3012_v12, 0.0  ;;  %v3544_v59 = vpack.c.bf16 %v3506_v50, %v3505_v51 }
 0x2f5   : > { %v3472_v36 = vmax.f32 %v7114_v10, 0.0  ;;  %v3541_v55 = vpack.c.bf16 %v3504_v57, %v3503_v33  ;;  %v7125_v45 = vmax.f32 %v6876_v42, %v3189_v8  ;;  %v3381_v24 = vadd.f32 %v6879_v47, %v3189_v8  ;;  %3822 = vmatprep.mubr.bf16.mxu0 %v3534_v41  ;;  %v7676_v47 = vld [vmem:[#allocation19_spill] sm:$0xff] }
 0x2f6   : > { %v5393_v20 = vpop.f32.mrb[112].mxu1  ;;  %v7129_v3 = vmax.f32 %v6882_v31, %v3187_v16  ;;  %v3379_v11 = vadd.f32 %v7675_v54, %v3187_v16  ;;  %v3188_v52 = vmax.f32 %v3004_v43, 0.0  ;;  %v7137_v8 = vmax.f32 %v7676_v47, %v3190_v44  ;;  %v7678_v43 = vld [vmem:[#allocation4_spill] sm:$0xff] }
 0x2f7   : > { %5431 = vmatprep.mubr.bf16.mxu1 %v3541_v55  ;;  %v3025_v23 = vadd.f32 %v7111_v32, %v5393_v20  ;;  %v3016_v37 = vpop.f32.mrb[113].mxu1  ;;  %v7133_v33 = vmul.f32 0.25, %v3381_v24  ;;  %v3509_v57 = vmax.f32 %v3381_v24, 0.0  ;;  %v3382_v41 = vadd.f32 %v6891_v25, %v3190_v44  ;;  %v7677_v24 = vld [vmem:[#allocation3_spill] sm:$0xff] }
 0x2f8   : > { %5432 = vmatmul.mubr.bf16.gmra.mrb[136].mxu1 %v3544_v59  ;;  %v5394_v51 = vpop.f32.mrb[114].mxu1  ;;  %v7139_v50 = vmul.f32 0.25, %v3379_v11  ;;  %v3507_v12 = vmax.f32 %v3379_v11, 0.0  ;;  %v7146_v20 = vmax.f32 %v6894_v34, %v3188_v52  ;;  %v3380_v54 = vadd.f32 %v7677_v24, %v3188_v52 }
 0x2f9   : > { %v3019_v16 = vpop.f32.mrb[115].mxu1  ;;  %v7150_v47 = vmul.f32 0.25, %v3382_v41  ;;  %v3510_v42 = vmax.f32 %v3382_v41, 0.0  ;;  %v3193_v28 = vmax.f32 %v3025_v23, 0.0  ;;  %v3017_v11 = vadd.f32 %v7111_v32, %v3016_v37 }
 0x2fa   : > { %v7152_v31 = vmul.f32 0.25, %v3380_v54  ;;  %v3508_v44 = vmax.f32 %v3380_v54, 0.0  ;;  %v3533_v23 = vpack.c.bf16 %v3436_v6, %v3435_v48  ;;  %v3028_v54 = vadd.f32 %v7111_v32, %v5394_v51 }
 0x2fb   : > { %v7158_v34 = vmax.f32 %v7678_v43, %v3193_v28  ;;  %v7161_v52 = vadd.f32 %v6907_v17, %v3193_v28  ;;  %v3191_v24 = vmax.f32 %v3017_v11, 0.0  ;;  %v7679_v37 = vmax.f32 %v7044_v35, 0.0  ;;  %v7681_v28 = vld [vmem:[#allocation20_spill] sm:$0xff] }
 0x2fc   : > { %v7680_v55 = vmax.f32 %v7061_v1, 0.0  ;;  %3823 = vmatmul.mubr.bf16.gmra.mrb[136].mxu0 %v3533_v23  ;;  %v3020_v48 = vadd.f32 %v7111_v32, %v3019_v16  ;;  %v3194_v51 = vmax.f32 %v3028_v54, 0.0  ;;  %v3547_v1 = vpack.c.bf16 %v3508_v44, %v3507_v12  ;;  %v7683_v44 = vld [vmem:[#allocation6_spill] sm:$0xff] }
 0x2fd   : > { %v7174_v59 = vmul.f32 0.25, %v7161_v52  ;;  %v3513_v61 = vmax.f32 %v7161_v52, 0.0  ;;  %v7180_v6 = vmax.f32 %v6910_v49, %v3191_v24  ;;  %v3383_v35 = vadd.f32 %v7681_v28, %v3191_v24  ;;  %v7682_v49 = vld [vmem:[#allocation5_spill] sm:$0xff] }
 0x2fe   : > { %v3537_v25 = vpack.c.bf16 %v7680_v55, %v7679_v37  ;;  %v5397_v43 = vpop.f32.mrb[116].mxu1  ;;  %v3192_v37 = vmax.f32 %v3020_v48, 0.0  ;;  %v3550_v41 = vpack.c.bf16 %v3510_v42, %v3509_v57  ;;  %v7189_v63 = vmax.f32 %v7682_v49, %v3194_v51  ;;  %5435 = vmatprep.mubr.bf16.mxu1 %v3547_v1 }
 0x2ff   : > { %v3032_v7 = vpop.f32.mrb[117].mxu1  ;;  %v3041_v17 = vadd.f32 %v7111_v32, %v5397_v43  ;;  %v7185_v23 = vmul.f32 0.25, %v3383_v35  ;;  %v3511_v46 = vmax.f32 %v3383_v35, 0.0  ;;  %v7684_v48 = vmax.f32 %v7037_v0, 0.0 }
 0x300   : > { %3830 = vmatprep.mubr.bf16.mxu0 %v3537_v25  ;;  %v5398_v55 = vpop.f32.mrb[118].mxu1  ;;  %v3386_v25 = vadd.f32 %v6919_v22, %v3194_v51  ;;  %v7193_v12 = vmax.f32 %v6922_v58, %v3192_v37  ;;  %v3384_v24 = vadd.f32 %v7683_v44, %v3192_v37  ;;  %5436 = vmatmul.mubr.bf16.gmra.mrb[140].mxu1 %v3550_v41  ;;  %v7685_v28 = vmax.f32 %v7048_v5, 0.0  ;;  %v7688_v51 = vld [vmem:[#allocation9_spill] sm:$0xff] }
 0x301   : > { %v3035_v52 = vpop.f32.mrb[119].mxu1  ;;  %v3197_v42 = vmax.f32 %v3041_v17, 0.0  ;;  %v3479_v57 = vmax.f32 %v7185_v23, 0.0  ;;  %v3033_v43 = vadd.f32 %v7111_v32, %v3032_v7  ;;  %v7686_v17 = vld [vmem:[#allocation7_spill] sm:$0xff] }
 0x302   : > { %v3536_v35 = vpack.c.bf16 %v7685_v28, %v7684_v48  ;;  %v7203_v1 = vmul.f32 0.25, %v3386_v25  ;;  %v3514_v22 = vmax.f32 %v3386_v25, 0.0  ;;  %v7205_v58 = vmul.f32 0.25, %v3384_v24 }
 0x303   : > { %v3512_v41 = vmax.f32 %v3384_v24, 0.0  ;;  %v7209_v37 = vmax.f32 %v7686_v17, %v3197_v42  ;;  %v7212_v49 = vadd.f32 %v6935_v60, %v3197_v42  ;;  %v3195_v7 = vmax.f32 %v3033_v43, 0.0 }
 0x304   : > { %v3480_v5 = vmax.f32 %v7205_v58, 0.0  ;;  %3831 = vmatmul.mubr.bf16.gmra.mrb[140].mxu0 %v3536_v35  ;;  %v3044_v25 = vadd.f32 %v7111_v32, %v5398_v55  ;;  %v3540_v24 = vpack.c.bf16 %v3472_v36, %v3471_v38  ;;  %v7687_v35 = vld [vmem:[#allocation8_spill] sm:$0xff]  ;;  %v3036_v21 = vadd.f32 %v7111_v32, %v3035_v52 }
 0x305   : > { %v7222_v28 = vmul.f32 0.25, %v7212_v49  ;;  %v3517_v42 = vmax.f32 %v7212_v49, 0.0  ;;  %v7227_v43 = vmax.f32 %v6938_v56, %v3195_v7  ;;  %v3387_v54 = vadd.f32 %v7687_v35, %v3195_v7 }
 0x306   : > { %v5401_v44 = vpop.f32.mrb[120].mxu1  ;;  %v3198_v55 = vmax.f32 %v3044_v25, 0.0  ;;  %3838 = vmatprep.mubr.bf16.mxu0 %v3540_v24  ;;  %v3553_v10 = vpack.c.bf16 %v3512_v41, %v3511_v46  ;;  %v3556_v11 = vpack.c.bf16 %v3514_v22, %v3513_v61  ;;  %v3196_v25 = vmax.f32 %v3036_v21, 0.0  ;;  %v7690_v24 = vld [vmem:[#allocation11_spill] sm:$0xff] }
 0x307   : > { %v3048_v48 = vpop.f32.mrb[121].mxu1  ;;  %v3057_v60 = vadd.f32 %v7111_v32, %v5401_v44  ;;  %v7234_v49 = vmul.f32 0.25, %v3387_v54  ;;  %v3515_v56 = vmax.f32 %v3387_v54, 0.0  ;;  %v3539_v61 = vpack.c.bf16 %v3440_v13, %v3439_v2  ;;  %v7689_v44 = vld [vmem:[#allocation10_spill] sm:$0xff]  ;;  %v7693_v2 = vld [vmem:[#allocation13_spill] sm:$0xff] }
 0x308   : > { %v5402_v17 = vpop.f32.mrb[122].mxu1  ;;  %v7237_v16 = vmax.f32 %v7688_v51, %v3198_v55  ;;  %v3390_v7 = vadd.f32 %v6947_v30, %v3198_v55  ;;  %5439 = vmatprep.mubr.bf16.mxu1 %v3553_v10  ;;  %v3049_v52 = vadd.f32 %v7111_v32, %v3048_v48  ;;  %v7250_v30 = vmax.f32 %v6950_v27, %v3196_v25 }
 0x309   : > { %v3051_v38 = vpop.f32.mrb[123].mxu1  ;;  %5440 = vmatmul.mubr.bf16.gmra.mrb[144].mxu1 %v3556_v11  ;;  %v3201_v46 = vmax.f32 %v3057_v60, 0.0  ;;  %v3388_v11 = vadd.f32 %v7689_v44, %v3196_v25  ;;  %v3060_v48 = vadd.f32 %v7111_v32, %v5402_v17  ;;  %v7691_v27 = vmax.f32 %v7106_v15, 0.0 }
 0x30a   : > { %v7246_v41 = vmul.f32 0.25, %v3390_v7  ;;  %v3518_v51 = vmax.f32 %v3390_v7, 0.0  ;;  %v3199_v13 = vmax.f32 %v3049_v52, 0.0  ;;  %v7694_v44 = vmax.f32 %v7078_v19, 0.0 }
 0x30b   : > { %v7254_v60 = vmax.f32 %v7690_v24, %v3201_v46  ;;  %v7257_v29 = vadd.f32 %v6963_v26, %v3201_v46  ;;  %v3543_v35 = vpack.c.bf16 %v7691_v27, %v3473_v9  ;;  %v7265_v21 = vmul.f32 0.25, %v3388_v11 }
 0x30c   : > { %3839 = vmatmul.mubr.bf16.gmra.mrb[144].mxu0 %v3539_v61  ;;  %v3516_v7 = vmax.f32 %v3388_v11, 0.0  ;;  %v7274_v17 = vmax.f32 %v6966_v39, %v3199_v13  ;;  %v3391_v15 = vadd.f32 %v7692_v18, %v3199_v13  ;;  %v3202_v11 = vmax.f32 %v3060_v48, 0.0 }
 0x30d   : > { %v7269_v26 = vmul.f32 0.25, %v7257_v29  ;;  %v3521_v52 = vmax.f32 %v7257_v29, 0.0  ;;  %3846 = vmatprep.mubr.bf16.mxu0 %v3543_v35  ;;  %v3052_v24 = vadd.f32 %v7111_v32, %v3051_v38  ;;  %v3562_v18 = vpack.c.bf16 %v3518_v51, %v3517_v42 }
 0x30e   : > { %v5405_v14 = vpop.f32.mrb[124].mxu1  ;;  %v7280_v27 = vmul.f32 0.25, %v3391_v15  ;;  %v3519_v54 = vmax.f32 %v3391_v15, 0.0  ;;  %v3559_v29 = vpack.c.bf16 %v3516_v7, %v3515_v56  ;;  %v7284_v39 = vmax.f32 %v7693_v2, %v3202_v11 }
 0x30f   : > { %v3064_v55 = vpop.f32.mrb[125].mxu1  ;;  %v3394_v13 = vadd.f32 %v6975_v53, %v3202_v11  ;;  %v3200_v35 = vmax.f32 %v3052_v24, 0.0  ;;  %v3073_v48 = vadd.f32 %v7111_v32, %v5405_v14  ;;  %v7695_v46 = vmax.f32 %v7093_v40, 0.0 }
 0x310   : > { %v5406_v25 = vpop.f32.mrb[126].mxu1  ;;  %5443 = vmatprep.mubr.bf16.mxu1 %v3559_v29  ;;  %v3065_v38 = vadd.f32 %v7111_v32, %v3064_v55  ;;  %v7719_v58 = vmax.f32 %v7265_v21, 0.0 }
 0x311   : > { %v3067_v9 = vpop.f32.mrb[127].mxu1  ;;  %v3542_v15 = vpack.c.bf16 %v7695_v46, %v7694_v44  ;;  %v7294_v56 = vmul.f32 0.25, %v3394_v13  ;;  %v3522_v7 = vmax.f32 %v3394_v13, 0.0  ;;  %v7298_v53 = vmax.f32 %v6978_v4, %v3200_v35  ;;  %5444 = vmatmul.mubr.bf16.gmra.mrb[148].mxu1 %v3562_v18  ;;  %v7698_v13 = vld [vmem:[#allocation14_spill] sm:$0xff] }
 0x312   : > { %v3392_v42 = vadd.f32 %v6981_v62, %v3200_v35  ;;  %v3205_v51 = vmax.f32 %v3073_v48, 0.0  ;;  %v3203_v14 = vmax.f32 %v3065_v38, 0.0  ;;  %v3076_v55 = vadd.f32 %v7111_v32, %v5406_v25  ;;  %v7699_v35 = vld [vmem:[#allocation15_spill] sm:$0xff]  ;;  %v7700_v48 = vld [vmem:[#allocation16_spill] sm:$0xff]  ;;  %v7701_v25 = vld [vmem:[#allocation21_spill] sm:$0xff] }
 0x313   : > { %v3490_v19 = vmax.f32 %v7294_v56, 0.0  ;;  %v3456_v40 = vmax.f32 %v7298_v53, 0.0  ;;  %v7696_v46 = vmax.f32 %v7139_v50, 0.0  ;;  %v7697_v44 = vmax.f32 %v7152_v31, 0.0 }
 0x314   : > { %3847 = vmatmul.mubr.bf16.gmra.mrb[148].mxu0 %v3542_v15  ;;  %v3068_v4 = vadd.f32 %v7111_v32, %v3067_v9  ;;  %v3424_v24 = vmul.f32 0.25, %v3392_v42  ;;  %v3520_v29 = vmax.f32 %v3392_v42, 0.0  ;;  %v3365_v62 = vmax.f32 %v7698_v13, %v3205_v51  ;;  %v7702_v9 = vld [vmem:[#allocation17_spill] sm:$0xff]  ;;  %v7703_v13 = vld [vmem:[#allocation22_spill] sm:$0xff] }
 0x315   : > { %v3546_v11 = vpack.c.bf16 %v7697_v44, %v7696_v46  ;;  %v3397_v18 = vadd.f32 %v7699_v35, %v3205_v51  ;;  %v3363_v38 = vmax.f32 %v7700_v48, %v3203_v14  ;;  %v3395_v15 = vadd.f32 %v7701_v25, %v3203_v14  ;;  %v7704_v51 = vld [vmem:[#allocation23_spill] sm:$0xff]  ;;  %v7705_v48 = vld [vmem:[#allocation24_spill] sm:$0xff] }
 0x316   : > { %v3206_v56 = vmax.f32 %v3076_v55, 0.0  ;;  %v3204_v53 = vmax.f32 %v3068_v4, 0.0  ;;  %v3488_v2 = vmax.f32 %v3424_v24, 0.0  ;;  %v3461_v36 = vmax.f32 %v3365_v62, 0.0 }
 0x317   : > { %3854 = vmatprep.mubr.bf16.mxu0 %v3546_v11  ;;  %v3429_v50 = vmul.f32 0.25, %v3397_v18  ;;  %v3525_v31 = vmax.f32 %v3397_v18, 0.0  ;;  %v3427_v46 = vmul.f32 0.25, %v3395_v15  ;;  %v3459_v44 = vmax.f32 %v3363_v38, 0.0 }
 0x318   : > { %v3523_v32 = vmax.f32 %v3395_v15, 0.0  ;;  %v3366_v42 = vmax.f32 %v7702_v9, %v3206_v56  ;;  %v3398_v0 = vadd.f32 %v7703_v13, %v3206_v56  ;;  %v3364_v35 = vmax.f32 %v7704_v51, %v3204_v53 }
 0x319   : > { %v3493_v10 = vmax.f32 %v3429_v50, 0.0  ;;  %v3396_v61 = vadd.f32 %v7705_v48, %v3204_v53  ;;  %v3491_v14 = vmax.f32 %v3427_v46, 0.0  ;;  %v3565_v11 = vpack.c.bf16 %v3520_v29, %v3519_v54 }
 0x31a   : > { %v3462_v55 = vmax.f32 %v3366_v42, 0.0  ;;  %v3568_v4 = vpack.c.bf16 %v3522_v7, %v3521_v52  ;;  %v3430_v24 = vmul.f32 0.25, %v3398_v0  ;;  %v3526_v25 = vmax.f32 %v3398_v0, 0.0 }
 0x31b   : > { %v3428_v62 = vmul.f32 0.25, %v3396_v61  ;;  %v3460_v18 = vmax.f32 %v3364_v35, 0.0  ;;  %v3524_v22 = vmax.f32 %v3396_v61, 0.0  ;;  %5447 = vmatprep.mubr.bf16.mxu1 %v3565_v11  ;;  %v7706_v38 = vmax.f32 %v7129_v3, 0.0 }
 0x31c   : > { %v7707_v15 = vmax.f32 %v7146_v20, 0.0  ;;  %v7708_v56 = vmax.f32 %v7133_v33, 0.0  ;;  %v7709_v9 = vmax.f32 %v7150_v47, 0.0  ;;  %v7710_v46 = vmax.f32 %v7125_v45, 0.0  ;;  %5448 = vmatmul.mubr.bf16.gmra.mrb[152].mxu1 %v3568_v4 }
 0x31d   : > { %v7711_v54 = vmax.f32 %v7137_v8, 0.0  ;;  %v3494_v0 = vmax.f32 %v3430_v24, 0.0  ;;  %v3492_v7 = vmax.f32 %v3428_v62, 0.0  ;;  %v3574_v61 = vpack.c.bf16 %v3526_v25, %v3525_v31 }
 0x31e   : > { %v3545_v50 = vpack.c.bf16 %v7707_v15, %v7706_v38  ;;  %v3549_v53 = vpack.c.bf16 %v7709_v9, %v7708_v56  ;;  %v3552_v3 = vpack.c.bf16 %v3480_v5, %v3479_v57  ;;  %v3571_v20 = vpack.c.bf16 %v3524_v22, %v3523_v32 }
 0x31f   : > { %v3548_v52 = vpack.c.bf16 %v7711_v54, %v7710_v46  ;;  %v7712_v33 = vmax.f32 %v7180_v6, 0.0  ;;  %v7713_v47 = vmax.f32 %v7193_v12, 0.0  ;;  %v7714_v45 = vmax.f32 %v7174_v59, 0.0 }
 0x320   : > { %3855 = vmatmul.mubr.bf16.gmra.mrb[152].mxu0 %v3545_v50  ;;  %v7715_v8 = vmax.f32 %v7203_v1, 0.0  ;;  %v7716_v13 = vmax.f32 %v7158_v34, 0.0  ;;  %v7717_v31 = vmax.f32 %v7189_v63, 0.0  ;;  %v7718_v57 = vmax.f32 %v7234_v49, 0.0  ;;  %5451 = vmatprep.mubr.bf16.mxu1 %v3571_v20 }
 0x321   : > { %v3551_v29 = vpack.c.bf16 %v7713_v47, %v7712_v33  ;;  %3862 = vmatprep.mubr.bf16.mxu0 %v3549_v53  ;;  %v7720_v6 = vmax.f32 %v7227_v43, 0.0  ;;  %v7721_v12 = vmax.f32 %v7250_v30, 0.0  ;;  %v7722_v59 = vmax.f32 %v7222_v28, 0.0 }
 0x322   : > { %v3555_v42 = vpack.c.bf16 %v7715_v8, %v7714_v45  ;;  %v3554_v23 = vpack.c.bf16 %v7717_v31, %v7716_v13  ;;  %v3558_v5 = vpack.c.bf16 %v7719_v58, %v7718_v57  ;;  %v7723_v1 = vmax.f32 %v7246_v41, 0.0 }
 0x323   : > { %v3557_v22 = vpack.c.bf16 %v7721_v12, %v7720_v6  ;;  %v7724_v34 = vmax.f32 %v7209_v37, 0.0  ;;  %v7725_v63 = vmax.f32 %v7237_v16, 0.0  ;;  %v7726_v49 = vmax.f32 %v7280_v27, 0.0  ;;  %v5569_v27 = vld [vmem:[%s7617_s7 + $0x38] sm:$0xff]  }
 0x324   : > { %v3561_v32 = vpack.c.bf16 %v7723_v1, %v7722_v59  ;;  %v7727_v35 = vmax.f32 %v7274_v17, 0.0  ;;  %v7728_v30 = vmax.f32 %v7269_v26, 0.0  ;;  %v7729_v28 = vmax.f32 %v7254_v60, 0.0  ;;  %5452 = vmatmul.mubr.bf16.gmra.mrb[156].mxu1 %v3574_v61  ;;  %v5564_v26 = vld [vmem:[%s7617_s7 + $0x10] sm:$0xff]   ;;  %v5565_v60 = vld [vmem:[%s7617_s7 + $0x18] sm:$0xff]  }
 0x325   : > { %v3560_v51 = vpack.c.bf16 %v7725_v63, %v7724_v34  ;;  %v3564_v21 = vpack.c.bf16 %v3488_v2, %v7726_v49  ;;  %v7730_v41 = vmax.f32 %v7284_v39, 0.0  ;;  %v3570_v4 = vpack.c.bf16 %v3492_v7, %v3491_v14  ;;  %5459 = vmatprep.subr.bf16.mxu1 %v5564_v26  ;;  %v5568_v17 = vld [vmem:[%s7617_s7 + $0x30] sm:$0xff]  }
 0x326   : > { %v3563_v43 = vpack.c.bf16 %v3456_v40, %v7727_v35  ;;  %v3567_v48 = vpack.c.bf16 %v3490_v19, %v7728_v30  ;;  %v3569_v37 = vpack.c.bf16 %v3460_v18, %v3459_v44  ;;  %v3573_v24 = vpack.c.bf16 %v3494_v0, %v3493_v10  ;;  %5460 = vmatpush3.bf16.msra.mxu1 %v5564_v26  ;;  %v5567_v10 = vld [vmem:[%s7617_s7 + $0x28] sm:$0xff]   ;;  %v7392_v44 = vld [vmem:[%s7616_s6] ss:$0 sm:$0xff] }
 0x327   : > { %v3566_v11 = vpack.c.bf16 %v7730_v41, %v7729_v28  ;;  %v3572_v16 = vpack.c.bf16 %v3462_v55, %v3461_v36  ;;  %5461 = vmatprep.subr.bf16.mxu1 %v5565_v60  ;;  %v5566_v36 = vld [vmem:[%s7617_s7 + $0x20] sm:$0xff]  }
 0x328   : > { %3863 = vmatmul.mubr.bf16.gmra.mrb[156].mxu0 %v3548_v52 }
 0x329   : > { %3870 = vmatprep.mubr.bf16.mxu0 %v3552_v3 }
 0x32a   : > { %5462 = vmatpush3.bf16.msra.mxu1 %v5565_v60 }
 0x32b   : > { %5463 = vmatprep.subr.bf16.mxu1 %v5566_v36 }
 0x32e   : > { %5464 = vmatpush3.bf16.msra.mxu1 %v5566_v36 }
 0x32f   : > { %5465 = vmatprep.subr.bf16.mxu1 %v5567_v10 }
 0x330   : > { %3871 = vmatmul.mubr.bf16.gmra.mrb[160].mxu0 %v3551_v29 }
 0x331   : > { %3878 = vmatprep.mubr.bf16.mxu0 %v3555_v42 }
 0x332   : > { %5466 = vmatpush3.bf16.msra.mxu1 %v5567_v10 }
 0x333   : > { %5467 = vmatprep.subr.bf16.mxu1 %v5568_v17 }
 0x336   : > { %5468 = vmatpush3.bf16.msra.mxu1 %v5568_v17 }
 0x337   : > { %5469 = vmatprep.subr.bf16.mxu1 %v5569_v27 }
 0x338   : > { %3879 = vmatmul.mubr.bf16.gmra.mrb[164].mxu0 %v3554_v23 }
 0x339   : > { %3886 = vmatprep.mubr.bf16.mxu0 %v3558_v5 }
 0x33a   : > { %5470 = vmatpush3.bf16.msra.mxu1 %v5569_v27 }
 0x340   : > { %3887 = vmatmul.mubr.bf16.gmra.mrb[168].mxu0 %v3557_v22 }
 0x341   : > { %3894 = vmatprep.mubr.bf16.mxu0 %v3561_v32 }
 0x348   : > { %3895 = vmatmul.mubr.bf16.gmra.mrb[172].mxu0 %v3560_v51 }
 0x349   : > { %3902 = vmatprep.mubr.bf16.mxu0 %v3564_v21 }
 0x350   : > { %3903 = vmatmul.mubr.bf16.gmra.mrb[176].mxu0 %v3563_v43 }
 0x351   : > { %3910 = vmatprep.mubr.bf16.mxu0 %v3567_v48 }
 0x358   : > { %3911 = vmatmul.mubr.bf16.gmra.mrb[180].mxu0 %v3566_v11 }
 0x359   : > { %3918 = vmatprep.mubr.bf16.mxu0 %v3570_v4 }
 0x360   : > { %3919 = vmatmul.mubr.bf16.gmra.mrb[184].mxu0 %v3569_v37 }
 0x361   : > { %3926 = vmatprep.mubr.bf16.mxu0 %v3573_v24 }
 0x368   : > { %3927 = vmatmul.mubr.bf16.gmra.mrb[188].mxu0 %v3572_v16 }
 0x3b9   : > { %v5425_v39 = vpop.f32.mrb[128].mxu1 }
 0x3ba   : > { %v3969_v2 = vpop.f32.mrb[129].mxu1 }
 0x3bb   : > { %v4931_v19 = vpop.f32.mrb[128].mxu0  ;;  %v5426_v40 = vpop.f32.mrb[130].mxu1 }
 0x3bc   : > { %v4932_v14 = vpop.f32.mrb[129].mxu0  ;;  %v3972_v25 = vpop.f32.mrb[131].mxu1 }
 0x3bd   : > { %v4933_v55 = vadd.f32 %v4932_v14, %v4931_v19  ;;  %v4934_v62 = vpop.f32.mrb[130].mxu0 }
 0x3be   : > { %v4935_v18 = vpop.f32.mrb[131].mxu0 }
 0x3bf   : > { %v3809_v38 = vadd.f32 %v4933_v55, %v7392_v44  ;;  %v4936_v15 = vadd.f32 %v4935_v18, %v4934_v62 }
 0x3c1   : > { %v3970_v50 = vadd.f32 %v3969_v2, %v3809_v38  ;;  %v3812_v56 = vadd.f32 %v4936_v15, %v7392_v44 }
 0x3c2   : > { %v5429_v9 = vpop.f32.mrb[132].mxu1 }
 0x3c3   : > { %v3973_v53 = vadd.f32 %v3972_v25, %v3812_v56  ;;  %v3985_v46 = vpop.f32.mrb[133].mxu1  ;;  %v4096_v7 = vmax.f32 %v3970_v50, 0.0 }
 0x3c4   : > { %v5430_v52 = vpop.f32.mrb[134].mxu1 }
 0x3c5   : > { %v4937_v54 = vpop.f32.mrb[132].mxu0  ;;  %v4097_v61 = vmax.f32 %v3973_v53, 0.0  ;;  %v3988_v20 = vpop.f32.mrb[135].mxu1 }
 0x3c6   : > { %v4938_v0 = vpop.f32.mrb[133].mxu0 }
 0x3c7   : > { %v4939_v3 = vadd.f32 %v4938_v0, %v4937_v54  ;;  %v4940_v33 = vpop.f32.mrb[134].mxu0  ;;  %v4128_v8 = vpack.c.bf16 %v4097_v61, %v4096_v7 }
 0x3c8   : > { %v4941_v47 = vpop.f32.mrb[135].mxu0 }
 0x3c9   : > { %v3817_v29 = vadd.f32 %v4939_v3, %v7392_v44  ;;  %v4942_v45 = vadd.f32 %v4941_v47, %v4940_v33  ;;  %5471 = vmatprep.mubr.bf16.mxu1 %v4128_v8 }
 0x3cb   : > { %v3978_v42 = vadd.f32 %v5425_v39, %v3817_v29  ;;  %v3820_v13 = vadd.f32 %v4942_v45, %v7392_v44  ;;  %v7398_v23 = vpop.f32.mrb[136].mxu1 }
 0x3cc   : > { %v4001_v57 = vpop.f32.mrb[137].mxu1 }
 0x3cd   : > { %v3981_v31 = vadd.f32 %v5426_v40, %v3820_v13  ;;  %v4098_v58 = vmax.f32 %v3978_v42, 0.0  ;;  %v7400_v6 = vpop.f32.mrb[138].mxu1 }
 0x3ce   : > { %v4004_v12 = vpop.f32.mrb[139].mxu1 }
 0x3cf   : > { %v4099_v5 = vmax.f32 %v3981_v31, 0.0  ;;  %v4943_v59 = vpop.f32.mrb[136].mxu0 }
 0x3d0   : > { %v4944_v1 = vpop.f32.mrb[137].mxu0 }
 0x3d1   : > { %v4129_v22 = vpack.c.bf16 %v4099_v5, %v4098_v58  ;;  %v4945_v32 = vadd.f32 %v4944_v1, %v4943_v59  ;;  %v4946_v34 = vpop.f32.mrb[138].mxu0 }
 0x3d2   : > { %v4947_v63 = vpop.f32.mrb[139].mxu0 }
 0x3d3   : > { %5472 = vmatmul.mubr.bf16.vlgmr.msra.gmra.mrb[160].mxu1 %v4129_v22  ;;  %v3825_v51 = vadd.f32 %v4945_v32, %v7392_v44  ;;  %v4948_v49 = vadd.f32 %v4947_v63, %v4946_v34  ;;  %v7403_v21 = vpop.f32.mrb[140].mxu1 }
 0x3d4   : > { %v7405_v35 = vpop.f32.mrb[141].mxu1 }
 0x3d5   : > { %v3986_v43 = vadd.f32 %v3985_v46, %v3825_v51  ;;  %v3828_v30 = vadd.f32 %v4948_v49, %v7392_v44  ;;  %v7408_v48 = vpop.f32.mrb[142].mxu1 }
 0x3d6   : > { %v7410_v28 = vpop.f32.mrb[143].mxu1 }
 0x3d7   : > { %v3989_v41 = vadd.f32 %v3988_v20, %v3828_v30  ;;  %v4949_v11 = vpop.f32.mrb[140].mxu0  ;;  %v4100_v37 = vmax.f32 %v3986_v43, 0.0 }
 0x3d8   : > { %v4950_v4 = vpop.f32.mrb[141].mxu0 }
 0x3d9   : > { %v4101_v24 = vmax.f32 %v3989_v41, 0.0  ;;  %v4951_v16 = vadd.f32 %v4950_v4, %v4949_v11  ;;  %v4952_v26 = vpop.f32.mrb[142].mxu0 }
 0x3da   : > { %v4953_v60 = vpop.f32.mrb[143].mxu0 }
 0x3db   : > { %v3833_v36 = vadd.f32 %v4951_v16, %v7392_v44  ;;  %v4954_v10 = vadd.f32 %v4953_v60, %v4952_v26  ;;  %v4130_v17 = vpack.c.bf16 %v4101_v24, %v4100_v37 }
 0x3dc   : > { %v7413_v27 = vpop.f32.mrb[144].mxu1 }
 0x3dd   : > { %v3994_v39 = vadd.f32 %v5429_v9, %v3833_v36  ;;  %v3836_v2 = vadd.f32 %v4954_v10, %v7392_v44  ;;  %5475 = vmatprep.mubr.bf16.mxu1 %v4130_v17  ;;  %v7416_v19 = vpop.f32.mrb[145].mxu1 }
 0x3de   : > { %v7418_v40 = vpop.f32.mrb[146].mxu1 }
 0x3df   : > { %v3997_v14 = vadd.f32 %v5430_v52, %v3836_v2  ;;  %v4955_v55 = vpop.f32.mrb[144].mxu0  ;;  %v7420_v25 = vpop.f32.mrb[147].mxu1  ;;  %v4102_v18 = vmax.f32 %v3994_v39, 0.0 }
 0x3e0   : > { %v4956_v62 = vpop.f32.mrb[145].mxu0 }
 0x3e1   : > { %v4103_v38 = vmax.f32 %v3997_v14, 0.0  ;;  %v4957_v15 = vadd.f32 %v4956_v62, %v4955_v55  ;;  %v4958_v50 = vpop.f32.mrb[146].mxu0 }
 0x3e2   : > { %v4959_v56 = vpop.f32.mrb[147].mxu0 }
 0x3e3   : > { %v3841_v53 = vadd.f32 %v4957_v15, %v7392_v44  ;;  %v4960_v9 = vadd.f32 %v4959_v56, %v4958_v50  ;;  %v4131_v46 = vpack.c.bf16 %v4103_v38, %v4102_v18 }
 0x3e4   : > { %v7424_v7 = vpop.f32.mrb[148].mxu1 }
 0x3e5   : > { %v4002_v54 = vadd.f32 %v4001_v57, %v3841_v53  ;;  %v3844_v0 = vadd.f32 %v4960_v9, %v7392_v44  ;;  %5476 = vmatmul.mubr.bf16.gmra.mrb[164].mxu1 %v4131_v46  ;;  %v7426_v61 = vpop.f32.mrb[149].mxu1 }
 0x3e6   : > { %v7428_v20 = vpop.f32.mrb[150].mxu1 }
 0x3e7   : > { %v4005_v52 = vadd.f32 %v4004_v12, %v3844_v0  ;;  %v4961_v3 = vpop.f32.mrb[148].mxu0  ;;  %v4104_v47 = vmax.f32 %v4002_v54, 0.0  ;;  %v7430_v8 = vpop.f32.mrb[151].mxu1 }
 0x3e8   : > { %v4962_v33 = vpop.f32.mrb[149].mxu0 }
 0x3e9   : > { %v4105_v29 = vmax.f32 %v4005_v52, 0.0  ;;  %v4963_v45 = vadd.f32 %v4962_v33, %v4961_v3  ;;  %v4964_v42 = vpop.f32.mrb[150].mxu0 }
 0x3ea   : > { %v4965_v13 = vpop.f32.mrb[151].mxu0 }
 0x3eb   : > { %v3849_v31 = vadd.f32 %v4963_v45, %v7392_v44  ;;  %v4966_v57 = vadd.f32 %v4965_v13, %v4964_v42  ;;  %v4132_v58 = vpack.c.bf16 %v4105_v29, %v4104_v47 }
 0x3ed   : > { %v4010_v5 = vadd.f32 %v7398_v23, %v3849_v31  ;;  %v3852_v12 = vadd.f32 %v4966_v57, %v7392_v44  ;;  %5479 = vmatprep.mubr.bf16.mxu1 %v4132_v58 }
 0x3ef   : > { %v4013_v22 = vadd.f32 %v7400_v6, %v3852_v12  ;;  %v4106_v59 = vmax.f32 %v4010_v5, 0.0  ;;  %v7436_v32 = vpop.f32.mrb[152].mxu1 }
 0x3f0   : > { %v7438_v34 = vpop.f32.mrb[153].mxu1 }
 0x3f1   : > { %v4107_v1 = vmax.f32 %v4013_v22, 0.0  ;;  %v7440_v51 = vpop.f32.mrb[154].mxu1 }
 0x3f2   : > { %v7442_v41 = vpop.f32.mrb[155].mxu1 }
 0x3f3   : > { %v4967_v63 = vpop.f32.mrb[152].mxu0  ;;  %v4133_v43 = vpack.c.bf16 %v4107_v1, %v4106_v59 }
 0x3f4   : > { %v4968_v49 = vpop.f32.mrb[153].mxu0 }
 0x3f5   : > { %v4969_v30 = vadd.f32 %v4968_v49, %v4967_v63  ;;  %v4970_v23 = vpop.f32.mrb[154].mxu0  ;;  %5480 = vmatmul.mubr.bf16.gmra.mrb[168].mxu1 %v4133_v43 }
 0x3f6   : > { %v4971_v11 = vpop.f32.mrb[155].mxu0 }
 0x3f7   : > { %v3857_v4 = vadd.f32 %v4969_v30, %v7392_v44  ;;  %v4972_v6 = vadd.f32 %v4971_v11, %v4970_v23  ;;  %v7447_v16 = vpop.f32.mrb[156].mxu1 }
 0x3f8   : > { %v7450_v60 = vpop.f32.mrb[157].mxu1 }
 0x3f9   : > { %v4018_v37 = vadd.f32 %v7405_v35, %v3857_v4  ;;  %v3860_v24 = vadd.f32 %v4972_v6, %v7392_v44  ;;  %v7452_v10 = vpop.f32.mrb[158].mxu1 }
 0x3fa   : > { %v7454_v55 = vpop.f32.mrb[159].mxu1 }
 0x3fb   : > { %v4021_v26 = vadd.f32 %v7410_v28, %v3860_v24  ;;  %v4973_v36 = vpop.f32.mrb[156].mxu0  ;;  %v4108_v39 = vmax.f32 %v4018_v37, 0.0 }
 0x3fc   : > { %v4974_v17 = vpop.f32.mrb[157].mxu0 }
 0x3fd   : > { %v4109_v2 = vmax.f32 %v4021_v26, 0.0  ;;  %v4975_v14 = vadd.f32 %v4974_v17, %v4973_v36  ;;  %v4976_v62 = vpop.f32.mrb[158].mxu0 }
 0x3fe   : > { %v4977_v18 = vpop.f32.mrb[159].mxu0 }
 0x3ff   : > { %v3865_v35 = vadd.f32 %v4975_v14, %v7392_v44  ;;  %v4978_v38 = vadd.f32 %v4977_v18, %v4976_v62  ;;  %v4134_v15 = vpack.c.bf16 %v4109_v2, %v4108_v39 }
 0x401   : > { %v4026_v50 = vadd.f32 %v7403_v21, %v3865_v35  ;;  %v3868_v28 = vadd.f32 %v4978_v38, %v7392_v44  ;;  %5483 = vmatprep.mubr.bf16.mxu1 %v4134_v15 }
 0x403   : > { %v4029_v56 = vadd.f32 %v7408_v48, %v3868_v28  ;;  %v4979_v53 = vpop.f32.mrb[160].mxu0  ;;  %v4110_v46 = vmax.f32 %v4026_v50, 0.0 }
 0x404   : > { %v4980_v9 = vpop.f32.mrb[161].mxu0 }
 0x405   : > { %v4111_v54 = vmax.f32 %v4029_v56, 0.0  ;;  %v4981_v0 = vadd.f32 %v4980_v9, %v4979_v53  ;;  %v4982_v52 = vpop.f32.mrb[162].mxu0 }
 0x406   : > { %v4983_v3 = vpop.f32.mrb[163].mxu0 }
 0x407   : > { %v3873_v33 = vadd.f32 %v4981_v0, %v7392_v44  ;;  %v4984_v47 = vadd.f32 %v4983_v3, %v4982_v52  ;;  %v4135_v29 = vpack.c.bf16 %v4111_v54, %v4110_v46 }
 0x409   : > { %v4034_v45 = vadd.f32 %v7416_v19, %v3873_v33  ;;  %v3876_v21 = vadd.f32 %v4984_v47, %v7392_v44  ;;  %5484 = vmatmul.mubr.bf16.gmra.mrb[172].mxu1 %v4135_v29 }
 0x40b   : > { %v4037_v42 = vadd.f32 %v7420_v25, %v3876_v21  ;;  %v4985_v13 = vpop.f32.mrb[164].mxu0  ;;  %v4112_v31 = vmax.f32 %v4034_v45, 0.0 }
 0x40c   : > { %v4986_v48 = vpop.f32.mrb[165].mxu0 }
 0x40d   : > { %v4113_v57 = vmax.f32 %v4037_v42, 0.0  ;;  %v4987_v58 = vadd.f32 %v4986_v48, %v4985_v13  ;;  %v4988_v5 = vpop.f32.mrb[166].mxu0 }
 0x40e   : > { %v4989_v12 = vpop.f32.mrb[167].mxu0 }
 0x40f   : > { %v3881_v22 = vadd.f32 %v4987_v58, %v7392_v44  ;;  %v4990_v59 = vadd.f32 %v4989_v12, %v4988_v5  ;;  %v4136_v1 = vpack.c.bf16 %v4113_v57, %v4112_v31 }
 0x411   : > { %v4042_v63 = vadd.f32 %v7413_v27, %v3881_v22  ;;  %v3884_v19 = vadd.f32 %v4990_v59, %v7392_v44  ;;  %5487 = vmatprep.mubr.bf16.mxu1 %v4136_v1 }
 0x413   : > { %v4045_v49 = vadd.f32 %v7418_v40, %v3884_v19  ;;  %v4991_v43 = vpop.f32.mrb[168].mxu0  ;;  %v4114_v30 = vmax.f32 %v4042_v63, 0.0 }
 0x414   : > { %v4992_v25 = vpop.f32.mrb[169].mxu0 }
 0x415   : > { %v4115_v23 = vmax.f32 %v4045_v49, 0.0  ;;  %v4993_v11 = vadd.f32 %v4992_v25, %v4991_v43  ;;  %v4994_v4 = vpop.f32.mrb[170].mxu0 }
 0x416   : > { %v4995_v6 = vpop.f32.mrb[171].mxu0 }
 0x417   : > { %v3889_v37 = vadd.f32 %v4993_v11, %v7392_v44  ;;  %v4996_v24 = vadd.f32 %v4995_v6, %v4994_v4  ;;  %v4137_v26 = vpack.c.bf16 %v4115_v23, %v4114_v30 }
 0x419   : > { %v4050_v36 = vadd.f32 %v7426_v61, %v3889_v37  ;;  %v3892_v27 = vadd.f32 %v4996_v24, %v7392_v44  ;;  %5488 = vmatmul.mubr.bf16.gmra.mrb[176].mxu1 %v4137_v26 }
 0x41b   : > { %v4053_v17 = vadd.f32 %v7430_v8, %v3892_v27  ;;  %v4997_v39 = vpop.f32.mrb[172].mxu0  ;;  %v4116_v2 = vmax.f32 %v4050_v36, 0.0 }
 0x41c   : > { %v4998_v40 = vpop.f32.mrb[173].mxu0 }
 0x41d   : > { %v4117_v14 = vmax.f32 %v4053_v17, 0.0  ;;  %v4999_v62 = vadd.f32 %v4998_v40, %v4997_v39  ;;  %v5000_v18 = vpop.f32.mrb[174].mxu0 }
 0x41e   : > { %v5001_v35 = vpop.f32.mrb[175].mxu0 }
 0x41f   : > { %v3897_v38 = vadd.f32 %v4999_v62, %v7392_v44  ;;  %v5002_v15 = vadd.f32 %v5001_v35, %v5000_v18  ;;  %v4138_v50 = vpack.c.bf16 %v4117_v14, %v4116_v2 }
 0x421   : > { %v4058_v28 = vadd.f32 %v7424_v7, %v3897_v38  ;;  %v3900_v61 = vadd.f32 %v5002_v15, %v7392_v44  ;;  %5491 = vmatprep.mubr.bf16.mxu1 %v4138_v50  ;;  %v7497_v38 = vld [vmem:[%s7618_s8] ss:$0 sm:$0xff] }
 0x423   : > { %v4061_v56 = vadd.f32 %v7428_v20, %v3900_v61  ;;  %v5003_v53 = vpop.f32.mrb[176].mxu0  ;;  %v4118_v9 = vmax.f32 %v4058_v28, 0.0 }
 0x424   : > { %v5004_v8 = vpop.f32.mrb[177].mxu0 }
 0x425   : > { %v4119_v46 = vmax.f32 %v4061_v56, 0.0  ;;  %v5005_v54 = vadd.f32 %v5004_v8, %v5003_v53  ;;  %v5006_v0 = vpop.f32.mrb[178].mxu0 }
 0x426   : > { %v5007_v52 = vpop.f32.mrb[179].mxu0 }
 0x427   : > { %v3905_v3 = vadd.f32 %v5005_v54, %v7392_v44  ;;  %v5008_v33 = vadd.f32 %v5007_v52, %v5006_v0  ;;  %v4139_v47 = vpack.c.bf16 %v4119_v46, %v4118_v9 }
 0x429   : > { %v4066_v29 = vadd.f32 %v7438_v34, %v3905_v3  ;;  %v3908_v7 = vadd.f32 %v5008_v33, %v7392_v44  ;;  %5492 = vmatmul.mubr.bf16.gmra.mrb[180].mxu1 %v4139_v47 }
 0x42b   : > { %v4069_v45 = vadd.f32 %v7442_v41, %v3908_v7  ;;  %v5009_v21 = vpop.f32.mrb[180].mxu0  ;;  %v4120_v42 = vmax.f32 %v4066_v29, 0.0 }
 0x42c   : > { %v5010_v20 = vpop.f32.mrb[181].mxu0 }
 0x42d   : > { %v4121_v13 = vmax.f32 %v4069_v45, 0.0  ;;  %v5011_v48 = vadd.f32 %v5010_v20, %v5009_v21  ;;  %v5012_v31 = vpop.f32.mrb[182].mxu0 }
 0x42e   : > { %v5013_v57 = vpop.f32.mrb[183].mxu0 }
 0x42f   : > { %v3913_v58 = vadd.f32 %v5011_v48, %v7392_v44  ;;  %v5014_v5 = vadd.f32 %v5013_v57, %v5012_v31  ;;  %v4140_v12 = vpack.c.bf16 %v4121_v13, %v4120_v42 }
 0x431   : > { %v4074_v22 = vadd.f32 %v7436_v32, %v3913_v58  ;;  %v3916_v34 = vadd.f32 %v5014_v5, %v7392_v44  ;;  %5495 = vmatprep.mubr.bf16.mxu1 %v4140_v12 }
 0x433   : > { %v4077_v59 = vadd.f32 %v7440_v51, %v3916_v34  ;;  %v5015_v1 = vpop.f32.mrb[184].mxu0  ;;  %v4122_v63 = vmax.f32 %v4074_v22, 0.0 }
 0x434   : > { %v5016_v41 = vpop.f32.mrb[185].mxu0 }
 0x435   : > { %v4123_v19 = vmax.f32 %v4077_v59, 0.0  ;;  %v5017_v49 = vadd.f32 %v5016_v41, %v5015_v1  ;;  %v5018_v43 = vpop.f32.mrb[186].mxu0 }
 0x436   : > { %v5019_v25 = vpop.f32.mrb[187].mxu0 }
 0x437   : > { %v3921_v30 = vadd.f32 %v5017_v49, %v7392_v44  ;;  %v5020_v23 = vadd.f32 %v5019_v25, %v5018_v43  ;;  %v4141_v11 = vpack.c.bf16 %v4123_v19, %v4122_v63 }
 0x439   : > { %v4082_v4 = vadd.f32 %v7450_v60, %v3921_v30  ;;  %v3924_v32 = vadd.f32 %v5020_v23, %v7392_v44  ;;  %5496 = vmatmul.mubr.bf16.gmra.mrb[184].mxu1 %v4141_v11 }
 0x43b   : > { %v4085_v6 = vadd.f32 %v7454_v55, %v3924_v32  ;;  %v5021_v37 = vpop.f32.mrb[188].mxu0  ;;  %v4124_v24 = vmax.f32 %v4082_v4, 0.0 }
 0x43c   : > { %v5022_v51 = vpop.f32.mrb[189].mxu0 }
 0x43d   : > { %v4125_v26 = vmax.f32 %v4085_v6, 0.0  ;;  %v5023_v36 = vadd.f32 %v5022_v51, %v5021_v37  ;;  %v5024_v27 = vpop.f32.mrb[190].mxu0 }
 0x43e   : > { %v5025_v17 = vpop.f32.mrb[191].mxu0 }
 0x43f   : > { %v3929_v39 = vadd.f32 %v5023_v36, %v7392_v44  ;;  %v5026_v40 = vadd.f32 %v5025_v17, %v5024_v27  ;;  %v4142_v2 = vpack.c.bf16 %v4125_v26, %v4124_v24 }
 0x441   : > { %v4090_v14 = vadd.f32 %v7447_v16, %v3929_v39  ;;  %v3932_v60 = vadd.f32 %v5026_v40, %v7392_v44  ;;  %5499 = vmatprep.mubr.bf16.mxu1 %v4142_v2 }
 0x443   : > { %v4093_v62 = vadd.f32 %v7452_v10, %v3932_v60  ;;  %v4126_v55 = vmax.f32 %v4090_v14, 0.0 }
 0x445   : > { %v4127_v18 = vmax.f32 %v4093_v62, 0.0 }
 0x447   : > { %v4143_v35 = vpack.c.bf16 %v4127_v18, %v4126_v55 }
 0x449   : > { %5500 = vmatmul.mubr.bf16.gmra.mrb[188].mxu1 %v4143_v35 }
 0x4a6   : > { %v5473_v44 = vpop.f32.mrb[160].mxu1 }
 0x4a7   : > { %v4258_v16 = vadd.f32 %v5473_v44, %v7497_v38  ;;  %v4249_v10 = vpop.f32.mrb[161].mxu1 }
 0x4a8   : > { %v4250_v15 = vadd.f32 %v7497_v38, %v4249_v10  ;;  %v5474_v50 = vpop.f32.mrb[162].mxu1 }
 0x4a9   : > { %4378 = vst.msk [vmem:[%s7502_s23 + $0x10] sm:$0xff] %vm2341_vm4, %v4258_v16  ;;  %v4261_v28 = vadd.f32 %v5474_v50, %v7497_v38  ;;  %v4252_v61 = vpop.f32.mrb[163].mxu1 }
 0x4aa   : > { %4376 = vst.msk [vmem:[%s7502_s23] sm:$0xff] %vm2341_vm4, %v4250_v15  ;;  %v4253_v56 = vadd.f32 %v7497_v38, %v4252_v61 }
 0x4ab   : > { %4379 = vst.msk [vmem:[%s7502_s23 + $0x18] sm:$0xff] %vm2341_vm4, %v4261_v28 }
 0x4ac   : > { %4377 = vst.msk [vmem:[%s7502_s23 + $0x8] sm:$0xff] %vm2341_vm4, %v4253_v56 }
 0x4b8   : > { %v5477_v53 = vpop.f32.mrb[164].mxu1 }
 0x4b9   : > { %v4274_v8 = vadd.f32 %v5477_v53, %v7497_v38  ;;  %v4265_v9 = vpop.f32.mrb[165].mxu1 }
 0x4ba   : > { %v4266_v46 = vadd.f32 %v7497_v38, %v4265_v9  ;;  %v5478_v54 = vpop.f32.mrb[166].mxu1 }
 0x4bb   : > { %4382 = vst.msk [vmem:[%s7502_s23 + $0x30] sm:$0xff] %vm2341_vm4, %v4274_v8  ;;  %v4277_v0 = vadd.f32 %v5478_v54, %v7497_v38  ;;  %v4268_v52 = vpop.f32.mrb[167].mxu1 }
 0x4bc   : > { %4380 = vst.msk [vmem:[%s7502_s23 + $0x20] sm:$0xff] %vm2341_vm4, %v4266_v46  ;;  %v4269_v3 = vadd.f32 %v7497_v38, %v4268_v52 }
 0x4bd   : > { %4383 = vst.msk [vmem:[%s7502_s23 + $0x38] sm:$0xff] %vm2341_vm4, %v4277_v0 }
 0x4be   : > { %4381 = vst.msk [vmem:[%s7502_s23 + $0x28] sm:$0xff] %vm2341_vm4, %v4269_v3 }
 0x4c8   : > { %v5481_v33 = vpop.f32.mrb[168].mxu1 }
 0x4c9   : > { %v4290_v47 = vadd.f32 %v5481_v33, %v7497_v38  ;;  %v4281_v29 = vpop.f32.mrb[169].mxu1 }
 0x4ca   : > { %v4282_v7 = vadd.f32 %v7497_v38, %v4281_v29  ;;  %v5482_v45 = vpop.f32.mrb[170].mxu1 }
 0x4cb   : > { %4386 = vst.msk [vmem:[%s7502_s23 + $0x50] sm:$0xff] %vm2341_vm4, %v4290_v47  ;;  %v4293_v21 = vadd.f32 %v5482_v45, %v7497_v38  ;;  %v4284_v20 = vpop.f32.mrb[171].mxu1 }
 0x4cc   : > { %4384 = vst.msk [vmem:[%s7502_s23 + $0x40] sm:$0xff] %vm2341_vm4, %v4282_v7  ;;  %v4285_v42 = vadd.f32 %v7497_v38, %v4284_v20 }
 0x4cd   : > { %4387 = vst.msk [vmem:[%s7502_s23 + $0x58] sm:$0xff] %vm2341_vm4, %v4293_v21 }
 0x4ce   : > { %4385 = vst.msk [vmem:[%s7502_s23 + $0x48] sm:$0xff] %vm2341_vm4, %v4285_v42 }
 0x4dc   : > { %v5485_v13 = vpop.f32.mrb[172].mxu1 }
 0x4dd   : > { %v4306_v48 = vadd.f32 %v5485_v13, %v7497_v38  ;;  %v4297_v31 = vpop.f32.mrb[173].mxu1 }
 0x4de   : > { %v4298_v57 = vadd.f32 %v7497_v38, %v4297_v31  ;;  %v5486_v58 = vpop.f32.mrb[174].mxu1 }
 0x4df   : > { %4390 = vst.msk [vmem:[%s7502_s23 + $0x70] sm:$0xff] %vm2341_vm4, %v4306_v48  ;;  %v4309_v5 = vadd.f32 %v5486_v58, %v7497_v38  ;;  %v4300_v12 = vpop.f32.mrb[175].mxu1 }
 0x4e0   : > { %4388 = vst.msk [vmem:[%s7502_s23 + $0x60] sm:$0xff] %vm2341_vm4, %v4298_v57  ;;  %v4301_v22 = vadd.f32 %v7497_v38, %v4300_v12 }
 0x4e1   : > { %4391 = vst.msk [vmem:[%s7502_s23 + $0x78] sm:$0xff] %vm2341_vm4, %v4309_v5 }
 0x4e2   : > { %4389 = vst.msk [vmem:[%s7502_s23 + $0x68] sm:$0xff] %vm2341_vm4, %v4301_v22 }
 0x4ec   : > { %v5489_v34 = vpop.f32.mrb[176].mxu1 }
 0x4ed   : > { %v4322_v59 = vadd.f32 %v5489_v34, %v7497_v38  ;;  %v4313_v1 = vpop.f32.mrb[177].mxu1 }
 0x4ee   : > { %v4314_v41 = vadd.f32 %v7497_v38, %v4313_v1  ;;  %v5490_v63 = vpop.f32.mrb[178].mxu1 }
 0x4ef   : > { %4394 = vst.msk [vmem:[%s7502_s23 + $0x90] sm:$0xff] %vm2341_vm4, %v4322_v59  ;;  %v4325_v19 = vadd.f32 %v5490_v63, %v7497_v38  ;;  %v4316_v49 = vpop.f32.mrb[179].mxu1 }
 0x4f0   : > { %4392 = vst.msk [vmem:[%s7502_s23 + $0x80] sm:$0xff] %vm2341_vm4, %v4314_v41  ;;  %v4317_v43 = vadd.f32 %v7497_v38, %v4316_v49 }
 0x4f1   : > { %4395 = vst.msk [vmem:[%s7502_s23 + $0x98] sm:$0xff] %vm2341_vm4, %v4325_v19 }
 0x4f2   : > { %4393 = vst.msk [vmem:[%s7502_s23 + $0x88] sm:$0xff] %vm2341_vm4, %v4317_v43 }
 0x4fc   : > { %v5493_v25 = vpop.f32.mrb[180].mxu1 }
 0x4fd   : > { %v4338_v30 = vadd.f32 %v5493_v25, %v7497_v38  ;;  %v4329_v23 = vpop.f32.mrb[181].mxu1 }
 0x4fe   : > { %v4330_v11 = vadd.f32 %v7497_v38, %v4329_v23  ;;  %v5494_v4 = vpop.f32.mrb[182].mxu1 }
 0x4ff   : > { %4398 = vst.msk [vmem:[%s7502_s23 + $0xb0] sm:$0xff] %vm2341_vm4, %v4338_v30  ;;  %v4341_v32 = vadd.f32 %v5494_v4, %v7497_v38  ;;  %v4332_v6 = vpop.f32.mrb[183].mxu1 }
 0x500   : > { %4396 = vst.msk [vmem:[%s7502_s23 + $0xa0] sm:$0xff] %vm2341_vm4, %v4330_v11  ;;  %v4333_v37 = vadd.f32 %v7497_v38, %v4332_v6 }
 0x501   : > { %4399 = vst.msk [vmem:[%s7502_s23 + $0xb8] sm:$0xff] %vm2341_vm4, %v4341_v32 }
 0x502   : > { %4397 = vst.msk [vmem:[%s7502_s23 + $0xa8] sm:$0xff] %vm2341_vm4, %v4333_v37 }
 0x50c   : > { %v5497_v51 = vpop.f32.mrb[184].mxu1 }
 0x50d   : > { %v4354_v24 = vadd.f32 %v5497_v51, %v7497_v38  ;;  %v4345_v26 = vpop.f32.mrb[185].mxu1 }
 0x50e   : > { %v4346_v36 = vadd.f32 %v7497_v38, %v4345_v26  ;;  %v5498_v27 = vpop.f32.mrb[186].mxu1 }
 0x50f   : > { %4402 = vst.msk [vmem:[%s7502_s23 + $0xd0] sm:$0xff] %vm2341_vm4, %v4354_v24  ;;  %v4357_v17 = vadd.f32 %v5498_v27, %v7497_v38  ;;  %v4348_v39 = vpop.f32.mrb[187].mxu1 }
 0x510   : > { %4400 = vst.msk [vmem:[%s7502_s23 + $0xc0] sm:$0xff] %vm2341_vm4, %v4346_v36  ;;  %v4349_v40 = vadd.f32 %v7497_v38, %v4348_v39 }
 0x511   : > { %4403 = vst.msk [vmem:[%s7502_s23 + $0xd8] sm:$0xff] %vm2341_vm4, %v4357_v17 }
 0x512   : > { %4401 = vst.msk [vmem:[%s7502_s23 + $0xc8] sm:$0xff] %vm2341_vm4, %v4349_v40 }
 0x51c   : > { %v5501_v2 = vpop.f32.mrb[188].mxu1 }
 0x51d   : > { %v4370_v14 = vadd.f32 %v5501_v2, %v7497_v38  ;;  %v4361_v60 = vpop.f32.mrb[189].mxu1 }
 0x51e   : > { %v4362_v62 = vadd.f32 %v7497_v38, %v4361_v60  ;;  %v5502_v55 = vpop.f32.mrb[190].mxu1 }
 0x51f   : > { %4406 = vst.msk [vmem:[%s7502_s23 + $0xf0] sm:$0xff] %vm2341_vm4, %v4370_v14  ;;  %v4373_v18 = vadd.f32 %v5502_v55, %v7497_v38  ;;  %v4364_v35 = vpop.f32.mrb[191].mxu1 }
 0x520   : > { %4404 = vst.msk [vmem:[%s7502_s23 + $0xe0] sm:$0xff] %vm2341_vm4, %v4362_v62  ;;  %v4365_v44 = vadd.f32 %v7497_v38, %v4364_v35 }
 0x521   : > { %4407 = vst.msk [vmem:[%s7502_s23 + $0xf8] sm:$0xff] %vm2341_vm4, %v4373_v18 }
 0x522   : > { %4405 = vst.msk [vmem:[%s7502_s23 + $0xe8] sm:$0xff] %vm2341_vm4, %v4365_v44 }
 0x523 PF: > { %p16_p9 = scmp.ge.s32.totalorder %s5664_s13, 4   ;;  %s7731_s30 = smov %s5590_s10 }
 0x524   : > { %s7732_s10 = smov %s5673_s16  ;;  %s7733_s11 = smov %s5664_s13 }
 0x525   :  { %18 = sbr.rel (!%p16_p9) target bundleno = 2 (0x2), region = 129 }

</bundles_post_ra>
